<compile_context>
chip_gen: v7x
topology: tpu7x:2x2x1
jax: 0.10.0
libtpu: 0.0.40
codegen_flags: <defaults>
</compile_context>

<pallas_src>
import functools

import jax
import jax.numpy as jnp
from jax.experimental import pallas as pl
from jax.experimental.pallas import tpu as pltpu


_TOL = 1e-1  # bf16 MXU operands vs f32 reference


def _round_up(x, m):
    return (x + m - 1) // m * m


def _vmem_limit_bytes():
    """Generation-aware VMEM limit (v5e/v6e: 128 MiB physical, v7x: 64 MiB per TC)."""
    try:
        cap = getattr(pltpu.get_tpu_info(), "vmem_capacity_bytes", None)
    except Exception:
        cap = None
    if not cap:
        cap = 64 * 1024 * 1024
    return min(int(cap) * 3 // 4, 100 * 1024 * 1024)


# ---------------------------------------------------------------------------
# In-kernel conv: one 3x3 "same" layer == one K=9*Cin MXU matmul
# ---------------------------------------------------------------------------

def _conv3x3(inputs, w_ref, b_ref, stage_ref, offsets, *, relu, mask=None):
    """3x3 'same' conv in the flattened-halo layout as a single MXU matmul.

    inputs:    list of (Ci, Ppad) f32 arrays; halo/pad lanes must already be zero.
    w_ref:     (Cout, 9*Cin) bf16; column k = tap*Cin + c, tap = ky*3 + kx
               (cross-correlation, matching nn.Conv2d).
    b_ref:     (Cout, 1) f32.
    stage_ref: (>= 9*Cin, Ppad) f32 VMEM scratch; taps staged as sublane slices.
    offsets:   static flat-pixel tap offsets ((ky-1)*Wp + (kx-1)).
    mask:      optional (1, Ppad) interior mask re-zeroing the halo lanes of the output.
    """
    cin = sum(int(a.shape[0]) for a in inputs)
    for tap, off in enumerate(offsets):
        row = tap * cin
        for a in inputs:
            ci = int(a.shape[0])
            # shifted[:, p] == a[:, p + off]; interior pixels never wrap thanks to the
            # zero halo, so this is exactly the zero-padded 'same' tap.
            shifted = a if off == 0 else jnp.roll(a, -off, axis=1)
            stage_ref[row:row + ci, :] = shifted
            row += ci
    xs = stage_ref[0:9 * cin, :].astype(jnp.bfloat16)
    out = jnp.dot(w_ref[...], xs, preferred_element_type=jnp.float32)
    out = out + b_ref[...]
    if relu:
        out = jnp.maximum(out, 0.0)
    if mask is not None:
        out = out * mask
    return out


# ---------------------------------------------------------------------------
# Fused kernels (one grid step = one image)
# ---------------------------------------------------------------------------

def _fullnet_kernel(mask_ref, x_ref,
                    tw1, tb1, tw2, tb2, tw3, tb3,
                    mw1, mb1, mw2, mb2, mw3, mb3,
                    out_ref, stage_ref, *, offsets):
    mask = mask_ref[...]                       # (1, Ppad) f32 interior mask
    x = x_ref[0]                               # (3, Ppad) f32, zero halo from host

    # ---- t_net ----
    h = _conv3x3([x], tw1, tb1, stage_ref, offsets, relu=True, mask=mask)
    h = _conv3x3([h], tw2, tb2, stage_ref, offsets, relu=True, mask=mask)
    logits = _conv3x3([h], tw3, tb3, stage_ref, offsets, relu=False)     # (3, Ppad)

    # ---- channel softmax (3 channels on sublanes), kept entirely in VMEM ----
    m = jnp.max(logits, axis=0, keepdims=True)
    e = jnp.exp(logits - m)
    s = jnp.sum(e, axis=0, keepdims=True)
    ts = (e * pl.reciprocal(s, approx=True)) * mask   # re-zero halo before m_net

    # ---- m_net on (x ++ trimap_softmax); channels staged per-tap, no concat ----
    h = _conv3x3([x, ts], mw1, mb1, stage_ref, offsets, relu=True, mask=mask)
    h = _conv3x3([h], mw2, mb2, stage_ref, offsets, relu=True, mask=mask)
    alpha_r = _conv3x3([h], mw3, mb3, stage_ref, offsets, relu=False)    # (1, Ppad)

    # ---- fused alpha_p = fg + unsure * alpha_r (channels: 0=bg, 1=unsure, 2=fg) ----
    alpha_p = ts[2:3] + ts[1:2] * alpha_r

    # packed lane-dense writeback: [logits(3) | alpha_r | alpha_p]
    out_ref[0, 0:3, :] = logits
    out_ref[0, 3:4, :] = alpha_r
    out_ref[0, 4:5, :] = alpha_p


def _mnet_kernel(mask_ref, x_ref, ts_ref,
                 mw1, mb1, mw2, mb2, mw3, mb3,
                 out_ref, stage_ref, *, offsets):
    mask = mask_ref[...]
    x = x_ref[0]                               # (3, Ppad)
    ts = ts_ref[0]                             # (3, Ppad), zero halo from host
    h = _conv3x3([x, ts], mw1, mb1, stage_ref, offsets, relu=True, mask=mask)
    h = _conv3x3([h], mw2, mb2, stage_ref, offsets, relu=True, mask=mask)
    alpha_r = _conv3x3([h], mw3, mb3, stage_ref, offsets, relu=False)
    alpha_p = ts[2:3] + ts[1:2] * alpha_r
    out_ref[0, 0:1, :] = alpha_r
    out_ref[0, 1:2, :] = alpha_p


# ---------------------------------------------------------------------------
# pallas_call wrappers
# ---------------------------------------------------------------------------

def _const_spec(shape):
    return pl.BlockSpec(shape, lambda n, _r=len(shape): (0,) * _r)


def _layer_params(w_oihw, b):
    """(Cout, Cin, 3, 3) f32 -> ((Cout, 9*Cin) bf16 matrix, (Cout, 1) f32 bias)."""
    cout, cin = w_oihw.shape[0], w_oihw.shape[1]
    w_mat = jnp.transpose(w_oihw, (0, 2, 3, 1)).reshape(cout, 9 * cin)
    return w_mat.astype(jnp.bfloat16), b.reshape(cout, 1).astype(jnp.float32)


def _tap_offsets(Wp):
    return tuple((ky - 1) * Wp + (kx - 1) for ky in range(3) for kx in range(3))


def _compiler_params(vmem_limit):
    return pltpu.CompilerParams(dimension_semantics=("parallel",),
                                vmem_limit_bytes=vmem_limit)


def _fullnet_apply(params, x_flat, mask, Wp, hidden, vmem_limit):
    N, _, Ppad = x_flat.shape
    layers = [_layer_params(w, b) for (w, b) in params["t_net"] + params["m_net"]]
    flat = [p for layer in layers for p in layer]
    kernel = functools.partial(_fullnet_kernel, offsets=_tap_offsets(Wp))
    in_specs = ([_const_spec(mask.shape),
                 pl.BlockSpec((1, 3, Ppad), lambda n: (n, 0, 0))]
                + [_const_spec(p.shape) for p in flat])
    return pl.pallas_call(
        kernel,
        out_shape=jax.ShapeDtypeStruct((N, 5, Ppad), jnp.float32),
        grid=(N,),
        in_specs=in_specs,
        out_specs=pl.BlockSpec((1, 5, Ppad), lambda n: (n, 0, 0)),
        scratch_shapes=[pltpu.VMEM((9 * max(hidden, 6), Ppad), jnp.float32)],
        compiler_params=_compiler_params(vmem_limit),
    )(mask, x_flat, *flat)


def _mnet_apply(m_params, x_flat, ts_flat, mask, Wp, hidden, vmem_limit):
    N, _, Ppad = x_flat.shape
    layers = [_layer_params(w, b) for (w, b) in m_params]
    flat = [p for layer in layers for p in layer]
    kernel = functools.partial(_mnet_kernel, offsets=_tap_offsets(Wp))
    in_specs = ([_const_spec(mask.shape),
                 pl.BlockSpec((1, 3, Ppad), lambda n: (n, 0, 0)),
                 pl.BlockSpec((1, 3, Ppad), lambda n: (n, 0, 0))]
                + [_const_spec(p.shape) for p in flat])
    return pl.pallas_call(
        kernel,
        out_shape=jax.ShapeDtypeStruct((N, 2, Ppad), jnp.float32),
        grid=(N,),
        in_specs=in_specs,
        out_specs=pl.BlockSpec((1, 2, Ppad), lambda n: (n, 0, 0)),
        scratch_shapes=[pltpu.VMEM((9 * max(hidden, 6), Ppad), jnp.float32)],
        compiler_params=_compiler_params(vmem_limit),
    )(mask, x_flat, ts_flat, *flat)


# ---------------------------------------------------------------------------
# FullNet forward (kernel path)
# ---------------------------------------------------------------------------

def full_net_forward(params, x_nchw, trimap_ideal=None):
    """Mirrors FullNet.forward; returns (trimap, alpha_p, alpha_r) in NCHW."""
    N, C, H, W = x_nchw.shape
    hidden = params["t_net"][0][0].shape[0]
    Hp, Wp = H + 2, W + 2                      # 1-pixel zero halo on every side
    Pp = Hp * Wp
    Ppad = _round_up(Pp, 128)

    vmem_limit = _vmem_limit_bytes()
    # Budget: double-buffered in/out blocks + f32 tap-staging scratch + live f32
    # temporaries; weights/biases are tiny (folded into the 2 MiB slack term).
    est = Ppad * 4 * (2 * (3 + 3 + 1) + 2 * 5 + 9 * max(hidden, 6) + 16 * hidden) \
        + (2 << 20)
    assert est <= vmem_limit, (
        f"image too large for whole-image fused kernels (~{est >> 20} MiB > "
        f"{vmem_limit >> 20} MiB VMEM); TODO(synk): spatial row tiling")

    def to_flat(a_nchw):
        a = jnp.pad(a_nchw, ((0, 0), (0, 0), (1, 1), (1, 1)))
        a = a.reshape(N, a.shape[1], Pp)
        if Ppad != Pp:
            a = jnp.pad(a, ((0, 0), (0, 0), (0, Ppad - Pp)))
        return a

    def from_flat(a_flat):
        c = a_flat.shape[1]
        return a_flat[:, :, :Pp].reshape(N, c, Hp, Wp)[:, :, 1:H + 1, 1:W + 1]

    x_flat = to_flat(x_nchw)

    lane = jnp.arange(Ppad, dtype=jnp.int32)
    row, col = lane // Wp, lane % Wp
    interior = (lane < Pp) & (row >= 1) & (row <= H) & (col >= 1) & (col <= W)
    mask = interior.astype(jnp.float32).reshape(1, Ppad)

    # NOTE: reference builds fg_img = cat((fg[0],)*3) but never uses it -- omitted.
    if trimap_ideal is None:
        packed = _fullnet_apply(params, x_flat, mask, Wp, hidden, vmem_limit)
        trimap = from_flat(packed[:, 0:3])
        alpha_r = from_flat(packed[:, 3:4])
        alpha_p = from_flat(packed[:, 4:5])
    else:
        packed = _mnet_apply(params["m_net"], x_flat, to_flat(trimap_ideal), mask,
                             Wp, hidden, vmem_limit)
        trimap = trimap_ideal
        alpha_r = from_flat(packed[:, 0:1])
        alpha_p = from_flat(packed[:, 1:2])
    return trimap, alpha_p, alpha_r


# ---------------------------------------------------------------------------
# Pure-JAX f32 reference (for correctness verification)
# ---------------------------------------------------------------------------

def _conv3x3_ref(x, w, b):
    out = jax.lax.conv_general_dilated(
        x, w, window_strides=(1, 1), padding=((1, 1), (1, 1)),
        dimension_numbers=("NCHW", "OIHW", "NCHW"),
        precision=jax.lax.Precision.HIGHEST)
    return out + b.reshape(1, -1, 1, 1)


def _stack_ref(layers, x):
    n = len(layers)
    for i, (w, b) in enumerate(layers):
        x = _conv3x3_ref(x, w, b)
        if i < n - 1:
            x = jnp.maximum(x, 0.0)
    return x


def full_net_reference(params, x, trimap_ideal=None):
    if trimap_ideal is None:
        trimap = _stack_ref(params["t_net"], x)
        ts = jax.nn.softmax(trimap, axis=1)
    else:
        trimap = trimap_ideal
        ts = trimap_ideal
    unsure, fg = ts[:, 1:2], ts[:, 2:3]
    alpha_r = _stack_ref(params["m_net"], jnp.concatenate([x, ts], axis=1))
    alpha_p = fg + unsure * alpha_r
    return trimap, alpha_p, alpha_r


# ---------------------------------------------------------------------------
# Parameters (deterministic init, OIHW like PyTorch)
# ---------------------------------------------------------------------------

def init_params(key, hidden=16):
    keys = jax.random.split(key, 6)

    def conv(k, cin, cout):
        k1, k2 = jax.random.split(k)
        w = jax.random.normal(k1, (cout, cin, 3, 3), jnp.float32) / jnp.sqrt(9.0 * cin)
        b = 0.01 * jax.random.normal(k2, (cout,), jnp.float32)
        return w, b

    t_net = [conv(keys[0], 3, hidden), conv(keys[1], hidden, hidden), conv(keys[2], hidden, 3)]
    m_net = [conv(keys[3], 6, hidden), conv(keys[4], hidden, hidden), conv(keys[5], hidden, 1)]
    return {"t_net": t_net, "m_net": m_net}


# ---------------------------------------------------------------------------

if __name__ == "__main__":
    key = jax.random.PRNGKey(0)
    pkey, xkey = jax.random.split(key)
    params = init_params(pkey, hidden=16)

    # small RGB input, NCHW like the PyTorch module
    x = jax.random.normal(xkey, (2, 3, 16, 16), jnp.float32)

    fwd = jax.jit(full_net_forward)
    trimap, alpha_p, alpha_r = fwd(params, x)
    jax.block_until_ready((trimap, alpha_p, alpha_r))

    assert trimap.shape == (2, 3, 16, 16)
    assert alpha_p.shape == (2, 1, 16, 16)
    assert alpha_r.shape == (2, 1, 16, 16)

    def _check(name, got, ref):
        assert bool(jnp.all(jnp.isfinite(got))), f"{name}: non-finite values"
        err = float(jnp.max(jnp.abs(got - ref)))
        assert err < _TOL, f"{name}: max abs err {err}"

    # path 1: predicted trimap (fully fused t_net -> softmax -> m_net -> alpha)
    r_trimap, r_alpha_p, r_alpha_r = full_net_reference(params, x)
    _check("trimap", trimap, r_trimap)
    _check("alpha_p", alpha_p, r_alpha_p)
    _check("alpha_r", alpha_r, r_alpha_r)

    # path 2: trimap_ideal provided (skips t_net, exercises the m_net-only kernel)
    ti = jax.nn.softmax(
        jax.random.normal(jax.random.PRNGKey(42), (2, 3, 16, 16), jnp.float32), axis=1)
    trimap2, alpha_p2, alpha_r2 = fwd(params, x, ti)
    jax.block_until_ready((trimap2, alpha_p2, alpha_r2))
    r_trimap2, r_alpha_p2, r_alpha_r2 = full_net_reference(params, x, ti)
    _check("trimap(ideal)", trimap2, r_trimap2)
    _check("alpha_p(ideal)", alpha_p2, r_alpha_p2)
    _check("alpha_r(ideal)", alpha_r2, r_alpha_r2)

    print("KERNEL_OK")
</pallas_src>

<mosaic_0001>
module attributes {stable_mosaic.version = 11 : i64} {
  func.func @_fullnet_kernel(%arg0: i32, %arg1: memref<1x384xf32, #tpu.memory_space<vmem>>, %arg2: memref<1x3x384xf32, #tpu.memory_space<vmem>>, %arg3: memref<16x27xbf16, #tpu.memory_space<vmem>>, %arg4: memref<16x1xf32, #tpu.memory_space<vmem>>, %arg5: memref<16x144xbf16, #tpu.memory_space<vmem>>, %arg6: memref<16x1xf32, #tpu.memory_space<vmem>>, %arg7: memref<3x144xbf16, #tpu.memory_space<vmem>>, %arg8: memref<3x1xf32, #tpu.memory_space<vmem>>, %arg9: memref<16x54xbf16, #tpu.memory_space<vmem>>, %arg10: memref<16x1xf32, #tpu.memory_space<vmem>>, %arg11: memref<16x144xbf16, #tpu.memory_space<vmem>>, %arg12: memref<16x1xf32, #tpu.memory_space<vmem>>, %arg13: memref<1x144xbf16, #tpu.memory_space<vmem>>, %arg14: memref<1x1xf32, #tpu.memory_space<vmem>>, %arg15: memref<1x5x384xf32, #tpu.memory_space<vmem>>, %arg16: memref<144x384xf32, #tpu.memory_space<vmem>>) attributes {dimension_semantics = [#tpu.dimension_semantics<parallel>], iteration_bounds = array<i64: 2>, scalar_prefetch = 0 : i64, scratch_operands = 1 : i64, tpu.core_type = #tpu.core_type<tc>, window_params = [{pipeline_mode = #tpu.pipeline_mode<synchronous>, transform_indices = @transform_0, window_bounds = array<i64: 1, 384>}, {transform_indices = @transform_1, window_bounds = array<i64: 1, 3, 384>}, {pipeline_mode = #tpu.pipeline_mode<synchronous>, transform_indices = @transform_2, window_bounds = array<i64: 16, 27>}, {pipeline_mode = #tpu.pipeline_mode<synchronous>, transform_indices = @transform_3, window_bounds = array<i64: 16, 1>}, {pipeline_mode = #tpu.pipeline_mode<synchronous>, transform_indices = @transform_4, window_bounds = array<i64: 16, 144>}, {pipeline_mode = #tpu.pipeline_mode<synchronous>, transform_indices = @transform_5, window_bounds = array<i64: 16, 1>}, {pipeline_mode = #tpu.pipeline_mode<synchronous>, transform_indices = @transform_6, window_bounds = array<i64: 3, 144>}, {pipeline_mode = #tpu.pipeline_mode<synchronous>, transform_indices = @transform_7, window_bounds = array<i64: 3, 1>}, {pipeline_mode = #tpu.pipeline_mode<synchronous>, transform_indices = @transform_8, window_bounds = array<i64: 16, 54>}, {pipeline_mode = #tpu.pipeline_mode<synchronous>, transform_indices = @transform_9, window_bounds = array<i64: 16, 1>}, {pipeline_mode = #tpu.pipeline_mode<synchronous>, transform_indices = @transform_10, window_bounds = array<i64: 16, 144>}, {pipeline_mode = #tpu.pipeline_mode<synchronous>, transform_indices = @transform_11, window_bounds = array<i64: 16, 1>}, {pipeline_mode = #tpu.pipeline_mode<synchronous>, transform_indices = @transform_12, window_bounds = array<i64: 1, 144>}, {pipeline_mode = #tpu.pipeline_mode<synchronous>, transform_indices = @transform_13, window_bounds = array<i64: 1, 1>}, {transform_indices = @transform_14, window_bounds = array<i64: 1, 5, 384>}]} {
    %c0 = arith.constant 0 : index
    %c0_0 = arith.constant 0 : index
    %0 = vector.load %arg1[%c0, %c0_0] : memref<1x384xf32, #tpu.memory_space<vmem>>, vector<1x384xf32>
    %c0_1 = arith.constant 0 : index
    %c0_2 = arith.constant 0 : index
    %c0_3 = arith.constant 0 : index
    %1 = vector.load %arg2[%c0_1, %c0_2, %c0_3] : memref<1x3x384xf32, #tpu.memory_space<vmem>>, vector<1x3x384xf32>
    %2 = vector.shape_cast %1 : vector<1x3x384xf32> to vector<3x384xf32>
    %3 = vector.extract_strided_slice %2 {offsets = [0, 365], sizes = [3, 19], strides = [1, 1]} : vector<3x384xf32> to vector<3x19xf32>
    %4 = vector.extract_strided_slice %2 {offsets = [0, 0], sizes = [3, 365], strides = [1, 1]} : vector<3x384xf32> to vector<3x365xf32>
    %5 = tpu.concatenate %3, %4 in 1 : vector<3x19xf32>, vector<3x365xf32> -> vector<3x384xf32>
    %c0_4 = arith.constant 0 : index
    %c0_5 = arith.constant 0 : index
    %6 = vector.load %arg16[%c0_4, %c0_5] : memref<144x384xf32, #tpu.memory_space<vmem>>, vector<3x384xf32>
    tpu.vector_store %arg16[%c0_4, %c0_5], %5 {strides = array<i32>} : memref<144x384xf32, #tpu.memory_space<vmem>>, vector<3x384xf32>,
    %7 = vector.extract_strided_slice %2 {offsets = [0, 366], sizes = [3, 18], strides = [1, 1]} : vector<3x384xf32> to vector<3x18xf32>
    %8 = vector.extract_strided_slice %2 {offsets = [0, 0], sizes = [3, 366], strides = [1, 1]} : vector<3x384xf32> to vector<3x366xf32>
    %9 = tpu.concatenate %7, %8 in 1 : vector<3x18xf32>, vector<3x366xf32> -> vector<3x384xf32>
    %c3 = arith.constant 3 : index
    %c0_6 = arith.constant 0 : index
    %10 = vector.load %arg16[%c3, %c0_6] : memref<144x384xf32, #tpu.memory_space<vmem>>, vector<3x384xf32>
    tpu.vector_store %arg16[%c3, %c0_6], %9 {strides = array<i32>} : memref<144x384xf32, #tpu.memory_space<vmem>>, vector<3x384xf32>,
    %11 = vector.extract_strided_slice %2 {offsets = [0, 367], sizes = [3, 17], strides = [1, 1]} : vector<3x384xf32> to vector<3x17xf32>
    %12 = vector.extract_strided_slice %2 {offsets = [0, 0], sizes = [3, 367], strides = [1, 1]} : vector<3x384xf32> to vector<3x367xf32>
    %13 = tpu.concatenate %11, %12 in 1 : vector<3x17xf32>, vector<3x367xf32> -> vector<3x384xf32>
    %c6 = arith.constant 6 : index
    %c0_7 = arith.constant 0 : index
    %14 = vector.load %arg16[%c6, %c0_7] : memref<144x384xf32, #tpu.memory_space<vmem>>, vector<3x384xf32>
    tpu.vector_store %arg16[%c6, %c0_7], %13 {strides = array<i32>} : memref<144x384xf32, #tpu.memory_space<vmem>>, vector<3x384xf32>,
    %15 = vector.extract_strided_slice %2 {offsets = [0, 383], sizes = [3, 1], strides = [1, 1]} : vector<3x384xf32> to vector<3x1xf32>
    %16 = vector.extract_strided_slice %2 {offsets = [0, 0], sizes = [3, 383], strides = [1, 1]} : vector<3x384xf32> to vector<3x383xf32>
    %17 = tpu.concatenate %15, %16 in 1 : vector<3x1xf32>, vector<3x383xf32> -> vector<3x384xf32>
    %c9 = arith.constant 9 : index
    %c0_8 = arith.constant 0 : index
    %18 = vector.load %arg16[%c9, %c0_8] : memref<144x384xf32, #tpu.memory_space<vmem>>, vector<3x384xf32>
    tpu.vector_store %arg16[%c9, %c0_8], %17 {strides = array<i32>} : memref<144x384xf32, #tpu.memory_space<vmem>>, vector<3x384xf32>,
    %c12 = arith.constant 12 : index
    %c0_9 = arith.constant 0 : index
    %19 = vector.load %arg16[%c12, %c0_9] : memref<144x384xf32, #tpu.memory_space<vmem>>, vector<3x384xf32>
    tpu.vector_store %arg16[%c12, %c0_9], %2 {strides = array<i32>} : memref<144x384xf32, #tpu.memory_space<vmem>>, vector<3x384xf32>,
    %20 = vector.extract_strided_slice %2 {offsets = [0, 1], sizes = [3, 383], strides = [1, 1]} : vector<3x384xf32> to vector<3x383xf32>
    %21 = vector.extract_strided_slice %2 {offsets = [0, 0], sizes = [3, 1], strides = [1, 1]} : vector<3x384xf32> to vector<3x1xf32>
    %22 = tpu.concatenate %20, %21 in 1 : vector<3x383xf32>, vector<3x1xf32> -> vector<3x384xf32>
    %c15 = arith.constant 15 : index
    %c0_10 = arith.constant 0 : index
    %23 = vector.load %arg16[%c15, %c0_10] : memref<144x384xf32, #tpu.memory_space<vmem>>, vector<3x384xf32>
    tpu.vector_store %arg16[%c15, %c0_10], %22 {strides = array<i32>} : memref<144x384xf32, #tpu.memory_space<vmem>>, vector<3x384xf32>,
    %24 = vector.extract_strided_slice %2 {offsets = [0, 17], sizes = [3, 367], strides = [1, 1]} : vector<3x384xf32> to vector<3x367xf32>
    %25 = vector.extract_strided_slice %2 {offsets = [0, 0], sizes = [3, 17], strides = [1, 1]} : vector<3x384xf32> to vector<3x17xf32>
    %26 = tpu.concatenate %24, %25 in 1 : vector<3x367xf32>, vector<3x17xf32> -> vector<3x384xf32>
    %c18 = arith.constant 18 : index
    %c0_11 = arith.constant 0 : index
    %27 = vector.load %arg16[%c18, %c0_11] : memref<144x384xf32, #tpu.memory_space<vmem>>, vector<3x384xf32>
    tpu.vector_store %arg16[%c18, %c0_11], %26 {strides = array<i32>} : memref<144x384xf32, #tpu.memory_space<vmem>>, vector<3x384xf32>,
    %28 = vector.extract_strided_slice %2 {offsets = [0, 18], sizes = [3, 366], strides = [1, 1]} : vector<3x384xf32> to vector<3x366xf32>
    %29 = vector.extract_strided_slice %2 {offsets = [0, 0], sizes = [3, 18], strides = [1, 1]} : vector<3x384xf32> to vector<3x18xf32>
    %30 = tpu.concatenate %28, %29 in 1 : vector<3x366xf32>, vector<3x18xf32> -> vector<3x384xf32>
    %c21 = arith.constant 21 : index
    %c0_12 = arith.constant 0 : index
    %31 = vector.load %arg16[%c21, %c0_12] : memref<144x384xf32, #tpu.memory_space<vmem>>, vector<3x384xf32>
    tpu.vector_store %arg16[%c21, %c0_12], %30 {strides = array<i32>} : memref<144x384xf32, #tpu.memory_space<vmem>>, vector<3x384xf32>,
    %32 = vector.extract_strided_slice %2 {offsets = [0, 19], sizes = [3, 365], strides = [1, 1]} : vector<3x384xf32> to vector<3x365xf32>
    %33 = vector.extract_strided_slice %2 {offsets = [0, 0], sizes = [3, 19], strides = [1, 1]} : vector<3x384xf32> to vector<3x19xf32>
    %34 = tpu.concatenate %32, %33 in 1 : vector<3x365xf32>, vector<3x19xf32> -> vector<3x384xf32>
    %c24 = arith.constant 24 : index
    %c0_13 = arith.constant 0 : index
    %35 = vector.load %arg16[%c24, %c0_13] : memref<144x384xf32, #tpu.memory_space<vmem>>, vector<3x384xf32>
    tpu.vector_store %arg16[%c24, %c0_13], %34 {strides = array<i32>} : memref<144x384xf32, #tpu.memory_space<vmem>>, vector<3x384xf32>,
    %c0_14 = arith.constant 0 : index
    %c0_15 = arith.constant 0 : index
    %36 = vector.load %arg16[%c0_14, %c0_15] : memref<144x384xf32, #tpu.memory_space<vmem>>, vector<27x384xf32>
    %37 = arith.truncf %36 : vector<27x384xf32> to vector<27x384xbf16>
    %c0_16 = arith.constant 0 : index
    %c0_17 = arith.constant 0 : index
    %38 = vector.load %arg3[%c0_16, %c0_17] : memref<16x27xbf16, #tpu.memory_space<vmem>>, vector<16x27xbf16>
    %cst = arith.constant dense<0.000000e+00> : vector<16x384xf32>
    %39 = tpu.matmul %38, %37, %cst {dimension_numbers = #tpu.dot_dimension_numbers<[1], [0], [0], [1], [0, 0, 1, 1], [], []>} : vector<16x27xbf16>, vector<27x384xbf16>, vector<16x384xf32> -> vector<16x384xf32>
    %c0_18 = arith.constant 0 : index
    %c0_19 = arith.constant 0 : index
    %40 = vector.load %arg4[%c0_18, %c0_19] : memref<16x1xf32, #tpu.memory_space<vmem>>, vector<16x1xf32>
    %41 = vector.broadcast %40 : vector<16x1xf32> to vector<16x384xf32>
    %42 = arith.addf %39, %41 : vector<16x384xf32>
    %cst_20 = arith.constant 0.000000e+00 : f32
    %43 = vector.broadcast %cst_20 : f32 to vector<16x384xf32>
    %44 = arith.maximumf %42, %43 : vector<16x384xf32>
    %45 = vector.broadcast %0 : vector<1x384xf32> to vector<16x384xf32>
    %46 = arith.mulf %44, %45 : vector<16x384xf32>
    %47 = vector.extract_strided_slice %46 {offsets = [0, 365], sizes = [16, 19], strides = [1, 1]} : vector<16x384xf32> to vector<16x19xf32>
    %48 = vector.extract_strided_slice %46 {offsets = [0, 0], sizes = [16, 365], strides = [1, 1]} : vector<16x384xf32> to vector<16x365xf32>
    %49 = tpu.concatenate %47, %48 in 1 : vector<16x19xf32>, vector<16x365xf32> -> vector<16x384xf32>
    %c0_21 = arith.constant 0 : index
    %c0_22 = arith.constant 0 : index
    %50 = vector.load %arg16[%c0_21, %c0_22] : memref<144x384xf32, #tpu.memory_space<vmem>>, vector<16x384xf32>
    tpu.vector_store %arg16[%c0_21, %c0_22], %49 {strides = array<i32>} : memref<144x384xf32, #tpu.memory_space<vmem>>, vector<16x384xf32>,
    %51 = vector.extract_strided_slice %46 {offsets = [0, 366], sizes = [16, 18], strides = [1, 1]} : vector<16x384xf32> to vector<16x18xf32>
    %52 = vector.extract_strided_slice %46 {offsets = [0, 0], sizes = [16, 366], strides = [1, 1]} : vector<16x384xf32> to vector<16x366xf32>
    %53 = tpu.concatenate %51, %52 in 1 : vector<16x18xf32>, vector<16x366xf32> -> vector<16x384xf32>
    %c16 = arith.constant 16 : index
    %c0_23 = arith.constant 0 : index
    %54 = vector.load %arg16[%c16, %c0_23] : memref<144x384xf32, #tpu.memory_space<vmem>>, vector<16x384xf32>
    tpu.vector_store %arg16[%c16, %c0_23], %53 {strides = array<i32>} : memref<144x384xf32, #tpu.memory_space<vmem>>, vector<16x384xf32>,
    %55 = vector.extract_strided_slice %46 {offsets = [0, 367], sizes = [16, 17], strides = [1, 1]} : vector<16x384xf32> to vector<16x17xf32>
    %56 = vector.extract_strided_slice %46 {offsets = [0, 0], sizes = [16, 367], strides = [1, 1]} : vector<16x384xf32> to vector<16x367xf32>
    %57 = tpu.concatenate %55, %56 in 1 : vector<16x17xf32>, vector<16x367xf32> -> vector<16x384xf32>
    %c32 = arith.constant 32 : index
    %c0_24 = arith.constant 0 : index
    %58 = vector.load %arg16[%c32, %c0_24] : memref<144x384xf32, #tpu.memory_space<vmem>>, vector<16x384xf32>
    tpu.vector_store %arg16[%c32, %c0_24], %57 {strides = array<i32>} : memref<144x384xf32, #tpu.memory_space<vmem>>, vector<16x384xf32>,
    %59 = vector.extract_strided_slice %46 {offsets = [0, 383], sizes = [16, 1], strides = [1, 1]} : vector<16x384xf32> to vector<16x1xf32>
    %60 = vector.extract_strided_slice %46 {offsets = [0, 0], sizes = [16, 383], strides = [1, 1]} : vector<16x384xf32> to vector<16x383xf32>
    %61 = tpu.concatenate %59, %60 in 1 : vector<16x1xf32>, vector<16x383xf32> -> vector<16x384xf32>
    %c48 = arith.constant 48 : index
    %c0_25 = arith.constant 0 : index
    %62 = vector.load %arg16[%c48, %c0_25] : memref<144x384xf32, #tpu.memory_space<vmem>>, vector<16x384xf32>
    tpu.vector_store %arg16[%c48, %c0_25], %61 {strides = array<i32>} : memref<144x384xf32, #tpu.memory_space<vmem>>, vector<16x384xf32>,
    %c64 = arith.constant 64 : index
    %c0_26 = arith.constant 0 : index
    %63 = vector.load %arg16[%c64, %c0_26] : memref<144x384xf32, #tpu.memory_space<vmem>>, vector<16x384xf32>
    tpu.vector_store %arg16[%c64, %c0_26], %46 {strides = array<i32>} : memref<144x384xf32, #tpu.memory_space<vmem>>, vector<16x384xf32>,
    %64 = vector.extract_strided_slice %46 {offsets = [0, 1], sizes = [16, 383], strides = [1, 1]} : vector<16x384xf32> to vector<16x383xf32>
    %65 = vector.extract_strided_slice %46 {offsets = [0, 0], sizes = [16, 1], strides = [1, 1]} : vector<16x384xf32> to vector<16x1xf32>
    %66 = tpu.concatenate %64, %65 in 1 : vector<16x383xf32>, vector<16x1xf32> -> vector<16x384xf32>
    %c80 = arith.constant 80 : index
    %c0_27 = arith.constant 0 : index
    %67 = vector.load %arg16[%c80, %c0_27] : memref<144x384xf32, #tpu.memory_space<vmem>>, vector<16x384xf32>
    tpu.vector_store %arg16[%c80, %c0_27], %66 {strides = array<i32>} : memref<144x384xf32, #tpu.memory_space<vmem>>, vector<16x384xf32>,
    %68 = vector.extract_strided_slice %46 {offsets = [0, 17], sizes = [16, 367], strides = [1, 1]} : vector<16x384xf32> to vector<16x367xf32>
    %69 = vector.extract_strided_slice %46 {offsets = [0, 0], sizes = [16, 17], strides = [1, 1]} : vector<16x384xf32> to vector<16x17xf32>
    %70 = tpu.concatenate %68, %69 in 1 : vector<16x367xf32>, vector<16x17xf32> -> vector<16x384xf32>
    %c96 = arith.constant 96 : index
    %c0_28 = arith.constant 0 : index
    %71 = vector.load %arg16[%c96, %c0_28] : memref<144x384xf32, #tpu.memory_space<vmem>>, vector<16x384xf32>
    tpu.vector_store %arg16[%c96, %c0_28], %70 {strides = array<i32>} : memref<144x384xf32, #tpu.memory_space<vmem>>, vector<16x384xf32>,
    %72 = vector.extract_strided_slice %46 {offsets = [0, 18], sizes = [16, 366], strides = [1, 1]} : vector<16x384xf32> to vector<16x366xf32>
    %73 = vector.extract_strided_slice %46 {offsets = [0, 0], sizes = [16, 18], strides = [1, 1]} : vector<16x384xf32> to vector<16x18xf32>
    %74 = tpu.concatenate %72, %73 in 1 : vector<16x366xf32>, vector<16x18xf32> -> vector<16x384xf32>
    %c112 = arith.constant 112 : index
    %c0_29 = arith.constant 0 : index
    %75 = vector.load %arg16[%c112, %c0_29] : memref<144x384xf32, #tpu.memory_space<vmem>>, vector<16x384xf32>
    tpu.vector_store %arg16[%c112, %c0_29], %74 {strides = array<i32>} : memref<144x384xf32, #tpu.memory_space<vmem>>, vector<16x384xf32>,
    %76 = vector.extract_strided_slice %46 {offsets = [0, 19], sizes = [16, 365], strides = [1, 1]} : vector<16x384xf32> to vector<16x365xf32>
    %77 = vector.extract_strided_slice %46 {offsets = [0, 0], sizes = [16, 19], strides = [1, 1]} : vector<16x384xf32> to vector<16x19xf32>
    %78 = tpu.concatenate %76, %77 in 1 : vector<16x365xf32>, vector<16x19xf32> -> vector<16x384xf32>
    %c128 = arith.constant 128 : index
    %c0_30 = arith.constant 0 : index
    %79 = vector.load %arg16[%c128, %c0_30] : memref<144x384xf32, #tpu.memory_space<vmem>>, vector<16x384xf32>
    tpu.vector_store %arg16[%c128, %c0_30], %78 {strides = array<i32>} : memref<144x384xf32, #tpu.memory_space<vmem>>, vector<16x384xf32>,
    %c0_31 = arith.constant 0 : index
    %c0_32 = arith.constant 0 : index
    %80 = vector.load %arg16[%c0_31, %c0_32] : memref<144x384xf32, #tpu.memory_space<vmem>>, vector<144x384xf32>
    %81 = arith.truncf %80 : vector<144x384xf32> to vector<144x384xbf16>
    %c0_33 = arith.constant 0 : index
    %c0_34 = arith.constant 0 : index
    %82 = vector.load %arg5[%c0_33, %c0_34] : memref<16x144xbf16, #tpu.memory_space<vmem>>, vector<16x144xbf16>
    %cst_35 = arith.constant dense<0.000000e+00> : vector<16x384xf32>
    %83 = tpu.matmul %82, %81, %cst_35 {dimension_numbers = #tpu.dot_dimension_numbers<[1], [0], [0], [1], [0, 0, 1, 1], [], []>} : vector<16x144xbf16>, vector<144x384xbf16>, vector<16x384xf32> -> vector<16x384xf32>
    %c0_36 = arith.constant 0 : index
    %c0_37 = arith.constant 0 : index
    %84 = vector.load %arg6[%c0_36, %c0_37] : memref<16x1xf32, #tpu.memory_space<vmem>>, vector<16x1xf32>
    %85 = vector.broadcast %84 : vector<16x1xf32> to vector<16x384xf32>
    %86 = arith.addf %83, %85 : vector<16x384xf32>
    %cst_38 = arith.constant 0.000000e+00 : f32
    %87 = vector.broadcast %cst_38 : f32 to vector<16x384xf32>
    %88 = arith.maximumf %86, %87 : vector<16x384xf32>
    %89 = vector.broadcast %0 : vector<1x384xf32> to vector<16x384xf32>
    %90 = arith.mulf %88, %89 : vector<16x384xf32>
    %91 = vector.extract_strided_slice %90 {offsets = [0, 365], sizes = [16, 19], strides = [1, 1]} : vector<16x384xf32> to vector<16x19xf32>
    %92 = vector.extract_strided_slice %90 {offsets = [0, 0], sizes = [16, 365], strides = [1, 1]} : vector<16x384xf32> to vector<16x365xf32>
    %93 = tpu.concatenate %91, %92 in 1 : vector<16x19xf32>, vector<16x365xf32> -> vector<16x384xf32>
    %c0_39 = arith.constant 0 : index
    %c0_40 = arith.constant 0 : index
    %94 = vector.load %arg16[%c0_39, %c0_40] : memref<144x384xf32, #tpu.memory_space<vmem>>, vector<16x384xf32>
    tpu.vector_store %arg16[%c0_39, %c0_40], %93 {strides = array<i32>} : memref<144x384xf32, #tpu.memory_space<vmem>>, vector<16x384xf32>,
    %95 = vector.extract_strided_slice %90 {offsets = [0, 366], sizes = [16, 18], strides = [1, 1]} : vector<16x384xf32> to vector<16x18xf32>
    %96 = vector.extract_strided_slice %90 {offsets = [0, 0], sizes = [16, 366], strides = [1, 1]} : vector<16x384xf32> to vector<16x366xf32>
    %97 = tpu.concatenate %95, %96 in 1 : vector<16x18xf32>, vector<16x366xf32> -> vector<16x384xf32>
    %c16_41 = arith.constant 16 : index
    %c0_42 = arith.constant 0 : index
    %98 = vector.load %arg16[%c16_41, %c0_42] : memref<144x384xf32, #tpu.memory_space<vmem>>, vector<16x384xf32>
    tpu.vector_store %arg16[%c16_41, %c0_42], %97 {strides = array<i32>} : memref<144x384xf32, #tpu.memory_space<vmem>>, vector<16x384xf32>,
    %99 = vector.extract_strided_slice %90 {offsets = [0, 367], sizes = [16, 17], strides = [1, 1]} : vector<16x384xf32> to vector<16x17xf32>
    %100 = vector.extract_strided_slice %90 {offsets = [0, 0], sizes = [16, 367], strides = [1, 1]} : vector<16x384xf32> to vector<16x367xf32>
    %101 = tpu.concatenate %99, %100 in 1 : vector<16x17xf32>, vector<16x367xf32> -> vector<16x384xf32>
    %c32_43 = arith.constant 32 : index
    %c0_44 = arith.constant 0 : index
    %102 = vector.load %arg16[%c32_43, %c0_44] : memref<144x384xf32, #tpu.memory_space<vmem>>, vector<16x384xf32>
    tpu.vector_store %arg16[%c32_43, %c0_44], %101 {strides = array<i32>} : memref<144x384xf32, #tpu.memory_space<vmem>>, vector<16x384xf32>,
    %103 = vector.extract_strided_slice %90 {offsets = [0, 383], sizes = [16, 1], strides = [1, 1]} : vector<16x384xf32> to vector<16x1xf32>
    %104 = vector.extract_strided_slice %90 {offsets = [0, 0], sizes = [16, 383], strides = [1, 1]} : vector<16x384xf32> to vector<16x383xf32>
    %105 = tpu.concatenate %103, %104 in 1 : vector<16x1xf32>, vector<16x383xf32> -> vector<16x384xf32>
    %c48_45 = arith.constant 48 : index
    %c0_46 = arith.constant 0 : index
    %106 = vector.load %arg16[%c48_45, %c0_46] : memref<144x384xf32, #tpu.memory_space<vmem>>, vector<16x384xf32>
    tpu.vector_store %arg16[%c48_45, %c0_46], %105 {strides = array<i32>} : memref<144x384xf32, #tpu.memory_space<vmem>>, vector<16x384xf32>,
    %c64_47 = arith.constant 64 : index
    %c0_48 = arith.constant 0 : index
    %107 = vector.load %arg16[%c64_47, %c0_48] : memref<144x384xf32, #tpu.memory_space<vmem>>, vector<16x384xf32>
    tpu.vector_store %arg16[%c64_47, %c0_48], %90 {strides = array<i32>} : memref<144x384xf32, #tpu.memory_space<vmem>>, vector<16x384xf32>,
    %108 = vector.extract_strided_slice %90 {offsets = [0, 1], sizes = [16, 383], strides = [1, 1]} : vector<16x384xf32> to vector<16x383xf32>
    %109 = vector.extract_strided_slice %90 {offsets = [0, 0], sizes = [16, 1], strides = [1, 1]} : vector<16x384xf32> to vector<16x1xf32>
    %110 = tpu.concatenate %108, %109 in 1 : vector<16x383xf32>, vector<16x1xf32> -> vector<16x384xf32>
    %c80_49 = arith.constant 80 : index
    %c0_50 = arith.constant 0 : index
    %111 = vector.load %arg16[%c80_49, %c0_50] : memref<144x384xf32, #tpu.memory_space<vmem>>, vector<16x384xf32>
    tpu.vector_store %arg16[%c80_49, %c0_50], %110 {strides = array<i32>} : memref<144x384xf32, #tpu.memory_space<vmem>>, vector<16x384xf32>,
    %112 = vector.extract_strided_slice %90 {offsets = [0, 17], sizes = [16, 367], strides = [1, 1]} : vector<16x384xf32> to vector<16x367xf32>
    %113 = vector.extract_strided_slice %90 {offsets = [0, 0], sizes = [16, 17], strides = [1, 1]} : vector<16x384xf32> to vector<16x17xf32>
    %114 = tpu.concatenate %112, %113 in 1 : vector<16x367xf32>, vector<16x17xf32> -> vector<16x384xf32>
    %c96_51 = arith.constant 96 : index
    %c0_52 = arith.constant 0 : index
    %115 = vector.load %arg16[%c96_51, %c0_52] : memref<144x384xf32, #tpu.memory_space<vmem>>, vector<16x384xf32>
    tpu.vector_store %arg16[%c96_51, %c0_52], %114 {strides = array<i32>} : memref<144x384xf32, #tpu.memory_space<vmem>>, vector<16x384xf32>,
    %116 = vector.extract_strided_slice %90 {offsets = [0, 18], sizes = [16, 366], strides = [1, 1]} : vector<16x384xf32> to vector<16x366xf32>
    %117 = vector.extract_strided_slice %90 {offsets = [0, 0], sizes = [16, 18], strides = [1, 1]} : vector<16x384xf32> to vector<16x18xf32>
    %118 = tpu.concatenate %116, %117 in 1 : vector<16x366xf32>, vector<16x18xf32> -> vector<16x384xf32>
    %c112_53 = arith.constant 112 : index
    %c0_54 = arith.constant 0 : index
    %119 = vector.load %arg16[%c112_53, %c0_54] : memref<144x384xf32, #tpu.memory_space<vmem>>, vector<16x384xf32>
    tpu.vector_store %arg16[%c112_53, %c0_54], %118 {strides = array<i32>} : memref<144x384xf32, #tpu.memory_space<vmem>>, vector<16x384xf32>,
    %120 = vector.extract_strided_slice %90 {offsets = [0, 19], sizes = [16, 365], strides = [1, 1]} : vector<16x384xf32> to vector<16x365xf32>
    %121 = vector.extract_strided_slice %90 {offsets = [0, 0], sizes = [16, 19], strides = [1, 1]} : vector<16x384xf32> to vector<16x19xf32>
    %122 = tpu.concatenate %120, %121 in 1 : vector<16x365xf32>, vector<16x19xf32> -> vector<16x384xf32>
    %c128_55 = arith.constant 128 : index
    %c0_56 = arith.constant 0 : index
    %123 = vector.load %arg16[%c128_55, %c0_56] : memref<144x384xf32, #tpu.memory_space<vmem>>, vector<16x384xf32>
    tpu.vector_store %arg16[%c128_55, %c0_56], %122 {strides = array<i32>} : memref<144x384xf32, #tpu.memory_space<vmem>>, vector<16x384xf32>,
    %c0_57 = arith.constant 0 : index
    %c0_58 = arith.constant 0 : index
    %124 = vector.load %arg16[%c0_57, %c0_58] : memref<144x384xf32, #tpu.memory_space<vmem>>, vector<144x384xf32>
    %125 = arith.truncf %124 : vector<144x384xf32> to vector<144x384xbf16>
    %c0_59 = arith.constant 0 : index
    %c0_60 = arith.constant 0 : index
    %126 = vector.load %arg7[%c0_59, %c0_60] : memref<3x144xbf16, #tpu.memory_space<vmem>>, vector<3x144xbf16>
    %cst_61 = arith.constant dense<0.000000e+00> : vector<3x384xf32>
    %127 = tpu.matmul %126, %125, %cst_61 {dimension_numbers = #tpu.dot_dimension_numbers<[1], [0], [0], [1], [0, 0, 1, 1], [], []>} : vector<3x144xbf16>, vector<144x384xbf16>, vector<3x384xf32> -> vector<3x384xf32>
    %c0_62 = arith.constant 0 : index
    %c0_63 = arith.constant 0 : index
    %128 = vector.load %arg8[%c0_62, %c0_63] : memref<3x1xf32, #tpu.memory_space<vmem>>, vector<3x1xf32>
    %129 = vector.broadcast %128 : vector<3x1xf32> to vector<3x384xf32>
    %130 = arith.addf %127, %129 : vector<3x384xf32>
    %cst_64 = arith.constant dense<0xFF800000> : vector<384xf32>
    %131 = vector.multi_reduction <maximumf>, %130, %cst_64 [0] : vector<3x384xf32> to vector<384xf32>
    %132 = vector.shape_cast %131 : vector<384xf32> to vector<1x384xf32>
    %133 = vector.broadcast %132 : vector<1x384xf32> to vector<3x384xf32>
    %134 = arith.subf %130, %133 : vector<3x384xf32>
    %135 = math.exp %134 : vector<3x384xf32>
    %cst_65 = arith.constant dense<0.000000e+00> : vector<384xf32>
    %136 = vector.multi_reduction <add>, %135, %cst_65 [0] : vector<3x384xf32> to vector<384xf32>
    %137 = vector.shape_cast %136 : vector<384xf32> to vector<1x384xf32>
    %138 = tpu.reciprocal %137 {approx = true} : vector<1x384xf32> -> vector<1x384xf32>
    %139 = vector.broadcast %138 : vector<1x384xf32> to vector<3x384xf32>
    %140 = arith.mulf %135, %139 : vector<3x384xf32>
    %141 = vector.broadcast %0 : vector<1x384xf32> to vector<3x384xf32>
    %142 = arith.mulf %140, %141 : vector<3x384xf32>
    %143 = vector.extract_strided_slice %2 {offsets = [0, 365], sizes = [3, 19], strides = [1, 1]} : vector<3x384xf32> to vector<3x19xf32>
    %144 = vector.extract_strided_slice %2 {offsets = [0, 0], sizes = [3, 365], strides = [1, 1]} : vector<3x384xf32> to vector<3x365xf32>
    %145 = tpu.concatenate %143, %144 in 1 : vector<3x19xf32>, vector<3x365xf32> -> vector<3x384xf32>
    %c0_66 = arith.constant 0 : index
    %c0_67 = arith.constant 0 : index
    %146 = vector.load %arg16[%c0_66, %c0_67] : memref<144x384xf32, #tpu.memory_space<vmem>>, vector<3x384xf32>
    tpu.vector_store %arg16[%c0_66, %c0_67], %145 {strides = array<i32>} : memref<144x384xf32, #tpu.memory_space<vmem>>, vector<3x384xf32>,
    %147 = vector.extract_strided_slice %142 {offsets = [0, 365], sizes = [3, 19], strides = [1, 1]} : vector<3x384xf32> to vector<3x19xf32>
    %148 = vector.extract_strided_slice %142 {offsets = [0, 0], sizes = [3, 365], strides = [1, 1]} : vector<3x384xf32> to vector<3x365xf32>
    %149 = tpu.concatenate %147, %148 in 1 : vector<3x19xf32>, vector<3x365xf32> -> vector<3x384xf32>
    %c3_68 = arith.constant 3 : index
    %c0_69 = arith.constant 0 : index
    %150 = vector.load %arg16[%c3_68, %c0_69] : memref<144x384xf32, #tpu.memory_space<vmem>>, vector<3x384xf32>
    tpu.vector_store %arg16[%c3_68, %c0_69], %149 {strides = array<i32>} : memref<144x384xf32, #tpu.memory_space<vmem>>, vector<3x384xf32>,
    %151 = vector.extract_strided_slice %2 {offsets = [0, 366], sizes = [3, 18], strides = [1, 1]} : vector<3x384xf32> to vector<3x18xf32>
    %152 = vector.extract_strided_slice %2 {offsets = [0, 0], sizes = [3, 366], strides = [1, 1]} : vector<3x384xf32> to vector<3x366xf32>
    %153 = tpu.concatenate %151, %152 in 1 : vector<3x18xf32>, vector<3x366xf32> -> vector<3x384xf32>
    %c6_70 = arith.constant 6 : index
    %c0_71 = arith.constant 0 : index
    %154 = vector.load %arg16[%c6_70, %c0_71] : memref<144x384xf32, #tpu.memory_space<vmem>>, vector<3x384xf32>
    tpu.vector_store %arg16[%c6_70, %c0_71], %153 {strides = array<i32>} : memref<144x384xf32, #tpu.memory_space<vmem>>, vector<3x384xf32>,
    %155 = vector.extract_strided_slice %142 {offsets = [0, 366], sizes = [3, 18], strides = [1, 1]} : vector<3x384xf32> to vector<3x18xf32>
    %156 = vector.extract_strided_slice %142 {offsets = [0, 0], sizes = [3, 366], strides = [1, 1]} : vector<3x384xf32> to vector<3x366xf32>
    %157 = tpu.concatenate %155, %156 in 1 : vector<3x18xf32>, vector<3x366xf32> -> vector<3x384xf32>
    %c9_72 = arith.constant 9 : index
    %c0_73 = arith.constant 0 : index
    %158 = vector.load %arg16[%c9_72, %c0_73] : memref<144x384xf32, #tpu.memory_space<vmem>>, vector<3x384xf32>
    tpu.vector_store %arg16[%c9_72, %c0_73], %157 {strides = array<i32>} : memref<144x384xf32, #tpu.memory_space<vmem>>, vector<3x384xf32>,
    %159 = vector.extract_strided_slice %2 {offsets = [0, 367], sizes = [3, 17], strides = [1, 1]} : vector<3x384xf32> to vector<3x17xf32>
    %160 = vector.extract_strided_slice %2 {offsets = [0, 0], sizes = [3, 367], strides = [1, 1]} : vector<3x384xf32> to vector<3x367xf32>
    %161 = tpu.concatenate %159, %160 in 1 : vector<3x17xf32>, vector<3x367xf32> -> vector<3x384xf32>
    %c12_74 = arith.constant 12 : index
    %c0_75 = arith.constant 0 : index
    %162 = vector.load %arg16[%c12_74, %c0_75] : memref<144x384xf32, #tpu.memory_space<vmem>>, vector<3x384xf32>
    tpu.vector_store %arg16[%c12_74, %c0_75], %161 {strides = array<i32>} : memref<144x384xf32, #tpu.memory_space<vmem>>, vector<3x384xf32>,
    %163 = vector.extract_strided_slice %142 {offsets = [0, 367], sizes = [3, 17], strides = [1, 1]} : vector<3x384xf32> to vector<3x17xf32>
    %164 = vector.extract_strided_slice %142 {offsets = [0, 0], sizes = [3, 367], strides = [1, 1]} : vector<3x384xf32> to vector<3x367xf32>
    %165 = tpu.concatenate %163, %164 in 1 : vector<3x17xf32>, vector<3x367xf32> -> vector<3x384xf32>
    %c15_76 = arith.constant 15 : index
    %c0_77 = arith.constant 0 : index
    %166 = vector.load %arg16[%c15_76, %c0_77] : memref<144x384xf32, #tpu.memory_space<vmem>>, vector<3x384xf32>
    tpu.vector_store %arg16[%c15_76, %c0_77], %165 {strides = array<i32>} : memref<144x384xf32, #tpu.memory_space<vmem>>, vector<3x384xf32>,
    %167 = vector.extract_strided_slice %2 {offsets = [0, 383], sizes = [3, 1], strides = [1, 1]} : vector<3x384xf32> to vector<3x1xf32>
    %168 = vector.extract_strided_slice %2 {offsets = [0, 0], sizes = [3, 383], strides = [1, 1]} : vector<3x384xf32> to vector<3x383xf32>
    %169 = tpu.concatenate %167, %168 in 1 : vector<3x1xf32>, vector<3x383xf32> -> vector<3x384xf32>
    %c18_78 = arith.constant 18 : index
    %c0_79 = arith.constant 0 : index
    %170 = vector.load %arg16[%c18_78, %c0_79] : memref<144x384xf32, #tpu.memory_space<vmem>>, vector<3x384xf32>
    tpu.vector_store %arg16[%c18_78, %c0_79], %169 {strides = array<i32>} : memref<144x384xf32, #tpu.memory_space<vmem>>, vector<3x384xf32>,
    %171 = vector.extract_strided_slice %142 {offsets = [0, 383], sizes = [3, 1], strides = [1, 1]} : vector<3x384xf32> to vector<3x1xf32>
    %172 = vector.extract_strided_slice %142 {offsets = [0, 0], sizes = [3, 383], strides = [1, 1]} : vector<3x384xf32> to vector<3x383xf32>
    %173 = tpu.concatenate %171, %172 in 1 : vector<3x1xf32>, vector<3x383xf32> -> vector<3x384xf32>
    %c21_80 = arith.constant 21 : index
    %c0_81 = arith.constant 0 : index
    %174 = vector.load %arg16[%c21_80, %c0_81] : memref<144x384xf32, #tpu.memory_space<vmem>>, vector<3x384xf32>
    tpu.vector_store %arg16[%c21_80, %c0_81], %173 {strides = array<i32>} : memref<144x384xf32, #tpu.memory_space<vmem>>, vector<3x384xf32>,
    %c24_82 = arith.constant 24 : index
    %c0_83 = arith.constant 0 : index
    %175 = vector.load %arg16[%c24_82, %c0_83] : memref<144x384xf32, #tpu.memory_space<vmem>>, vector<3x384xf32>
    tpu.vector_store %arg16[%c24_82, %c0_83], %2 {strides = array<i32>} : memref<144x384xf32, #tpu.memory_space<vmem>>, vector<3x384xf32>,
    %c27 = arith.constant 27 : index
    %c0_84 = arith.constant 0 : index
    %176 = vector.load %arg16[%c27, %c0_84] : memref<144x384xf32, #tpu.memory_space<vmem>>, vector<3x384xf32>
    tpu.vector_store %arg16[%c27, %c0_84], %142 {strides = array<i32>} : memref<144x384xf32, #tpu.memory_space<vmem>>, vector<3x384xf32>,
    %177 = vector.extract_strided_slice %2 {offsets = [0, 1], sizes = [3, 383], strides = [1, 1]} : vector<3x384xf32> to vector<3x383xf32>
    %178 = vector.extract_strided_slice %2 {offsets = [0, 0], sizes = [3, 1], strides = [1, 1]} : vector<3x384xf32> to vector<3x1xf32>
    %179 = tpu.concatenate %177, %178 in 1 : vector<3x383xf32>, vector<3x1xf32> -> vector<3x384xf32>
    %c30 = arith.constant 30 : index
    %c0_85 = arith.constant 0 : index
    %180 = vector.load %arg16[%c30, %c0_85] : memref<144x384xf32, #tpu.memory_space<vmem>>, vector<3x384xf32>
    tpu.vector_store %arg16[%c30, %c0_85], %179 {strides = array<i32>} : memref<144x384xf32, #tpu.memory_space<vmem>>, vector<3x384xf32>,
    %181 = vector.extract_strided_slice %142 {offsets = [0, 1], sizes = [3, 383], strides = [1, 1]} : vector<3x384xf32> to vector<3x383xf32>
    %182 = vector.extract_strided_slice %142 {offsets = [0, 0], sizes = [3, 1], strides = [1, 1]} : vector<3x384xf32> to vector<3x1xf32>
    %183 = tpu.concatenate %181, %182 in 1 : vector<3x383xf32>, vector<3x1xf32> -> vector<3x384xf32>
    %c33 = arith.constant 33 : index
    %c0_86 = arith.constant 0 : index
    %184 = vector.load %arg16[%c33, %c0_86] : memref<144x384xf32, #tpu.memory_space<vmem>>, vector<3x384xf32>
    tpu.vector_store %arg16[%c33, %c0_86], %183 {strides = array<i32>} : memref<144x384xf32, #tpu.memory_space<vmem>>, vector<3x384xf32>,
    %185 = vector.extract_strided_slice %2 {offsets = [0, 17], sizes = [3, 367], strides = [1, 1]} : vector<3x384xf32> to vector<3x367xf32>
    %186 = vector.extract_strided_slice %2 {offsets = [0, 0], sizes = [3, 17], strides = [1, 1]} : vector<3x384xf32> to vector<3x17xf32>
    %187 = tpu.concatenate %185, %186 in 1 : vector<3x367xf32>, vector<3x17xf32> -> vector<3x384xf32>
    %c36 = arith.constant 36 : index
    %c0_87 = arith.constant 0 : index
    %188 = vector.load %arg16[%c36, %c0_87] : memref<144x384xf32, #tpu.memory_space<vmem>>, vector<3x384xf32>
    tpu.vector_store %arg16[%c36, %c0_87], %187 {strides = array<i32>} : memref<144x384xf32, #tpu.memory_space<vmem>>, vector<3x384xf32>,
    %189 = vector.extract_strided_slice %142 {offsets = [0, 17], sizes = [3, 367], strides = [1, 1]} : vector<3x384xf32> to vector<3x367xf32>
    %190 = vector.extract_strided_slice %142 {offsets = [0, 0], sizes = [3, 17], strides = [1, 1]} : vector<3x384xf32> to vector<3x17xf32>
    %191 = tpu.concatenate %189, %190 in 1 : vector<3x367xf32>, vector<3x17xf32> -> vector<3x384xf32>
    %c39 = arith.constant 39 : index
    %c0_88 = arith.constant 0 : index
    %192 = vector.load %arg16[%c39, %c0_88] : memref<144x384xf32, #tpu.memory_space<vmem>>, vector<3x384xf32>
    tpu.vector_store %arg16[%c39, %c0_88], %191 {strides = array<i32>} : memref<144x384xf32, #tpu.memory_space<vmem>>, vector<3x384xf32>,
    %193 = vector.extract_strided_slice %2 {offsets = [0, 18], sizes = [3, 366], strides = [1, 1]} : vector<3x384xf32> to vector<3x366xf32>
    %194 = vector.extract_strided_slice %2 {offsets = [0, 0], sizes = [3, 18], strides = [1, 1]} : vector<3x384xf32> to vector<3x18xf32>
    %195 = tpu.concatenate %193, %194 in 1 : vector<3x366xf32>, vector<3x18xf32> -> vector<3x384xf32>
    %c42 = arith.constant 42 : index
    %c0_89 = arith.constant 0 : index
    %196 = vector.load %arg16[%c42, %c0_89] : memref<144x384xf32, #tpu.memory_space<vmem>>, vector<3x384xf32>
    tpu.vector_store %arg16[%c42, %c0_89], %195 {strides = array<i32>} : memref<144x384xf32, #tpu.memory_space<vmem>>, vector<3x384xf32>,
    %197 = vector.extract_strided_slice %142 {offsets = [0, 18], sizes = [3, 366], strides = [1, 1]} : vector<3x384xf32> to vector<3x366xf32>
    %198 = vector.extract_strided_slice %142 {offsets = [0, 0], sizes = [3, 18], strides = [1, 1]} : vector<3x384xf32> to vector<3x18xf32>
    %199 = tpu.concatenate %197, %198 in 1 : vector<3x366xf32>, vector<3x18xf32> -> vector<3x384xf32>
    %c45 = arith.constant 45 : index
    %c0_90 = arith.constant 0 : index
    %200 = vector.load %arg16[%c45, %c0_90] : memref<144x384xf32, #tpu.memory_space<vmem>>, vector<3x384xf32>
    tpu.vector_store %arg16[%c45, %c0_90], %199 {strides = array<i32>} : memref<144x384xf32, #tpu.memory_space<vmem>>, vector<3x384xf32>,
    %201 = vector.extract_strided_slice %2 {offsets = [0, 19], sizes = [3, 365], strides = [1, 1]} : vector<3x384xf32> to vector<3x365xf32>
    %202 = vector.extract_strided_slice %2 {offsets = [0, 0], sizes = [3, 19], strides = [1, 1]} : vector<3x384xf32> to vector<3x19xf32>
    %203 = tpu.concatenate %201, %202 in 1 : vector<3x365xf32>, vector<3x19xf32> -> vector<3x384xf32>
    %c48_91 = arith.constant 48 : index
    %c0_92 = arith.constant 0 : index
    %204 = vector.load %arg16[%c48_91, %c0_92] : memref<144x384xf32, #tpu.memory_space<vmem>>, vector<3x384xf32>
    tpu.vector_store %arg16[%c48_91, %c0_92], %203 {strides = array<i32>} : memref<144x384xf32, #tpu.memory_space<vmem>>, vector<3x384xf32>,
    %205 = vector.extract_strided_slice %142 {offsets = [0, 19], sizes = [3, 365], strides = [1, 1]} : vector<3x384xf32> to vector<3x365xf32>
    %206 = vector.extract_strided_slice %142 {offsets = [0, 0], sizes = [3, 19], strides = [1, 1]} : vector<3x384xf32> to vector<3x19xf32>
    %207 = tpu.concatenate %205, %206 in 1 : vector<3x365xf32>, vector<3x19xf32> -> vector<3x384xf32>
    %c51 = arith.constant 51 : index
    %c0_93 = arith.constant 0 : index
    %208 = vector.load %arg16[%c51, %c0_93] : memref<144x384xf32, #tpu.memory_space<vmem>>, vector<3x384xf32>
    tpu.vector_store %arg16[%c51, %c0_93], %207 {strides = array<i32>} : memref<144x384xf32, #tpu.memory_space<vmem>>, vector<3x384xf32>,
    %c0_94 = arith.constant 0 : index
    %c0_95 = arith.constant 0 : index
    %209 = vector.load %arg16[%c0_94, %c0_95] : memref<144x384xf32, #tpu.memory_space<vmem>>, vector<54x384xf32>
    %210 = arith.truncf %209 : vector<54x384xf32> to vector<54x384xbf16>
    %c0_96 = arith.constant 0 : index
    %c0_97 = arith.constant 0 : index
    %211 = vector.load %arg9[%c0_96, %c0_97] : memref<16x54xbf16, #tpu.memory_space<vmem>>, vector<16x54xbf16>
    %cst_98 = arith.constant dense<0.000000e+00> : vector<16x384xf32>
    %212 = tpu.matmul %211, %210, %cst_98 {dimension_numbers = #tpu.dot_dimension_numbers<[1], [0], [0], [1], [0, 0, 1, 1], [], []>} : vector<16x54xbf16>, vector<54x384xbf16>, vector<16x384xf32> -> vector<16x384xf32>
    %c0_99 = arith.constant 0 : index
    %c0_100 = arith.constant 0 : index
    %213 = vector.load %arg10[%c0_99, %c0_100] : memref<16x1xf32, #tpu.memory_space<vmem>>, vector<16x1xf32>
    %214 = vector.broadcast %213 : vector<16x1xf32> to vector<16x384xf32>
    %215 = arith.addf %212, %214 : vector<16x384xf32>
    %cst_101 = arith.constant 0.000000e+00 : f32
    %216 = vector.broadcast %cst_101 : f32 to vector<16x384xf32>
    %217 = arith.maximumf %215, %216 : vector<16x384xf32>
    %218 = vector.broadcast %0 : vector<1x384xf32> to vector<16x384xf32>
    %219 = arith.mulf %217, %218 : vector<16x384xf32>
    %220 = vector.extract_strided_slice %219 {offsets = [0, 365], sizes = [16, 19], strides = [1, 1]} : vector<16x384xf32> to vector<16x19xf32>
    %221 = vector.extract_strided_slice %219 {offsets = [0, 0], sizes = [16, 365], strides = [1, 1]} : vector<16x384xf32> to vector<16x365xf32>
    %222 = tpu.concatenate %220, %221 in 1 : vector<16x19xf32>, vector<16x365xf32> -> vector<16x384xf32>
    %c0_102 = arith.constant 0 : index
    %c0_103 = arith.constant 0 : index
    %223 = vector.load %arg16[%c0_102, %c0_103] : memref<144x384xf32, #tpu.memory_space<vmem>>, vector<16x384xf32>
    tpu.vector_store %arg16[%c0_102, %c0_103], %222 {strides = array<i32>} : memref<144x384xf32, #tpu.memory_space<vmem>>, vector<16x384xf32>,
    %224 = vector.extract_strided_slice %219 {offsets = [0, 366], sizes = [16, 18], strides = [1, 1]} : vector<16x384xf32> to vector<16x18xf32>
    %225 = vector.extract_strided_slice %219 {offsets = [0, 0], sizes = [16, 366], strides = [1, 1]} : vector<16x384xf32> to vector<16x366xf32>
    %226 = tpu.concatenate %224, %225 in 1 : vector<16x18xf32>, vector<16x366xf32> -> vector<16x384xf32>
    %c16_104 = arith.constant 16 : index
    %c0_105 = arith.constant 0 : index
    %227 = vector.load %arg16[%c16_104, %c0_105] : memref<144x384xf32, #tpu.memory_space<vmem>>, vector<16x384xf32>
    tpu.vector_store %arg16[%c16_104, %c0_105], %226 {strides = array<i32>} : memref<144x384xf32, #tpu.memory_space<vmem>>, vector<16x384xf32>,
    %228 = vector.extract_strided_slice %219 {offsets = [0, 367], sizes = [16, 17], strides = [1, 1]} : vector<16x384xf32> to vector<16x17xf32>
    %229 = vector.extract_strided_slice %219 {offsets = [0, 0], sizes = [16, 367], strides = [1, 1]} : vector<16x384xf32> to vector<16x367xf32>
    %230 = tpu.concatenate %228, %229 in 1 : vector<16x17xf32>, vector<16x367xf32> -> vector<16x384xf32>
    %c32_106 = arith.constant 32 : index
    %c0_107 = arith.constant 0 : index
    %231 = vector.load %arg16[%c32_106, %c0_107] : memref<144x384xf32, #tpu.memory_space<vmem>>, vector<16x384xf32>
    tpu.vector_store %arg16[%c32_106, %c0_107], %230 {strides = array<i32>} : memref<144x384xf32, #tpu.memory_space<vmem>>, vector<16x384xf32>,
    %232 = vector.extract_strided_slice %219 {offsets = [0, 383], sizes = [16, 1], strides = [1, 1]} : vector<16x384xf32> to vector<16x1xf32>
    %233 = vector.extract_strided_slice %219 {offsets = [0, 0], sizes = [16, 383], strides = [1, 1]} : vector<16x384xf32> to vector<16x383xf32>
    %234 = tpu.concatenate %232, %233 in 1 : vector<16x1xf32>, vector<16x383xf32> -> vector<16x384xf32>
    %c48_108 = arith.constant 48 : index
    %c0_109 = arith.constant 0 : index
    %235 = vector.load %arg16[%c48_108, %c0_109] : memref<144x384xf32, #tpu.memory_space<vmem>>, vector<16x384xf32>
    tpu.vector_store %arg16[%c48_108, %c0_109], %234 {strides = array<i32>} : memref<144x384xf32, #tpu.memory_space<vmem>>, vector<16x384xf32>,
    %c64_110 = arith.constant 64 : index
    %c0_111 = arith.constant 0 : index
    %236 = vector.load %arg16[%c64_110, %c0_111] : memref<144x384xf32, #tpu.memory_space<vmem>>, vector<16x384xf32>
    tpu.vector_store %arg16[%c64_110, %c0_111], %219 {strides = array<i32>} : memref<144x384xf32, #tpu.memory_space<vmem>>, vector<16x384xf32>,
    %237 = vector.extract_strided_slice %219 {offsets = [0, 1], sizes = [16, 383], strides = [1, 1]} : vector<16x384xf32> to vector<16x383xf32>
    %238 = vector.extract_strided_slice %219 {offsets = [0, 0], sizes = [16, 1], strides = [1, 1]} : vector<16x384xf32> to vector<16x1xf32>
    %239 = tpu.concatenate %237, %238 in 1 : vector<16x383xf32>, vector<16x1xf32> -> vector<16x384xf32>
    %c80_112 = arith.constant 80 : index
    %c0_113 = arith.constant 0 : index
    %240 = vector.load %arg16[%c80_112, %c0_113] : memref<144x384xf32, #tpu.memory_space<vmem>>, vector<16x384xf32>
    tpu.vector_store %arg16[%c80_112, %c0_113], %239 {strides = array<i32>} : memref<144x384xf32, #tpu.memory_space<vmem>>, vector<16x384xf32>,
    %241 = vector.extract_strided_slice %219 {offsets = [0, 17], sizes = [16, 367], strides = [1, 1]} : vector<16x384xf32> to vector<16x367xf32>
    %242 = vector.extract_strided_slice %219 {offsets = [0, 0], sizes = [16, 17], strides = [1, 1]} : vector<16x384xf32> to vector<16x17xf32>
    %243 = tpu.concatenate %241, %242 in 1 : vector<16x367xf32>, vector<16x17xf32> -> vector<16x384xf32>
    %c96_114 = arith.constant 96 : index
    %c0_115 = arith.constant 0 : index
    %244 = vector.load %arg16[%c96_114, %c0_115] : memref<144x384xf32, #tpu.memory_space<vmem>>, vector<16x384xf32>
    tpu.vector_store %arg16[%c96_114, %c0_115], %243 {strides = array<i32>} : memref<144x384xf32, #tpu.memory_space<vmem>>, vector<16x384xf32>,
    %245 = vector.extract_strided_slice %219 {offsets = [0, 18], sizes = [16, 366], strides = [1, 1]} : vector<16x384xf32> to vector<16x366xf32>
    %246 = vector.extract_strided_slice %219 {offsets = [0, 0], sizes = [16, 18], strides = [1, 1]} : vector<16x384xf32> to vector<16x18xf32>
    %247 = tpu.concatenate %245, %246 in 1 : vector<16x366xf32>, vector<16x18xf32> -> vector<16x384xf32>
    %c112_116 = arith.constant 112 : index
    %c0_117 = arith.constant 0 : index
    %248 = vector.load %arg16[%c112_116, %c0_117] : memref<144x384xf32, #tpu.memory_space<vmem>>, vector<16x384xf32>
    tpu.vector_store %arg16[%c112_116, %c0_117], %247 {strides = array<i32>} : memref<144x384xf32, #tpu.memory_space<vmem>>, vector<16x384xf32>,
    %249 = vector.extract_strided_slice %219 {offsets = [0, 19], sizes = [16, 365], strides = [1, 1]} : vector<16x384xf32> to vector<16x365xf32>
    %250 = vector.extract_strided_slice %219 {offsets = [0, 0], sizes = [16, 19], strides = [1, 1]} : vector<16x384xf32> to vector<16x19xf32>
    %251 = tpu.concatenate %249, %250 in 1 : vector<16x365xf32>, vector<16x19xf32> -> vector<16x384xf32>
    %c128_118 = arith.constant 128 : index
    %c0_119 = arith.constant 0 : index
    %252 = vector.load %arg16[%c128_118, %c0_119] : memref<144x384xf32, #tpu.memory_space<vmem>>, vector<16x384xf32>
    tpu.vector_store %arg16[%c128_118, %c0_119], %251 {strides = array<i32>} : memref<144x384xf32, #tpu.memory_space<vmem>>, vector<16x384xf32>,
    %c0_120 = arith.constant 0 : index
    %c0_121 = arith.constant 0 : index
    %253 = vector.load %arg16[%c0_120, %c0_121] : memref<144x384xf32, #tpu.memory_space<vmem>>, vector<144x384xf32>
    %254 = arith.truncf %253 : vector<144x384xf32> to vector<144x384xbf16>
    %c0_122 = arith.constant 0 : index
    %c0_123 = arith.constant 0 : index
    %255 = vector.load %arg11[%c0_122, %c0_123] : memref<16x144xbf16, #tpu.memory_space<vmem>>, vector<16x144xbf16>
    %cst_124 = arith.constant dense<0.000000e+00> : vector<16x384xf32>
    %256 = tpu.matmul %255, %254, %cst_124 {dimension_numbers = #tpu.dot_dimension_numbers<[1], [0], [0], [1], [0, 0, 1, 1], [], []>} : vector<16x144xbf16>, vector<144x384xbf16>, vector<16x384xf32> -> vector<16x384xf32>
    %c0_125 = arith.constant 0 : index
    %c0_126 = arith.constant 0 : index
    %257 = vector.load %arg12[%c0_125, %c0_126] : memref<16x1xf32, #tpu.memory_space<vmem>>, vector<16x1xf32>
    %258 = vector.broadcast %257 : vector<16x1xf32> to vector<16x384xf32>
    %259 = arith.addf %256, %258 : vector<16x384xf32>
    %cst_127 = arith.constant 0.000000e+00 : f32
    %260 = vector.broadcast %cst_127 : f32 to vector<16x384xf32>
    %261 = arith.maximumf %259, %260 : vector<16x384xf32>
    %262 = vector.broadcast %0 : vector<1x384xf32> to vector<16x384xf32>
    %263 = arith.mulf %261, %262 : vector<16x384xf32>
    %264 = vector.extract_strided_slice %263 {offsets = [0, 365], sizes = [16, 19], strides = [1, 1]} : vector<16x384xf32> to vector<16x19xf32>
    %265 = vector.extract_strided_slice %263 {offsets = [0, 0], sizes = [16, 365], strides = [1, 1]} : vector<16x384xf32> to vector<16x365xf32>
    %266 = tpu.concatenate %264, %265 in 1 : vector<16x19xf32>, vector<16x365xf32> -> vector<16x384xf32>
    %c0_128 = arith.constant 0 : index
    %c0_129 = arith.constant 0 : index
    %267 = vector.load %arg16[%c0_128, %c0_129] : memref<144x384xf32, #tpu.memory_space<vmem>>, vector<16x384xf32>
    tpu.vector_store %arg16[%c0_128, %c0_129], %266 {strides = array<i32>} : memref<144x384xf32, #tpu.memory_space<vmem>>, vector<16x384xf32>,
    %268 = vector.extract_strided_slice %263 {offsets = [0, 366], sizes = [16, 18], strides = [1, 1]} : vector<16x384xf32> to vector<16x18xf32>
    %269 = vector.extract_strided_slice %263 {offsets = [0, 0], sizes = [16, 366], strides = [1, 1]} : vector<16x384xf32> to vector<16x366xf32>
    %270 = tpu.concatenate %268, %269 in 1 : vector<16x18xf32>, vector<16x366xf32> -> vector<16x384xf32>
    %c16_130 = arith.constant 16 : index
    %c0_131 = arith.constant 0 : index
    %271 = vector.load %arg16[%c16_130, %c0_131] : memref<144x384xf32, #tpu.memory_space<vmem>>, vector<16x384xf32>
    tpu.vector_store %arg16[%c16_130, %c0_131], %270 {strides = array<i32>} : memref<144x384xf32, #tpu.memory_space<vmem>>, vector<16x384xf32>,
    %272 = vector.extract_strided_slice %263 {offsets = [0, 367], sizes = [16, 17], strides = [1, 1]} : vector<16x384xf32> to vector<16x17xf32>
    %273 = vector.extract_strided_slice %263 {offsets = [0, 0], sizes = [16, 367], strides = [1, 1]} : vector<16x384xf32> to vector<16x367xf32>
    %274 = tpu.concatenate %272, %273 in 1 : vector<16x17xf32>, vector<16x367xf32> -> vector<16x384xf32>
    %c32_132 = arith.constant 32 : index
    %c0_133 = arith.constant 0 : index
    %275 = vector.load %arg16[%c32_132, %c0_133] : memref<144x384xf32, #tpu.memory_space<vmem>>, vector<16x384xf32>
    tpu.vector_store %arg16[%c32_132, %c0_133], %274 {strides = array<i32>} : memref<144x384xf32, #tpu.memory_space<vmem>>, vector<16x384xf32>,
    %276 = vector.extract_strided_slice %263 {offsets = [0, 383], sizes = [16, 1], strides = [1, 1]} : vector<16x384xf32> to vector<16x1xf32>
    %277 = vector.extract_strided_slice %263 {offsets = [0, 0], sizes = [16, 383], strides = [1, 1]} : vector<16x384xf32> to vector<16x383xf32>
    %278 = tpu.concatenate %276, %277 in 1 : vector<16x1xf32>, vector<16x383xf32> -> vector<16x384xf32>
    %c48_134 = arith.constant 48 : index
    %c0_135 = arith.constant 0 : index
    %279 = vector.load %arg16[%c48_134, %c0_135] : memref<144x384xf32, #tpu.memory_space<vmem>>, vector<16x384xf32>
    tpu.vector_store %arg16[%c48_134, %c0_135], %278 {strides = array<i32>} : memref<144x384xf32, #tpu.memory_space<vmem>>, vector<16x384xf32>,
    %c64_136 = arith.constant 64 : index
    %c0_137 = arith.constant 0 : index
    %280 = vector.load %arg16[%c64_136, %c0_137] : memref<144x384xf32, #tpu.memory_space<vmem>>, vector<16x384xf32>
    tpu.vector_store %arg16[%c64_136, %c0_137], %263 {strides = array<i32>} : memref<144x384xf32, #tpu.memory_space<vmem>>, vector<16x384xf32>,
    %281 = vector.extract_strided_slice %263 {offsets = [0, 1], sizes = [16, 383], strides = [1, 1]} : vector<16x384xf32> to vector<16x383xf32>
    %282 = vector.extract_strided_slice %263 {offsets = [0, 0], sizes = [16, 1], strides = [1, 1]} : vector<16x384xf32> to vector<16x1xf32>
    %283 = tpu.concatenate %281, %282 in 1 : vector<16x383xf32>, vector<16x1xf32> -> vector<16x384xf32>
    %c80_138 = arith.constant 80 : index
    %c0_139 = arith.constant 0 : index
    %284 = vector.load %arg16[%c80_138, %c0_139] : memref<144x384xf32, #tpu.memory_space<vmem>>, vector<16x384xf32>
    tpu.vector_store %arg16[%c80_138, %c0_139], %283 {strides = array<i32>} : memref<144x384xf32, #tpu.memory_space<vmem>>, vector<16x384xf32>,
    %285 = vector.extract_strided_slice %263 {offsets = [0, 17], sizes = [16, 367], strides = [1, 1]} : vector<16x384xf32> to vector<16x367xf32>
    %286 = vector.extract_strided_slice %263 {offsets = [0, 0], sizes = [16, 17], strides = [1, 1]} : vector<16x384xf32> to vector<16x17xf32>
    %287 = tpu.concatenate %285, %286 in 1 : vector<16x367xf32>, vector<16x17xf32> -> vector<16x384xf32>
    %c96_140 = arith.constant 96 : index
    %c0_141 = arith.constant 0 : index
    %288 = vector.load %arg16[%c96_140, %c0_141] : memref<144x384xf32, #tpu.memory_space<vmem>>, vector<16x384xf32>
    tpu.vector_store %arg16[%c96_140, %c0_141], %287 {strides = array<i32>} : memref<144x384xf32, #tpu.memory_space<vmem>>, vector<16x384xf32>,
    %289 = vector.extract_strided_slice %263 {offsets = [0, 18], sizes = [16, 366], strides = [1, 1]} : vector<16x384xf32> to vector<16x366xf32>
    %290 = vector.extract_strided_slice %263 {offsets = [0, 0], sizes = [16, 18], strides = [1, 1]} : vector<16x384xf32> to vector<16x18xf32>
    %291 = tpu.concatenate %289, %290 in 1 : vector<16x366xf32>, vector<16x18xf32> -> vector<16x384xf32>
    %c112_142 = arith.constant 112 : index
    %c0_143 = arith.constant 0 : index
    %292 = vector.load %arg16[%c112_142, %c0_143] : memref<144x384xf32, #tpu.memory_space<vmem>>, vector<16x384xf32>
    tpu.vector_store %arg16[%c112_142, %c0_143], %291 {strides = array<i32>} : memref<144x384xf32, #tpu.memory_space<vmem>>, vector<16x384xf32>,
    %293 = vector.extract_strided_slice %263 {offsets = [0, 19], sizes = [16, 365], strides = [1, 1]} : vector<16x384xf32> to vector<16x365xf32>
    %294 = vector.extract_strided_slice %263 {offsets = [0, 0], sizes = [16, 19], strides = [1, 1]} : vector<16x384xf32> to vector<16x19xf32>
    %295 = tpu.concatenate %293, %294 in 1 : vector<16x365xf32>, vector<16x19xf32> -> vector<16x384xf32>
    %c128_144 = arith.constant 128 : index
    %c0_145 = arith.constant 0 : index
    %296 = vector.load %arg16[%c128_144, %c0_145] : memref<144x384xf32, #tpu.memory_space<vmem>>, vector<16x384xf32>
    tpu.vector_store %arg16[%c128_144, %c0_145], %295 {strides = array<i32>} : memref<144x384xf32, #tpu.memory_space<vmem>>, vector<16x384xf32>,
    %c0_146 = arith.constant 0 : index
    %c0_147 = arith.constant 0 : index
    %297 = vector.load %arg16[%c0_146, %c0_147] : memref<144x384xf32, #tpu.memory_space<vmem>>, vector<144x384xf32>
    %298 = arith.truncf %297 : vector<144x384xf32> to vector<144x384xbf16>
    %c0_148 = arith.constant 0 : index
    %c0_149 = arith.constant 0 : index
    %299 = vector.load %arg13[%c0_148, %c0_149] : memref<1x144xbf16, #tpu.memory_space<vmem>>, vector<1x144xbf16>
    %cst_150 = arith.constant dense<0.000000e+00> : vector<1x384xf32>
    %300 = tpu.matmul %299, %298, %cst_150 {dimension_numbers = #tpu.dot_dimension_numbers<[1], [0], [0], [1], [0, 0, 1, 1], [], []>} : vector<1x144xbf16>, vector<144x384xbf16>, vector<1x384xf32> -> vector<1x384xf32>
    %c0_151 = arith.constant 0 : index
    %c0_152 = arith.constant 0 : index
    %301 = vector.load %arg14[%c0_151, %c0_152] : memref<1x1xf32, #tpu.memory_space<vmem>>, vector<1x1xf32>
    %302 = vector.broadcast %301 : vector<1x1xf32> to vector<1x384xf32>
    %303 = arith.addf %300, %302 : vector<1x384xf32>
    %304 = vector.extract_strided_slice %142 {offsets = [2, 0], sizes = [1, 384], strides = [1, 1]} : vector<3x384xf32> to vector<1x384xf32>
    %305 = vector.extract_strided_slice %142 {offsets = [1, 0], sizes = [1, 384], strides = [1, 1]} : vector<3x384xf32> to vector<1x384xf32>
    %306 = arith.mulf %305, %303 : vector<1x384xf32>
    %307 = arith.addf %304, %306 : vector<1x384xf32>
    %c0_153 = arith.constant 0 : index
    %c0_154 = arith.constant 0 : index
    %c0_155 = arith.constant 0 : index
    %308 = vector.load %arg15[%c0_153, %c0_154, %c0_155] : memref<1x5x384xf32, #tpu.memory_space<vmem>>, vector<1x3x384xf32>
    %309 = vector.shape_cast %308 : vector<1x3x384xf32> to vector<3x384xf32>
    %310 = vector.shape_cast %130 : vector<3x384xf32> to vector<1x3x384xf32>
    tpu.vector_store %arg15[%c0_153, %c0_154, %c0_155], %310 {strides = array<i32>} : memref<1x5x384xf32, #tpu.memory_space<vmem>>, vector<1x3x384xf32>,
    %c0_156 = arith.constant 0 : index
    %c3_157 = arith.constant 3 : index
    %c0_158 = arith.constant 0 : index
    %311 = vector.load %arg15[%c0_156, %c3_157, %c0_158] : memref<1x5x384xf32, #tpu.memory_space<vmem>>, vector<1x1x384xf32>
    %312 = vector.shape_cast %311 : vector<1x1x384xf32> to vector<1x384xf32>
    %313 = vector.shape_cast %303 : vector<1x384xf32> to vector<1x1x384xf32>
    tpu.vector_store %arg15[%c0_156, %c3_157, %c0_158], %313 {strides = array<i32>} : memref<1x5x384xf32, #tpu.memory_space<vmem>>, vector<1x1x384xf32>,
    %c0_159 = arith.constant 0 : index
    %c4 = arith.constant 4 : index
    %c0_160 = arith.constant 0 : index
    %314 = vector.load %arg15[%c0_159, %c4, %c0_160] : memref<1x5x384xf32, #tpu.memory_space<vmem>>, vector<1x1x384xf32>
    %315 = vector.shape_cast %314 : vector<1x1x384xf32> to vector<1x384xf32>
    %316 = vector.shape_cast %307 : vector<1x384xf32> to vector<1x1x384xf32>
    tpu.vector_store %arg15[%c0_159, %c4, %c0_160], %316 {strides = array<i32>} : memref<1x5x384xf32, #tpu.memory_space<vmem>>, vector<1x1x384xf32>,
    return
  }
  func.func @transform_0(%arg0: i32) -> (i32, i32) {
    %c0_i32 = arith.constant 0 : i32
    %c0_i32_0 = arith.constant 0 : i32
    %c0_i32_1 = arith.constant 0 : i32
    return %c0_i32, %c0_i32_0 : i32, i32
  }
  func.func @transform_1(%arg0: i32) -> (i32, i32, i32) {
    %c0_i32 = arith.constant 0 : i32
    %c0_i32_0 = arith.constant 0 : i32
    %c0_i32_1 = arith.constant 0 : i32
    return %arg0, %c0_i32, %c0_i32_0 : i32, i32, i32
  }
  func.func @transform_2(%arg0: i32) -> (i32, i32) {
    %c0_i32 = arith.constant 0 : i32
    %c0_i32_0 = arith.constant 0 : i32
    %c0_i32_1 = arith.constant 0 : i32
    return %c0_i32, %c0_i32_0 : i32, i32
  }
  func.func @transform_3(%arg0: i32) -> (i32, i32) {
    %c0_i32 = arith.constant 0 : i32
    %c0_i32_0 = arith.constant 0 : i32
    %c0_i32_1 = arith.constant 0 : i32
    return %c0_i32, %c0_i32_0 : i32, i32
  }
  func.func @transform_4(%arg0: i32) -> (i32, i32) {
    %c0_i32 = arith.constant 0 : i32
    %c0_i32_0 = arith.constant 0 : i32
    %c0_i32_1 = arith.constant 0 : i32
    return %c0_i32, %c0_i32_0 : i32, i32
  }
  func.func @transform_5(%arg0: i32) -> (i32, i32) {
    %c0_i32 = arith.constant 0 : i32
    %c0_i32_0 = arith.constant 0 : i32
    %c0_i32_1 = arith.constant 0 : i32
    return %c0_i32, %c0_i32_0 : i32, i32
  }
  func.func @transform_6(%arg0: i32) -> (i32, i32) {
    %c0_i32 = arith.constant 0 : i32
    %c0_i32_0 = arith.constant 0 : i32
    %c0_i32_1 = arith.constant 0 : i32
    return %c0_i32, %c0_i32_0 : i32, i32
  }
  func.func @transform_7(%arg0: i32) -> (i32, i32) {
    %c0_i32 = arith.constant 0 : i32
    %c0_i32_0 = arith.constant 0 : i32
    %c0_i32_1 = arith.constant 0 : i32
    return %c0_i32, %c0_i32_0 : i32, i32
  }
  func.func @transform_8(%arg0: i32) -> (i32, i32) {
    %c0_i32 = arith.constant 0 : i32
    %c0_i32_0 = arith.constant 0 : i32
    %c0_i32_1 = arith.constant 0 : i32
    return %c0_i32, %c0_i32_0 : i32, i32
  }
  func.func @transform_9(%arg0: i32) -> (i32, i32) {
    %c0_i32 = arith.constant 0 : i32
    %c0_i32_0 = arith.constant 0 : i32
    %c0_i32_1 = arith.constant 0 : i32
    return %c0_i32, %c0_i32_0 : i32, i32
  }
  func.func @transform_10(%arg0: i32) -> (i32, i32) {
    %c0_i32 = arith.constant 0 : i32
    %c0_i32_0 = arith.constant 0 : i32
    %c0_i32_1 = arith.constant 0 : i32
    return %c0_i32, %c0_i32_0 : i32, i32
  }
  func.func @transform_11(%arg0: i32) -> (i32, i32) {
    %c0_i32 = arith.constant 0 : i32
    %c0_i32_0 = arith.constant 0 : i32
    %c0_i32_1 = arith.constant 0 : i32
    return %c0_i32, %c0_i32_0 : i32, i32
  }
  func.func @transform_12(%arg0: i32) -> (i32, i32) {
    %c0_i32 = arith.constant 0 : i32
    %c0_i32_0 = arith.constant 0 : i32
    %c0_i32_1 = arith.constant 0 : i32
    return %c0_i32, %c0_i32_0 : i32, i32
  }
  func.func @transform_13(%arg0: i32) -> (i32, i32) {
    %c0_i32 = arith.constant 0 : i32
    %c0_i32_0 = arith.constant 0 : i32
    %c0_i32_1 = arith.constant 0 : i32
    return %c0_i32, %c0_i32_0 : i32, i32
  }
  func.func @transform_14(%arg0: i32) -> (i32, i32, i32) {
    %c0_i32 = arith.constant 0 : i32
    %c0_i32_0 = arith.constant 0 : i32
    %c0_i32_1 = arith.constant 0 : i32
    return %arg0, %c0_i32, %c0_i32_0 : i32, i32, i32
  }
}

</mosaic_0001>

<bundles_post_ra>
// kernel: full_net_forward.1
= control target key start
LH: loop header
LB: loop body
LE: loop exit
PB: predicated region body
PF: predicated region fallthrough
CT: control target
= control target key end

     0   :  { %s3512_s15 = smov 0   ;;  %s4994_s0 = inlined_call_operand.vmem [shape: f32[1,384], index: 0, kind: input, shape index: {}]   ;;  %s4995_s1 = inlined_call_operand.vmem [shape: f32[2,3,384], index: 1, kind: input, shape index: {}]   ;;  %s4996_s2 = inlined_call_operand.vmem [shape: bf16[16,27], index: 2, kind: input, shape index: {}]   ;;  %s4997_s3 = inlined_call_operand.vmem [shape: f32[16,1], index: 3, kind: input, shape index: {}]   ;;  %s4998_s4 = inlined_call_operand.vmem [shape: bf16[16,144], index: 4, kind: input, shape index: {}]   ;;  %s4999_s5 = inlined_call_operand.vmem [shape: f32[16,1], index: 5, kind: input, shape index: {}]   ;;  %s5000_s6 = inlined_call_operand.vmem [shape: bf16[3,144], index: 6, kind: input, shape index: {}]   ;;  %s5001_s7 = inlined_call_operand.vmem [shape: f32[3,1], index: 7, kind: input, shape index: {}]   ;;  %s5002_s8 = inlined_call_operand.vmem [shape: bf16[16,54], index: 8, kind: input, shape index: {}]   ;;  %s5003_s9 = inlined_call_operand.vmem [shape: f32[16,1], index: 9, kind: input, shape index: {}]   ;;  %s5004_s10 = inlined_call_operand.vmem [shape: bf16[16,144], index: 10, kind: input, shape index: {}]   ;;  %s5005_s11 = inlined_call_operand.vmem [shape: f32[16,1], index: 11, kind: input, shape index: {}]   ;;  %s5006_s12 = inlined_call_operand.vmem [shape: bf16[1,144], index: 12, kind: input, shape index: {}]   ;;  %s5007_s13 = inlined_call_operand.<no memory space> [shape: f32[1,1], index: 13, kind: input, shape index: {}]   ;;  %s5008_s14 = inlined_call_operand.vmem [shape: f32[2,5,384], index: 14, kind: output, shape index: {}]  }
   0x1   :  { %v19_v0 = vstv %s5007_s13 }
   0x2   :  { %20 = vst [vmem:[#allocation3] sm:$0x1] %v19_v0 }
   0x3 LB: > { %s3305_s16 = sadd.s32 4294967295, %s3419_s15   ;;  %p3309_p0 = scmp.ge.s32.totalorder %s3419_s15, 1  ;;  %s3419_s15 = sphi %s3512_s15, %s26_s15  }
   0x4   : > { %p414_p1 = scmp.lt.s32.totalorder %s3419_s15, 3 }
   0x6   : > { %p415_p2 = pnand %p3309_p0, %p414_p1 }
   0x8   : > { %418 = sbr.rel (%p415_p2) target bundleno = 2604 (0xa2c), region = 76 }
   0xf   : > { %p460_p3 = scmp.lt.s32.totalorder %s3305_s16, 1  ;;  %s3421_s20 = smov 17   ;;  %v5011_v6 = vmov 0.0   ;;  %vm3430_vm0 = vmmov 0   ;;  %v5013_v7 = vmov 0   ;;  %v676_v8 = vld [vmem:[%s4997_s3] sm:$0xff] }
  0x10   : > { %s3422_s21 = smov 18   ;;  %s3423_s22 = smov 1   ;;  %3345 = vmatprep.subr.bf16.mxu1 %v5011_v6  ;;  %3349 = vmatprep.mubr.msk.bf16.mxu1 %vm3430_vm0, %v5011_v6  ;;  %v677_v9 = vld [vmem:[%s4997_s3 + $0x8] sm:$0xff]  ;;  %vm523_vm1 = vcmask 138240   ;;  %vm548_vm2 = vcmask 7168   ;;  %vm501_vm3 = vcmask 146432  }
  0x11   : > { %s5073_s16 = smov (!%p460_p3, %s3305_s16), 1  ;;  %s3424_s23 = smov 127   ;;  %742 = vmatprep.mubr.bf16.mxu0 %v5013_v7  ;;  %3388 = vset.pattern.permute.xlu0 %v5013_v7  ;;  %vm576_vm4 = vcmask 1039360   ;;  %vm484_vm5 = vcmask 154624   ;;  %vm601_vm6 = vcmask 908288   ;;  %vm623_vm7 = vcmask 900096  }
  0x12   : > { %s3365_s13 = smul.u32 12, %s5073_s16  ;;  %s3425_s24 = smov 19   ;;  %3389 = vset.pattern.permute.xlu1 %v5013_v7  ;;  %vm645_vm8 = vcmask 891904   ;;  %vm697_vm9 = vcmask 1044480   ;;  %vm698_vm10 = vcmask 1045504   ;;  %vm693_vm11 = vcmask 220160  }
  0x13   : > { %s3426_s25 = smov 111   ;;  %s3427_s26 = smov 110   ;;  %vm1194_vm12 = vcmask 130048   ;;  %vm1744_vm13 = vcmask 1042432   ;;  %vm2113_vm14 = vcmask 441344  }
  0x14   : > { %s464_s19 = scalar_lea.vmem %s4995_s1, %s3365_s13  ;;  %s3429_s27 = smov 109  }
  0x15   : > { %v3526_v1 = vld [vmem:[%s464_s19] sm:$0x77]  ;;  %v3545_v3 = vld [vmem:[%s464_s19 + $0x8] sm:$0x7]  ;;  %s3366_s19 = smul.u32 24, %s5073_s16 }
  0x16   : > { %5034 = vst [vmem:[#allocation4_spill] sm:$0xff] %v3526_v1  ;;  %519 = vrot.lane.b32.xlu1 %v3526_v1, %s3421_s20  ;;  %568 = vst [vmem:[#allocation2 + $0x20] sm:$0x70] %v3526_v1  ;;  %497 = vrot.lane.b32.xlu0 %v3526_v1, %s3422_s21  ;;  %v3535_v2 = vcombine.high %v3526_v1, %v3526_v1  ;;  %v563_v4 = vcombine.low %v3526_v1, %v3526_v1 }
  0x17   : > { %5036 = vst [vmem:[#allocation6_spill] sm:$0xff] %v3545_v3  ;;  %v564_v5 = vcombine.low %v3545_v3, %v3545_v3  ;;  %s4325_s30 = scalar_lea.vmem %s5008_s14, %s3366_s19 }
  0x18   : > { %5035 = vst [vmem:[#allocation5_spill] sm:$0xff] %v3535_v2  ;;  %567 = vst [vmem:[#allocation2 + $0x18] sm:$0x70] %v563_v4 }
  0x19   : > { %569 = vst [vmem:[#allocation2 + $0x28] sm:$0x70] %v564_v5 }
  0x1a   : > { %544 = vrot.lane.b32.xlu0 %v3526_v1, %s3423_s22  ;;  %521 = vrot.lane.b32.xlu1 %v3535_v2, %s3421_s20 }
  0x1e   : > { %546 = vrot.lane.b32.xlu1 %v3535_v2, %s3423_s22  ;;  %499 = vrot.lane.b32.xlu0 %v3535_v2, %s3422_s21 }
  0x22   : > { %574 = vrot.lane.b32.xlu1 %v3545_v3, %s3424_s23  ;;  %572 = vrot.lane.b32.xlu0 %v3535_v2, %s3424_s23 }
  0x26   : > { %516 = vrot.lane.b32.xlu1 %v3545_v3, %s3421_s20  ;;  %494 = vrot.lane.b32.xlu0 %v3545_v3, %s3422_s21 }
  0x2a   : > { %570 = vrot.lane.b32.xlu1 %v3526_v1, %s3424_s23  ;;  %541 = vrot.lane.b32.xlu0 %v3545_v3, %s3423_s22 }
  0x2e   : > { %482 = vrot.lane.b32.xlu1 %v3535_v2, %s3425_s24  ;;  %480 = vrot.lane.b32.xlu0 %v3526_v1, %s3425_s24 }
  0x32   : > { %599 = vrot.lane.b32.xlu1 %v3545_v3, %s3426_s25  ;;  %597 = vrot.lane.b32.xlu0 %v3535_v2, %s3426_s25 }
  0x36   : > { %621 = vrot.lane.b32.xlu1 %v3545_v3, %s3427_s26  ;;  %619 = vrot.lane.b32.xlu0 %v3535_v2, %s3427_s26 }
  0x3a   : > { %595 = vrot.lane.b32.xlu1 %v3526_v1, %s3426_s25  ;;  %475 = vrot.lane.b32.xlu0 %v3545_v3, %s3425_s24 }
  0x3e   : > { %641 = vrot.lane.b32.xlu1 %v3535_v2, %s3429_s27  ;;  %617 = vrot.lane.b32.xlu0 %v3526_v1, %s3427_s26 }
  0x42   : > { %639 = vrot.lane.b32.xlu1 %v3526_v1, %s3429_s27  ;;  %643 = vrot.lane.b32.xlu0 %v3545_v3, %s3429_s27 }
  0x46   : > { %680 = vperm.xlu0 %3388, %v676_v8   ;;  %685 = vperm.xlu1 %3389, %v677_v9  }
  0x88   : > { %v520_v10 = vpop.permute.xlu1 %519  ;;  %v498_v11 = vpop.permute.xlu0 %497 }
  0x8c   : > { %v545_v12 = vpop.permute.xlu0 %544  ;;  %v522_v13 = vpop.permute.xlu1 %521 }
  0x8d   : > { %v3600_v14 = vsel %vm523_vm1, %v520_v10, %v522_v13 }
  0x8e   : > { %5037 = vst [vmem:[#allocation7_spill] sm:$0xff] %v3600_v14  ;;  %v530_v15 = vrot.slane %v3600_v14, 2 }
  0x90   : > { %536 = vst [vmem:[#allocation2 + $0x20] ss:$-20 sps:$4 sm:$0xc1] %v530_v15   ;;  %v547_v16 = vpop.permute.xlu1 %546  ;;  %v500_v17 = vpop.permute.xlu0 %499 }
  0x91   : > { %v3604_v18 = vsel %vm548_vm2, %v545_v12, %v547_v16  ;;  %v3607_v19 = vsel %vm501_vm3, %v498_v11, %v500_v17 }
  0x92   : > { %v555_v20 = vrot.slane %v3604_v18, 7  ;;  %v508_v21 = vrot.slane %v3607_v19, 5 }
  0x94   : > { %561 = vst [vmem:[#allocation2 + $0x20] sm:$0xe] %v555_v20  ;;  %514 = vst [vmem:[#allocation2 + $0x8] sm:$0x38] %v508_v21  ;;  %v575_v22 = vpop.permute.xlu1 %574  ;;  %v573_v23 = vpop.permute.xlu0 %572 }
  0x95   : > { %v3612_v24 = vsel %vm576_vm4, %v573_v23, %v575_v22 }
  0x96   : > { %v584_v25 = vrot.slane %v3612_v24, 1 }
  0x98   : > { %590 = vst [vmem:[#allocation2 + $0x38] ss:$-20 sps:$4 sm:$0x83] %v584_v25   ;;  %v517_v26 = vpop.permute.xlu1 %516  ;;  %v495_v27 = vpop.permute.xlu0 %494 }
  0x99   : > { %v3616_v28 = vsel %vm523_vm1, %v522_v13, %v517_v26  ;;  %v3619_v29 = vsel %vm523_vm1, %v517_v26, %v520_v10  ;;  %v3622_v30 = vsel %vm501_vm3, %v500_v17, %v495_v27  ;;  %v3625_v31 = vsel %vm501_vm3, %v495_v27, %v498_v11 }
  0x9a   : > { %5038 = vst [vmem:[#allocation8_spill] sm:$0xff] %v3616_v28  ;;  %5039 = vst [vmem:[#allocation9_spill] sm:$0xff] %v3619_v29  ;;  %v529_v32 = vrot.slane %v3619_v29, 2  ;;  %v531_v33 = vrot.slane %v3616_v28, 2  ;;  %v507_v34 = vrot.slane %v3625_v31, 5  ;;  %v509_v35 = vrot.slane %v3622_v30, 5 }
  0x9c   : > { %535 = vst [vmem:[#allocation2 + $0x18] ss:$-20 sps:$4 sm:$0xc1] %v529_v32   ;;  %537 = vst [vmem:[#allocation2 + $0x28] ss:$-20 sps:$4 sm:$0xc1] %v531_v33   ;;  %v571_v36 = vpop.permute.xlu1 %570  ;;  %v542_v37 = vpop.permute.xlu0 %541 }
  0x9d   : > { %513 = vst [vmem:[#allocation2] sm:$0x38] %v507_v34  ;;  %515 = vst [vmem:[#allocation2 + $0x10] sm:$0x38] %v509_v35  ;;  %v3632_v38 = vsel %vm576_vm4, %v571_v36, %v573_v23  ;;  %v3635_v39 = vsel %vm576_vm4, %v575_v22, %v571_v36  ;;  %v3638_v40 = vsel %vm548_vm2, %v547_v16, %v542_v37  ;;  %v3432_v34 = vmov 65535  }
  0x9e   : > { %5040 = vst [vmem:[#allocation10_spill] sm:$0xff] %v3635_v39  ;;  %v3641_v41 = vsel %vm548_vm2, %v542_v37, %v545_v12  ;;  %v583_v42 = vrot.slane %v3632_v38, 1  ;;  %v585_v43 = vrot.slane %v3635_v39, 1  ;;  %v556_v45 = vrot.slane %v3638_v40, 7 }
  0x9f   : > { %v554_v44 = vrot.slane %v3641_v41, 7  ;;  %v660_v57 = vld [vmem:[#allocation2 + $0x20] sm:$0xff]  ;;  %v699_v35 = vsel %vm697_vm9, 4294967295, %v3432_v34 }
  0xa0   : > { %589 = vst [vmem:[#allocation2 + $0x30] ss:$-20 sps:$4 sm:$0x83] %v583_v42   ;;  %591 = vst [vmem:[#allocation2 + $0x40] ss:$-20 sps:$4 sm:$0x83] %v585_v43   ;;  %v483_v46 = vpop.permute.xlu1 %482  ;;  %v481_v47 = vpop.permute.xlu0 %480 }
  0xa1   : > { %560 = vst [vmem:[#allocation2 + $0x18] sm:$0xe] %v554_v44  ;;  %562 = vst [vmem:[#allocation2 + $0x28] sm:$0xe] %v556_v45  ;;  %v3648_v48 = vsel %vm484_vm5, %v481_v47, %v483_v46  ;;  %v700_v37 = vsel %vm698_vm10, %v699_v35, 0 }
  0xa2   : > { %492 = vst [vmem:[#allocation2 + $0x8] sm:$0x7] %v3648_v48 }
  0xa4   : > { %v600_v49 = vpop.permute.xlu1 %599  ;;  %v598_v50 = vpop.permute.xlu0 %597 }
  0xa5   : > { %v3652_v51 = vsel %vm601_vm6, %v598_v50, %v600_v49 }
  0xa6   : > { %5041 = vst [vmem:[#allocation11_spill] sm:$0xff] %v3652_v51  ;;  %v609_v52 = vrot.slane %v3652_v51, 6 }
  0xa8   : > { %615 = vst [vmem:[#allocation2 + $0x38] sm:$0x1c] %v609_v52  ;;  %v622_v53 = vpop.permute.xlu1 %621  ;;  %v620_v54 = vpop.permute.xlu0 %619  ;;  %v659_v20 = vld [vmem:[#allocation2 + $0x18] sm:$0xff]  ;;  %v661_v27 = vld [vmem:[#allocation2 + $0x28] sm:$0xff] }
  0xa9   : > { %v3656_v55 = vsel %vm623_vm7, %v620_v54, %v622_v53  ;;  %v657_v56 = vld [vmem:[#allocation2 + $0x8] sm:$0xff] }
  0xaa   : > { %5042 = vst [vmem:[#allocation12_spill] sm:$0xff] %v3656_v55  ;;  %v631_v58 = vrot.slane %v3656_v55, 3  ;;  %v669_v59 = vpack.c.bf16 %v660_v57, %v657_v56  ;;  %v3393_v56 = vld [vmem:[%s4996_s2] sm:$0xff]   ;;  %v5009_v57 = vlaneseq }
  0xac   : > { %637 = vst [vmem:[#allocation2 + $0x38] sm:$0xe0] %v631_v58  ;;  %v596_v60 = vpop.permute.xlu1 %595  ;;  %710 = vmatprep.subr.bf16.mxu0 %v669_v59  ;;  %v476_v61 = vpop.permute.xlu0 %475  ;;  %v3701_v58 = vshrl.u32 %v5009_v57, 7 }
  0xad   : > { %v3660_v62 = vsel %vm601_vm6, %v596_v60, %v598_v50  ;;  %v3663_v63 = vsel %vm601_vm6, %v600_v49, %v596_v60  ;;  %v3666_v0 = vsel %vm484_vm5, %v483_v46, %v476_v61  ;;  %v3669_v4 = vsel %vm484_vm5, %v476_v61, %v481_v47  ;;  %v471_v60 = vld [vmem:[%s4994_s0] sm:$0x7] }
  0xae   : > { %5043 = vst [vmem:[#allocation13_spill] sm:$0xff] %v3660_v62  ;;  %5044 = vst [vmem:[#allocation14_spill] sm:$0xff] %v3663_v63  ;;  %v608_v5 = vrot.slane %v3660_v62, 6  ;;  %v610_v8 = vrot.slane %v3663_v63, 6  ;;  %v811_v59 = vsub.s32 2, %v3701_v58 }
  0xaf   : > { %491 = vst [vmem:[#allocation2] sm:$0x7] %v3669_v4  ;;  %493 = vst [vmem:[#allocation2 + $0x10] sm:$0x7] %v3666_v0 }
  0xb0   : > { %614 = vst [vmem:[#allocation2 + $0x30] sm:$0x1c] %v608_v5  ;;  %616 = vst [vmem:[#allocation2 + $0x40] sm:$0x1c] %v610_v8  ;;  %v642_v9 = vpop.permute.xlu1 %641  ;;  %v618_v10 = vpop.permute.xlu0 %617  ;;  %v3707_v8 = vrot.slane %v471_v60, %v811_v59 }
  0xb1   : > { %v3676_v11 = vsel %vm623_vm7, %v618_v10, %v620_v54  ;;  %v3679_v12 = vsel %vm623_vm7, %v622_v53, %v618_v10  ;;  %5050 = vst [vmem:[#allocation20_spill] sm:$0xff] %v3701_v58 }
  0xb2   : > { %5045 = vst [vmem:[#allocation15_spill] sm:$0xff] %v3676_v11  ;;  %5046 = vst [vmem:[#allocation16_spill] sm:$0xff] %v3679_v12  ;;  %v630_v13 = vrot.slane %v3676_v11, 3  ;;  %v632_v15 = vrot.slane %v3679_v12, 3 }
  0xb3   : > { %v663_v36 = vld [vmem:[#allocation2 + $0x38] sm:$0xff] }
  0xb4   : > { %636 = vst [vmem:[#allocation2 + $0x30] sm:$0xe0] %v630_v13  ;;  %638 = vst [vmem:[#allocation2 + $0x40] sm:$0xe0] %v632_v15  ;;  %v640_v16 = vpop.permute.xlu1 %639  ;;  %v644_v17 = vpop.permute.xlu0 %643 }
  0xb5   : > { %v3684_v21 = vsel %vm645_vm8, %v640_v16, %v642_v9  ;;  %v3687_v22 = vsel %vm645_vm8, %v642_v9, %v644_v17  ;;  %v3690_v23 = vsel %vm645_vm8, %v644_v17, %v640_v16 }
  0xb6   : > { %5047 = vst [vmem:[#allocation17_spill] sm:$0xff] %v3684_v21  ;;  %5048 = vst [vmem:[#allocation18_spill] sm:$0xff] %v3687_v22  ;;  %v656_v25 = vld [vmem:[#allocation2] sm:$0xff]  ;;  %v658_v26 = vld [vmem:[#allocation2 + $0x10] sm:$0xff] }
  0xb7   : > { %5049 = vst [vmem:[#allocation19_spill] sm:$0xff] %v3690_v23  ;;  %653 = vst [vmem:[#allocation2 + $0x48] sm:$0x7] %v3684_v21  ;;  %v668_v32 = vpack.c.bf16 %v659_v20, %v656_v25  ;;  %v670_v33 = vpack.c.bf16 %v661_v27, %v658_v26 }
  0xb8   : > { %654 = vst [vmem:[#allocation2 + $0x50] sm:$0x7] %v3687_v22  ;;  %655 = vst [vmem:[#allocation2 + $0x58] sm:$0x7] %v3690_v23 }
  0xb9   : > { %711 = vmatpush1.bf16.msra.mxu0 %v668_v32  ;;  %3346 = vmatpush3.bf16.msra.mxu1 %v670_v33  ;;  %v807_v33 = vsub.s32 1, %v3701_v58 }
  0xba   : > { %3347 = vmatprep.subr.bf16.mxu1 %v5011_v6 }
  0xbb   : > { %v664_v42 = vld [vmem:[#allocation2 + $0x40] sm:$0xff]  ;;  %v662_v43 = vld [vmem:[#allocation2 + $0x30] sm:$0xff] }
  0xbe   : > { %v665_v46 = vld [vmem:[#allocation2 + $0x48] sm:$0x7] }
  0xbf   : > { %v666_v44 = vld [vmem:[#allocation2 + $0x50] sm:$0x7]  ;;  %v667_v45 = vld [vmem:[#allocation2 + $0x58] sm:$0x7]  ;;  %v671_v50 = vpack.c.bf16 %v665_v46, %v662_v43  ;;  %v5010_v43 = vsub.s32 0, %v3701_v58 }
  0xc0   : > { %v672_v47 = vpack.c.bf16 %v666_v44, %v663_v36  ;;  %v673_v49 = vpack.c.bf16 %v667_v45, %v664_v42  ;;  %v3717_v36 = vrot.slane %v471_v60, %v807_v33 }
  0xc1   : > { %v702_v54 = vand.u32 %v700_v37, %v671_v50 }
  0xc2   : > { %v705_v52 = vand.u32 %v700_v37, %v672_v47  ;;  %v708_v53 = vand.u32 %v700_v37, %v673_v49  ;;  %v3733_v47 = vrot.slane %v471_v60, %v5010_v43 }
  0xc4   : > { %712 = vmatprep.subr.bf16.mxu0 %v705_v52  ;;  %3348 = vmatpush3.bf16.msra.mxu1 %v708_v53 }
  0xc5   : > { %713 = vmatpush1.bf16.msra.mxu0 %v702_v54  ;;  %1241 = vmatprep.subr.bf16.mxu1 %v5013_v7  ;;  %v681_v61 = vpop.permute.xlu0 %680  ;;  %v686_v34 = vpop.permute.xlu1 %685 }
  0xc7   : > { %3350 = vmatmul.mubr.msk.bf16.vlgmr.msra.gmra.mrb[0].mxu1 %vm693_vm11, %v3393_v56 }
  0xc8   : > { %3313 = vmatmul.mubr.msk.bf16.vlgmr.msra.gmra.mrb[0].mxu0 %vm693_vm11, %v3393_v56 }
 0x19a   : > { %v787_v5 = vpop.f32.mrb[0].mxu1 }
 0x19b   : > { %v788_v9 = vadd.f32 %v787_v5, %v681_v61  ;;  %v744_v10 = vpop.f32.mrb[0].mxu0  ;;  %v3351_v13 = vpop.f32.mrb[1].mxu1  ;;  %v1174_v5 = vld [vmem:[%s4999_s5 + $0x8] sm:$0xff] }
 0x19c   : > { %v746_v15 = vpop.f32.mrb[1].mxu0  ;;  %v790_v16 = vpop.f32.mrb[2].mxu1  ;;  %v745_v42 = vadd.f32 %v744_v10, %v681_v61 }
 0x19d   : > { %v796_v17 = vmax.f32 %v788_v9, 0.0  ;;  %v748_v20 = vpop.f32.mrb[2].mxu0  ;;  %v3352_v25 = vpop.f32.mrb[3].mxu1  ;;  %v747_v32 = vadd.f32 %v746_v15, %v681_v61  ;;  %v791_v37 = vadd.f32 %v790_v16, %v686_v34  ;;  %v3394_v61 = vld [vmem:[%s4998_s4 + $0x4] ss:$8 sps:$4 sm:$0xff]  }
 0x19e   : > { %v750_v26 = vpop.f32.mrb[3].mxu0  ;;  %v794_v46 = vmax.f32 %v745_v42, 0.0  ;;  %v749_v52 = vadd.f32 %v748_v20, %v686_v34  ;;  %3317 = vmatprep.mubr.msk.bf16.mxu0 %vm1194_vm12, %v3394_v61  ;;  %3318 = vmatprep.mubr.msk.bf16.mxu1 %vm1194_vm12, %v3394_v61  ;;  %v1173_v9 = vld [vmem:[%s4999_s5] sm:$0xff] }
 0x19f   : > { %v3710_v27 = vmul.f32 %v3707_v8, %v796_v17  ;;  %v795_v35 = vmax.f32 %v747_v32, 0.0  ;;  %v799_v45 = vmax.f32 %v791_v37, 0.0  ;;  %v751_v56 = vadd.f32 %v750_v26, %v686_v34 }
 0x1a0   : > { %v3743_v50 = vmul.f32 %v3733_v47, %v794_v46  ;;  %v797_v53 = vmax.f32 %v749_v52, 0.0 }
 0x1a1   : > { %966 = vrot.lane.b32.xlu0 %v3710_v27, %s3424_s23  ;;  %824 = vrot.lane.b32.xlu1 %v3710_v27, %s3425_s24  ;;  %v3725_v44 = vmul.f32 %v3717_v36, %v795_v35  ;;  %v3736_v49 = vmul.f32 %v3707_v8, %v799_v45  ;;  %v798_v59 = vmax.f32 %v751_v56, 0.0 }
 0x1a2   : > { %v3778_v54 = vmul.f32 %v3733_v47, %v797_v53 }
 0x1a3   : > { %v3789_v60 = vmul.f32 %v3717_v36, %v798_v59 }
 0x1a5   : > { %998 = vrot.lane.b32.xlu0 %v3710_v27, %s3426_s25  ;;  %860 = vrot.lane.b32.xlu1 %v3710_v27, %s3422_s21 }
 0x1a9   : > { %892 = vrot.lane.b32.xlu1 %v3710_v27, %s3421_s20  ;;  %836 = vrot.lane.b32.xlu0 %v3725_v44, %s3425_s24 }
 0x1ad   : > { %924 = vrot.lane.b32.xlu1 %v3710_v27, %s3423_s22  ;;  %826 = vrot.lane.b32.xlu0 %v3736_v49, %s3425_s24 }
 0x1b1   : > { %868 = vrot.lane.b32.xlu0 %v3725_v44, %s3422_s21  ;;  %834 = vrot.lane.b32.xlu1 %v3743_v50, %s3425_s24 }
 0x1b5   : > { %862 = vrot.lane.b32.xlu0 %v3736_v49, %s3422_s21  ;;  %866 = vrot.lane.b32.xlu1 %v3743_v50, %s3422_s21 }
 0x1b9   : > { %900 = vrot.lane.b32.xlu0 %v3725_v44, %s3421_s20  ;;  %898 = vrot.lane.b32.xlu1 %v3743_v50, %s3421_s20 }
 0x1bd   : > { %894 = vrot.lane.b32.xlu0 %v3736_v49, %s3421_s20  ;;  %930 = vrot.lane.b32.xlu1 %v3743_v50, %s3423_s22 }
 0x1c1   : > { %932 = vrot.lane.b32.xlu0 %v3725_v44, %s3423_s22  ;;  %962 = vrot.lane.b32.xlu1 %v3743_v50, %s3424_s23 }
 0x1c5   : > { %926 = vrot.lane.b32.xlu0 %v3736_v49, %s3423_s22  ;;  %994 = vrot.lane.b32.xlu1 %v3743_v50, %s3426_s25 }
 0x1c9   : > { %972 = vrot.lane.b32.xlu0 %v3736_v49, %s3424_s23  ;;  %964 = vrot.lane.b32.xlu1 %v3725_v44, %s3424_s23 }
 0x1cd   : > { %1004 = vrot.lane.b32.xlu0 %v3736_v49, %s3426_s25  ;;  %996 = vrot.lane.b32.xlu1 %v3725_v44, %s3426_s25 }
 0x1d1   : > { %968 = vrot.lane.b32.xlu0 %v3778_v54, %s3424_s23  ;;  %1028 = vrot.lane.b32.xlu1 %v3725_v44, %s3427_s26 }
 0x1d5   : > { %1000 = vrot.lane.b32.xlu0 %v3778_v54, %s3426_s25  ;;  %838 = vrot.lane.b32.xlu1 %v3778_v54, %s3425_s24 }
 0x1d9   : > { %840 = vrot.lane.b32.xlu0 %v3789_v60, %s3425_s24  ;;  %870 = vrot.lane.b32.xlu1 %v3778_v54, %s3422_s21 }
 0x1dd   : > { %872 = vrot.lane.b32.xlu0 %v3789_v60, %s3422_s21  ;;  %902 = vrot.lane.b32.xlu1 %v3778_v54, %s3421_s20 }
 0x1e1   : > { %904 = vrot.lane.b32.xlu0 %v3789_v60, %s3421_s20  ;;  %934 = vrot.lane.b32.xlu1 %v3778_v54, %s3423_s22 }
 0x1e5   : > { %936 = vrot.lane.b32.xlu0 %v3789_v60, %s3423_s22  ;;  %1026 = vrot.lane.b32.xlu1 %v3743_v50, %s3427_s26 }
 0x1e9   : > { %1030 = vrot.lane.b32.xlu0 %v3710_v27, %s3427_s26  ;;  %1060 = vrot.lane.b32.xlu1 %v3725_v44, %s3429_s27 }
 0x1ed   : > { %1036 = vrot.lane.b32.xlu0 %v3736_v49, %s3427_s26  ;;  %970 = vrot.lane.b32.xlu1 %v3789_v60, %s3424_s23 }
 0x1f1   : > { %1032 = vrot.lane.b32.xlu0 %v3778_v54, %s3427_s26  ;;  %1002 = vrot.lane.b32.xlu1 %v3789_v60, %s3426_s25 }
 0x1f5   : > { %1062 = vrot.lane.b32.xlu0 %v3710_v27, %s3429_s27  ;;  %1034 = vrot.lane.b32.xlu1 %v3789_v60, %s3427_s26 }
 0x1f9   : > { %1068 = vrot.lane.b32.xlu0 %v3736_v49, %s3429_s27  ;;  %1066 = vrot.lane.b32.xlu1 %v3789_v60, %s3429_s27 }
 0x1fd   : > { %1064 = vrot.lane.b32.xlu0 %v3778_v54, %s3429_s27  ;;  %1058 = vrot.lane.b32.xlu1 %v3743_v50, %s3429_s27 }
 0x201   : > { %1182 = vperm.xlu0 %3388, %v1174_v5   ;;  %1177 = vperm.xlu1 %3389, %v1173_v9  }
 0x213   : > { %v3842_v10 = vpop.permute.xlu0 %966  ;;  %v825_v13 = vpop.permute.xlu1 %824 }
 0x217   : > { %v3844_v15 = vpop.permute.xlu0 %998  ;;  %v861_v16 = vpop.permute.xlu1 %860 }
 0x21b   : > { %v893_v17 = vpop.permute.xlu1 %892  ;;  %v837_v20 = vpop.permute.xlu0 %836 }
 0x21c   : > { %v843_v2 = vsel %vm484_vm5, %v837_v20, %v825_v13 }
 0x21f   : > { %v3846_v25 = vpop.permute.xlu1 %924  ;;  %v827_v26 = vpop.permute.xlu0 %826 }
 0x223   : > { %v869_v32 = vpop.permute.xlu0 %868  ;;  %v835_v33 = vpop.permute.xlu1 %834 }
 0x224   : > { %v842_v11 = vsel %vm484_vm5, %v835_v33, %v837_v20  ;;  %v852_v14 = vsel %vm484_vm5, %v825_v13, %v835_v33  ;;  %v875_v21 = vsel %vm501_vm3, %v869_v32, %v861_v16 }
 0x227   : > { %v863_v34 = vpop.permute.xlu0 %862  ;;  %v867_v35 = vpop.permute.xlu1 %866 }
 0x228   : > { %v874_v39 = vsel %vm501_vm3, %v867_v35, %v869_v32 }
 0x22b   : > { %v901_v37 = vpop.permute.xlu0 %900  ;;  %v899_v42 = vpop.permute.xlu1 %898 }
 0x22f   : > { %v895_v45 = vpop.permute.xlu0 %894  ;;  %v3848_v46 = vpop.permute.xlu1 %930 }
 0x233   : > { %v933_v52 = vpop.permute.xlu0 %932  ;;  %v3850_v53 = vpop.permute.xlu1 %962 }
 0x237   : > { %v927_v56 = vpop.permute.xlu0 %926  ;;  %v3852_v59 = vpop.permute.xlu1 %994 }
 0x23b   : > { %v3854_v61 = vpop.permute.xlu0 %972  ;;  %v3856_v5 = vpop.permute.xlu1 %964 }
 0x23f   : > { %v3858_v9 = vpop.permute.xlu0 %1004  ;;  %v3860_v57 = vpop.permute.xlu1 %996 }
 0x243   : > { %v3862_v43 = vpop.permute.xlu0 %968  ;;  %v3864_v6 = vpop.permute.xlu1 %1028 }
 0x247   : > { %v3866_v7 = vpop.permute.xlu0 %1000  ;;  %v839_v58 = vpop.permute.xlu1 %838 }
 0x248   : > { %v853_v12 = vsel %vm484_vm5, %v827_v26, %v839_v58 }
 0x249   : > { %v1144_v23 = vpack.c.bf16 %v853_v12, %v852_v14 }
 0x24b   : > { %v841_v55 = vpop.permute.xlu0 %840  ;;  %v871_v3 = vpop.permute.xlu1 %870 }
 0x24c   : > { %v844_v1 = vsel %vm484_vm5, %v839_v58, %v841_v55  ;;  %v845_v28 = vsel %vm484_vm5, %v841_v55, %v827_v26  ;;  %v885_v63 = vsel %vm501_vm3, %v863_v34, %v871_v3  ;;  %v5051_v55 = vmov 0  }
 0x24d   : > { %v1146_v29 = vpack.c.bf16 %v845_v28, %v843_v2  ;;  %v1145_v22 = vpack.c.bf16 %v844_v1, %v842_v11  ;;  %v884_v1 = vsel %vm501_vm3, %v861_v16, %v867_v35  ;;  %v907_v11 = vsel %vm523_vm1, %v901_v37, %v893_v17 }
 0x24e   : > { %v1147_v28 = vpack.c.bf16 %v885_v63, %v884_v1  ;;  %v938_v16 = vsel %vm548_vm2, %v3848_v46, %v933_v52  ;;  %v986_v1 = vsel %vm576_vm4, %v3842_v10, %v3850_v53 }
 0x24f   : > { %v873_v62 = vpop.permute.xlu0 %872  ;;  %v903_v51 = vpop.permute.xlu1 %902  ;;  %1242 = vmatpush1.bf16.msra.mxu1 %v1146_v29  ;;  %1198 = vmatprep.subr.bf16.mxu0 %v1145_v22 }
 0x250   : > { %v876_v20 = vsel %vm501_vm3, %v871_v3, %v873_v62  ;;  %v877_v58 = vsel %vm501_vm3, %v873_v62, %v863_v34  ;;  %1199 = vmatpush1.bf16.msra.mxu0 %v1144_v23  ;;  %1243 = vmatprep.subr.bf16.mxu1 %v5051_v55  ;;  %v917_v12 = vsel %vm523_vm1, %v895_v45, %v903_v51 }
 0x251   : > { %v1149_v2 = vpack.c.bf16 %v877_v58, %v875_v21  ;;  %v1148_v14 = vpack.c.bf16 %v876_v20, %v874_v39  ;;  %v906_v3 = vsel %vm523_vm1, %v899_v42, %v901_v37  ;;  %v916_v39 = vsel %vm523_vm1, %v893_v17, %v899_v42 }
 0x252   : > { %v1150_v13 = vpack.c.bf16 %v917_v12, %v916_v39  ;;  %v948_v17 = vsel %vm548_vm2, %v3846_v25, %v3848_v46  ;;  %v1156_v46 = vpack.c.bf16 %v3778_v54, %v3743_v50 }
 0x253   : > { %v905_v29 = vpop.permute.xlu0 %904  ;;  %v935_v22 = vpop.permute.xlu1 %934  ;;  %1244 = vmatpush1.bf16.msra.mxu1 %v1149_v2  ;;  %1200 = vmatprep.subr.bf16.mxu0 %v1148_v14 }
 0x254   : > { %v908_v62 = vsel %vm523_vm1, %v903_v51, %v905_v29  ;;  %v909_v23 = vsel %vm523_vm1, %v905_v29, %v895_v45  ;;  %1201 = vmatpush1.bf16.msra.mxu0 %v1147_v28  ;;  %1245 = vmatprep.subr.bf16.mxu1 %v5051_v55  ;;  %v949_v26 = vsel %vm548_vm2, %v927_v56, %v935_v22 }
 0x255   : > { %v1152_v63 = vpack.c.bf16 %v909_v23, %v907_v11  ;;  %v1151_v21 = vpack.c.bf16 %v908_v62, %v906_v3  ;;  %v939_v51 = vsel %vm548_vm2, %v933_v52, %v3846_v25  ;;  %v1153_v45 = vpack.c.bf16 %v949_v26, %v948_v17 }
 0x256   : > { %v1157_v52 = vpack.c.bf16 %v3789_v60, %v3725_v44  ;;  %v987_v25 = vsel %vm576_vm4, %v3854_v61, %v3862_v43  ;;  %v974_v44 = vsel %vm576_vm4, %v3850_v53, %v3856_v5  ;;  %v1019_v53 = vsel %vm601_vm6, %v3858_v9, %v3866_v7 }
 0x257   : > { %v937_v32 = vpop.permute.xlu0 %936  ;;  %v1027_v33 = vpop.permute.xlu1 %1026  ;;  %1246 = vmatpush1.bf16.msra.mxu1 %v1152_v63  ;;  %1202 = vmatprep.subr.bf16.mxu0 %v1151_v21  ;;  %v1161_v54 = vpack.c.bf16 %v987_v25, %v986_v1  ;;  %v1007_v11 = vsel %vm601_vm6, %v3860_v57, %v3844_v15 }
 0x258   : > { %v940_v34 = vsel %vm548_vm2, %v935_v22, %v937_v32  ;;  %v941_v35 = vsel %vm548_vm2, %v937_v32, %v927_v56  ;;  %1203 = vmatpush1.bf16.msra.mxu0 %v1150_v13  ;;  %1247 = vmatprep.subr.bf16.mxu1 %v5051_v55  ;;  %v1158_v56 = vpack.c.bf16 %v3736_v49, %v3710_v27 }
 0x259   : > { %v1155_v37 = vpack.c.bf16 %v941_v35, %v939_v51  ;;  %v1154_v42 = vpack.c.bf16 %v940_v34, %v938_v16  ;;  %v975_v27 = vsel %vm576_vm4, %v3856_v5, %v3842_v10  ;;  %v1018_v10 = vsel %vm601_vm6, %v3844_v15, %v3852_v59 }
 0x25a   : > { %v1164_v22 = vpack.c.bf16 %v1019_v53, %v1018_v10  ;;  %v1038_v23 = vsel %vm623_vm7, %v1027_v33, %v3864_v6 }
 0x25b   : > { %v1031_v20 = vpop.permute.xlu0 %1030  ;;  %v3899_v58 = vpop.permute.xlu1 %1060  ;;  %1248 = vmatpush1.bf16.msra.mxu1 %v1155_v37  ;;  %1204 = vmatprep.subr.bf16.mxu0 %v1154_v42 }
 0x25c   : > { %1205 = vmatpush1.bf16.msra.mxu0 %v1153_v45  ;;  %1249 = vmatprep.subr.bf16.mxu1 %v5051_v55 }
 0x25d   : > { %1206 = vmatprep.subr.bf16.mxu0 %v1157_v52 }
 0x25f   : > { %v1037_v60 = vpop.permute.xlu0 %1036  ;;  %v971_v2 = vpop.permute.xlu1 %970  ;;  %1250 = vmatpush1.bf16.msra.mxu1 %v1158_v56  ;;  %v3396_v56 = vld [vmem:[%s4998_s4] ss:$8 sps:$4 sm:$0xff]  }
 0x260   : > { %v976_v49 = vsel %vm576_vm4, %v3862_v43, %v971_v2  ;;  %v977_v50 = vsel %vm576_vm4, %v971_v2, %v3854_v61  ;;  %1207 = vmatpush1.bf16.msra.mxu0 %v1156_v46  ;;  %1251 = vmatprep.subr.bf16.mxu1 %v5051_v55  ;;  %v1006_v43 = vsel %vm601_vm6, %v3852_v59, %v3860_v57 }
 0x261   : > { %v1160_v14 = vpack.c.bf16 %v977_v50, %v975_v27  ;;  %v1159_v28 = vpack.c.bf16 %v976_v49, %v974_v44  ;;  %v1039_v57 = vsel %vm623_vm7, %v3864_v6, %v1031_v20 }
 0x263   : > { %v1033_v5 = vpop.permute.xlu0 %1032  ;;  %v1003_v61 = vpop.permute.xlu1 %1002  ;;  %1252 = vmatpush1.bf16.msra.mxu1 %v1161_v54  ;;  %1208 = vmatprep.subr.bf16.mxu0 %v1160_v14 }
 0x264   : > { %v1008_v12 = vsel %vm601_vm6, %v3866_v7, %v1003_v61  ;;  %v1009_v29 = vsel %vm601_vm6, %v1003_v61, %v3858_v9  ;;  %1209 = vmatpush1.bf16.msra.mxu0 %v1159_v28  ;;  %1253 = vmatprep.subr.bf16.mxu1 %v5051_v55  ;;  %v1051_v62 = vsel %vm623_vm7, %v1037_v60, %v1033_v5 }
 0x265   : > { %v1163_v3 = vpack.c.bf16 %v1009_v29, %v1007_v11  ;;  %v1162_v59 = vpack.c.bf16 %v1008_v12, %v1006_v43  ;;  %v1050_v7 = vsel %vm623_vm7, %v1031_v20, %v1027_v33 }
 0x266   : > { %v1167_v13 = vpack.c.bf16 %v1051_v62, %v1050_v7 }
 0x267   : > { %v1063_v15 = vpop.permute.xlu0 %1062  ;;  %v1035_v39 = vpop.permute.xlu1 %1034  ;;  %1254 = vmatpush1.bf16.msra.mxu1 %v1164_v22  ;;  %1210 = vmatprep.subr.bf16.mxu0 %v1163_v3 }
 0x268   : > { %v1040_v9 = vsel %vm623_vm7, %v1033_v5, %v1035_v39  ;;  %v1041_v63 = vsel %vm623_vm7, %v1035_v39, %v1037_v60  ;;  %1211 = vmatpush1.bf16.msra.mxu0 %v1162_v59  ;;  %1255 = vmatprep.subr.bf16.mxu1 %v5051_v55  ;;  %v1071_v6 = vsel %vm645_vm8, %v3899_v58, %v1063_v15  ;;  %v4069_v39 = vld.sshfl [vmem:[%s5000_s6] sm:$0x33 pattern:$0x76325410] }
 0x269   : > { %v1166_v21 = vpack.c.bf16 %v1041_v63, %v1039_v57  ;;  %v1165_v16 = vpack.c.bf16 %v1040_v9, %v1038_v23  ;;  %v1658_v7 = vcombine.high %v4069_v39, %v4069_v39  ;;  %v1644_v9 = vld [vmem:[%s5001_s7] sm:$0x7] }
 0x26b   : > { %v1069_v26 = vpop.permute.xlu0 %1068  ;;  %v1067_v32 = vpop.permute.xlu1 %1066  ;;  %1212 = vmatprep.subr.bf16.mxu0 %v1166_v21  ;;  %1256 = vmatpush1.bf16.msra.mxu1 %v1167_v13 }
 0x26c   : > { %v1073_v51 = vsel %vm645_vm8, %v1067_v32, %v1069_v26  ;;  %1213 = vmatpush1.bf16.msra.mxu0 %v1165_v16  ;;  %1257 = vmatprep.subr.bf16.mxu1 %v5051_v55 }
 0x26d   : > { %v1169_v33 = vpack.c.bf16 %v1073_v51, %v1071_v6  ;;  %v1834_v6 = vrot.slane %v3622_v30, 2 }
 0x26f   : > { %v1065_v34 = vpop.permute.xlu0 %1064  ;;  %v1059_v35 = vpop.permute.xlu1 %1058  ;;  %1214 = vmatprep.subr.bf16.mxu0 %v1169_v33 }
 0x270   : > { %v1072_v17 = vsel %vm645_vm8, %v1065_v34, %v1067_v32  ;;  %v1083_v37 = vsel %vm645_vm8, %v1069_v26, %v1065_v34  ;;  %v1070_v42 = vsel %vm645_vm8, %v1059_v35, %v3899_v58  ;;  %v1082_v45 = vsel %vm645_vm8, %v1063_v15, %v1059_v35 }
 0x271   : > { %v1168_v20 = vpack.c.bf16 %v1072_v17, %v1070_v42  ;;  %v1170_v52 = vpack.c.bf16 %v1083_v37, %v1082_v45  ;;  %v1833_v35 = vrot.slane %v3607_v19, 2  ;;  %v1832_v17 = vrot.slane %v3625_v31, 2 }
 0x272   : > { %v1900_v45 = vrot.slane %v3638_v40, 6 }
 0x273   : > { %1215 = vmatpush1.bf16.msra.mxu0 %v1168_v20  ;;  %1258 = vmatpush1.bf16.msra.mxu1 %v1170_v52 }
 0x274   : > { %1704 = vmatprep.subr.bf16.mxu1 %v5051_v55 }
 0x276   : > { %1231 = vmatmul.mubr.bf16.vlgmr.msra.gmra.mrb[4].mxu0 %v3396_v56  ;;  %1274 = vmatmul.mubr.bf16.vlgmr.msra.gmra.mrb[4].mxu1 %v3396_v56 }
 0x277   : > { %3320 = vmatprep.mubr.msk.bf16.mxu0 %vm1194_vm12, %v1658_v7  ;;  %3321 = vmatprep.mubr.msk.bf16.mxu1 %vm1194_vm12, %v1658_v7 }
 0x280   : > { %v1178_v25 = vpop.permute.xlu1 %1177  ;;  %v1183_v53 = vpop.permute.xlu0 %1182 }
 0x349   : > { %v1232_v46 = vpop.f32.mrb[4].mxu0  ;;  %v1275_v1 = vpop.f32.mrb[4].mxu1 }
 0x34a   : > { %v1276_v44 = vadd.f32 %v1275_v1, %v1178_v25  ;;  %v1234_v60 = vpop.f32.mrb[5].mxu0  ;;  %v1277_v58 = vpop.f32.mrb[5].mxu1  ;;  %v1233_v5 = vadd.f32 %v1232_v46, %v1178_v25  ;;  %v1898_v46 = vrot.slane %v3641_v41, 6 }
 0x34b   : > { %v1236_v2 = vpop.f32.mrb[6].mxu0  ;;  %v1278_v27 = vpop.f32.mrb[6].mxu1  ;;  %v1235_v28 = vadd.f32 %v1234_v60, %v1178_v25  ;;  %v1899_v25 = vrot.slane %v3604_v18, 6  ;;  %v5052_v60 = vld [vmem:[#allocation10_spill] sm:$0xff]  ;;  %v5053_v58 = vld [vmem:[#allocation11_spill] sm:$0xff] }
 0x34c   : > { %v1284_v49 = vmax.f32 %v1276_v44, 0.0  ;;  %v1238_v50 = vpop.f32.mrb[7].mxu0  ;;  %v1280_v54 = vpop.f32.mrb[7].mxu1  ;;  %v1279_v43 = vadd.f32 %v1278_v27, %v1183_v53  ;;  %v1282_v12 = vmax.f32 %v1233_v5, 0.0  ;;  %v1237_v3 = vadd.f32 %v1236_v2, %v1183_v53  ;;  %v5054_v2 = vld [vmem:[#allocation13_spill] sm:$0xff] }
 0x34d   : > { %v1283_v10 = vmax.f32 %v1235_v28, 0.0  ;;  %v1239_v23 = vadd.f32 %v1238_v50, %v1183_v53  ;;  %v1941_v44 = vrot.slane %v3632_v38, 2  ;;  %v1943_v18 = vrot.slane %v5052_v60, 2  ;;  %v5055_v54 = vld [vmem:[#allocation14_spill] sm:$0xff] }
 0x34e   : > { %v3965_v14 = vmul.f32 %v1284_v49, %v3707_v8  ;;  %v1287_v11 = vmax.f32 %v1279_v43, 0.0  ;;  %v3990_v22 = vmul.f32 %v1282_v12, %v3733_v47  ;;  %v1285_v59 = vmax.f32 %v1237_v3, 0.0  ;;  %v5056_v3 = vld [vmem:[#allocation17_spill] sm:$0xff] }
 0x34f   : > { %v3976_v61 = vmul.f32 %v1283_v10, %v3717_v36  ;;  %v1286_v57 = vmax.f32 %v1239_v23, 0.0  ;;  %v1975_v41 = vrot.slane %v5053_v58, 4  ;;  %v1974_v27 = vrot.slane %v5054_v2, 4  ;;  %v5059_v58 = vld [vmem:[#allocation9_spill] sm:$0xff] }
 0x350   : > { %1438 = vrot.lane.b32.xlu0 %v3965_v14, %s3424_s23  ;;  %1296 = vrot.lane.b32.xlu1 %v3965_v14, %s3425_s24  ;;  %v3983_v29 = vmul.f32 %v1287_v11, %v3707_v8  ;;  %v4025_v62 = vmul.f32 %v1285_v59, %v3733_v47  ;;  %v1976_v28 = vrot.slane %v5055_v54, 4 }
 0x351   : > { %v4036_v15 = vmul.f32 %v1286_v57, %v3717_v36 }
 0x354   : > { %1470 = vrot.lane.b32.xlu0 %v3965_v14, %s3426_s25  ;;  %1332 = vrot.lane.b32.xlu1 %v3965_v14, %s3422_s21 }
 0x358   : > { %1364 = vrot.lane.b32.xlu1 %v3965_v14, %s3421_s20  ;;  %1308 = vrot.lane.b32.xlu0 %v3976_v61, %s3425_s24 }
 0x35c   : > { %1396 = vrot.lane.b32.xlu1 %v3965_v14, %s3423_s22  ;;  %1298 = vrot.lane.b32.xlu0 %v3983_v29, %s3425_s24 }
 0x360   : > { %1340 = vrot.lane.b32.xlu0 %v3976_v61, %s3422_s21  ;;  %1306 = vrot.lane.b32.xlu1 %v3990_v22, %s3425_s24 }
 0x364   : > { %1334 = vrot.lane.b32.xlu0 %v3983_v29, %s3422_s21  ;;  %1338 = vrot.lane.b32.xlu1 %v3990_v22, %s3422_s21 }
 0x368   : > { %1372 = vrot.lane.b32.xlu0 %v3976_v61, %s3421_s20  ;;  %1370 = vrot.lane.b32.xlu1 %v3990_v22, %s3421_s20 }
 0x36c   : > { %1366 = vrot.lane.b32.xlu0 %v3983_v29, %s3421_s20  ;;  %1402 = vrot.lane.b32.xlu1 %v3990_v22, %s3423_s22 }
 0x370   : > { %1404 = vrot.lane.b32.xlu0 %v3976_v61, %s3423_s22  ;;  %1434 = vrot.lane.b32.xlu1 %v3990_v22, %s3424_s23 }
 0x374   : > { %1398 = vrot.lane.b32.xlu0 %v3983_v29, %s3423_s22  ;;  %1466 = vrot.lane.b32.xlu1 %v3990_v22, %s3426_s25 }
 0x378   : > { %1444 = vrot.lane.b32.xlu0 %v3983_v29, %s3424_s23  ;;  %1436 = vrot.lane.b32.xlu1 %v3976_v61, %s3424_s23 }
 0x37c   : > { %1476 = vrot.lane.b32.xlu0 %v3983_v29, %s3426_s25  ;;  %1468 = vrot.lane.b32.xlu1 %v3976_v61, %s3426_s25 }
 0x380   : > { %1440 = vrot.lane.b32.xlu0 %v4025_v62, %s3424_s23  ;;  %1500 = vrot.lane.b32.xlu1 %v3976_v61, %s3427_s26 }
 0x384   : > { %1472 = vrot.lane.b32.xlu0 %v4025_v62, %s3426_s25  ;;  %1310 = vrot.lane.b32.xlu1 %v4025_v62, %s3425_s24 }
 0x388   : > { %1312 = vrot.lane.b32.xlu0 %v4036_v15, %s3425_s24  ;;  %1342 = vrot.lane.b32.xlu1 %v4025_v62, %s3422_s21 }
 0x38c   : > { %1344 = vrot.lane.b32.xlu0 %v4036_v15, %s3422_s21  ;;  %1374 = vrot.lane.b32.xlu1 %v4025_v62, %s3421_s20 }
 0x390   : > { %1376 = vrot.lane.b32.xlu0 %v4036_v15, %s3421_s20  ;;  %1406 = vrot.lane.b32.xlu1 %v4025_v62, %s3423_s22 }
 0x394   : > { %1408 = vrot.lane.b32.xlu0 %v4036_v15, %s3423_s22  ;;  %1498 = vrot.lane.b32.xlu1 %v3990_v22, %s3427_s26 }
 0x398   : > { %1502 = vrot.lane.b32.xlu0 %v3965_v14, %s3427_s26  ;;  %1532 = vrot.lane.b32.xlu1 %v3976_v61, %s3429_s27 }
 0x39c   : > { %1508 = vrot.lane.b32.xlu0 %v3983_v29, %s3427_s26  ;;  %1442 = vrot.lane.b32.xlu1 %v4036_v15, %s3424_s23 }
 0x3a0   : > { %1504 = vrot.lane.b32.xlu0 %v4025_v62, %s3427_s26  ;;  %1474 = vrot.lane.b32.xlu1 %v4036_v15, %s3426_s25 }
 0x3a4   : > { %1534 = vrot.lane.b32.xlu0 %v3965_v14, %s3429_s27  ;;  %1506 = vrot.lane.b32.xlu1 %v4036_v15, %s3427_s26 }
 0x3a8   : > { %1540 = vrot.lane.b32.xlu0 %v3983_v29, %s3429_s27  ;;  %1538 = vrot.lane.b32.xlu1 %v4036_v15, %s3429_s27 }
 0x3ac   : > { %1536 = vrot.lane.b32.xlu0 %v4025_v62, %s3429_s27  ;;  %1530 = vrot.lane.b32.xlu1 %v3990_v22, %s3429_s27 }
 0x3b0   : > { %1647 = vperm.xlu1 %3389, %v1644_v9   ;;  %v5057_v9 = vld [vmem:[#allocation19_spill] sm:$0xff] }
 0x3c2   : > { %v4090_v63 = vpop.permute.xlu0 %1438  ;;  %v1297_v21 = vpop.permute.xlu1 %1296 }
 0x3c6   : > { %v4092_v13 = vpop.permute.xlu0 %1470  ;;  %v1333_v16 = vpop.permute.xlu1 %1332 }
 0x3ca   : > { %v1365_v26 = vpop.permute.xlu1 %1364  ;;  %v1309_v32 = vpop.permute.xlu0 %1308 }
 0x3cb   : > { %v4096_v51 = vsel %vm484_vm5, %v1309_v32, %v1297_v21 }
 0x3cc   : > { %1328 = vst [vmem:[#allocation2 + $0x10] sm:$0xff] %v4096_v51 }
 0x3cd   : > { %1807 = vst [vmem:[#allocation2 + $0x10] sm:$0x7] %v3666_v0  ;;  %1840 = vst [vmem:[#allocation2 + $0x10] sm:$0xc0] %v1834_v6 }
 0x3ce   : > { %v1397_v33 = vpop.permute.xlu1 %1396  ;;  %v4102_v34 = vpop.permute.xlu0 %1298 }
 0x3d2   : > { %v1341_v37 = vpop.permute.xlu0 %1340  ;;  %v1307_v42 = vpop.permute.xlu1 %1306 }
 0x3d3   : > { %v4108_v20 = vsel %vm501_vm3, %v1341_v37, %v1333_v16  ;;  %v4111_v52 = vsel %vm484_vm5, %v1307_v42, %v1309_v32  ;;  %v4114_v0 = vsel %vm484_vm5, %v1297_v21, %v1307_v42  ;;  %v5058_v21 = vld [vmem:[#allocation18_spill] sm:$0xff] }
 0x3d4   : > { %1360 = vst [vmem:[#allocation2 + $0x40] sm:$0xff] %v4108_v20  ;;  %1326 = vst [vmem:[#allocation2] sm:$0xff] %v4114_v0 }
 0x3d5   : > { %1327 = vst [vmem:[#allocation2 + $0x8] sm:$0xff] %v4111_v52  ;;  %1906 = vst [vmem:[#allocation2 + $0x40] sm:$0x1c] %v1900_v45 }
 0x3d6   : > { %1805 = vst [vmem:[#allocation2] sm:$0x7] %v3669_v4  ;;  %1806 = vst [vmem:[#allocation2 + $0x8] sm:$0x7] %v3648_v48  ;;  %v4125_v40 = vpop.permute.xlu0 %1334  ;;  %v1339_v56 = vpop.permute.xlu1 %1338  ;;  %v1942_v48 = vrot.slane %v3612_v24, 2 }
 0x3d7   : > { %1838 = vst [vmem:[#allocation2] sm:$0xc0] %v1832_v17  ;;  %1839 = vst [vmem:[#allocation2 + $0x8] sm:$0xc0] %v1833_v35  ;;  %v4130_v1 = vsel %vm501_vm3, %v1339_v56, %v1341_v37  ;;  %v4133_v4 = vsel %vm501_vm3, %v1333_v16, %v1339_v56 }
 0x3d8   : > { %1358 = vst [vmem:[#allocation2 + $0x30] sm:$0xff] %v4133_v4  ;;  %1359 = vst [vmem:[#allocation2 + $0x38] sm:$0xff] %v4130_v1 }
 0x3d9   : > { %1904 = vst [vmem:[#allocation2 + $0x30] sm:$0x1c] %v1898_v46  ;;  %1905 = vst [vmem:[#allocation2 + $0x38] sm:$0x1c] %v1899_v25 }
 0x3da   : > { %v1373_v49 = vpop.permute.xlu0 %1372  ;;  %v1371_v50 = vpop.permute.xlu1 %1370 }
 0x3db   : > { %v4144_v53 = vsel %vm523_vm1, %v1373_v49, %v1365_v26  ;;  %v4147_v10 = vsel %vm523_vm1, %v1371_v50, %v1373_v49  ;;  %v4150_v43 = vsel %vm523_vm1, %v1365_v26, %v1371_v50 }
 0x3dc   : > { %1392 = vst [vmem:[#allocation2 + $0x70] sm:$0xff] %v4144_v53  ;;  %1390 = vst [vmem:[#allocation2 + $0x60] sm:$0xff] %v4150_v43 }
 0x3dd   : > { %1391 = vst [vmem:[#allocation2 + $0x68] sm:$0xff] %v4147_v10  ;;  %1952 = vst [vmem:[#allocation2 + $0x70] sm:$0x1] %v1943_v18 }
 0x3de   : > { %1982 = vst [vmem:[#allocation2 + $0x70] sm:$0x70] %v1976_v28  ;;  %1950 = vst [vmem:[#allocation2 + $0x60] sm:$0x1] %v1941_v44  ;;  %v4161_v5 = vpop.permute.xlu0 %1366  ;;  %v1403_v11 = vpop.permute.xlu1 %1402  ;;  %v5061_v28 = vld [vmem:[#allocation8_spill] sm:$0xff] }
 0x3df   : > { %1951 = vst [vmem:[#allocation2 + $0x68] sm:$0x1] %v1942_v48  ;;  %1980 = vst [vmem:[#allocation2 + $0x60] sm:$0x70] %v1974_v27  ;;  %v4164_v12 = vsel %vm548_vm2, %v1397_v33, %v1403_v11  ;;  %v5060_v27 = vld [vmem:[#allocation7_spill] sm:$0xff] }
 0x3e0   : > { %1981 = vst [vmem:[#allocation2 + $0x68] sm:$0x70] %v1975_v41  ;;  %1422 = vst [vmem:[#allocation2 + $0x90] sm:$0xff] %v4164_v12  ;;  %v1865_v41 = vrot.slane %v5059_v58, 4  ;;  %v1866_v49 = vrot.slane %v5060_v27, 4 }
 0x3e1   : > { %2037 = vst [vmem:[#allocation2 + $0x90] sm:$0x7] %v5056_v3 }
 0x3e2   : > { %v1405_v59 = vpop.permute.xlu0 %1404  ;;  %v4168_v23 = vpop.permute.xlu1 %1434 }
 0x3e3   : > { %v4171_v57 = vsel %vm548_vm2, %v1403_v11, %v1405_v59  ;;  %v4174_v7 = vsel %vm548_vm2, %v1405_v59, %v1397_v33  ;;  %v1867_v11 = vrot.slane %v5061_v28, 4 }
 0x3e4   : > { %1423 = vst [vmem:[#allocation2 + $0x98] sm:$0xff] %v4171_v57  ;;  %1424 = vst [vmem:[#allocation2 + $0xa0] sm:$0xff] %v4174_v7 }
 0x3e5   : > { %2039 = vst [vmem:[#allocation2 + $0xa0] sm:$0x7] %v5057_v9  ;;  %2038 = vst [vmem:[#allocation2 + $0x98] sm:$0x7] %v5058_v21  ;;  %v5062_v21 = vld [vmem:[#allocation4_spill] sm:$0xff] }
 0x3e6   : > { %v4180_v16 = vpop.permute.xlu0 %1398  ;;  %v4182_v26 = vpop.permute.xlu1 %1466 }
 0x3ea   : > { %v4184_v32 = vpop.permute.xlu0 %1444  ;;  %v4186_v37 = vpop.permute.xlu1 %1436 }
 0x3ee   : > { %v4188_v42 = vpop.permute.xlu0 %1476  ;;  %v4190_v33 = vpop.permute.xlu1 %1468 }
 0x3f2   : > { %v4192_v45 = vpop.permute.xlu0 %1440  ;;  %v4194_v56 = vpop.permute.xlu1 %1500 }
 0x3f6   : > { %v4196_v25 = vpop.permute.xlu0 %1472  ;;  %v1311_v46 = vpop.permute.xlu1 %1310 }
 0x3f7   : > { %v1325_v2 = vsel %vm484_vm5, %v4102_v34, %v1311_v46 }
 0x3f8   : > { %1329 = vst [vmem:[#allocation2 + $0x18] sm:$0xff] %v1325_v2 }
 0x3f9   : > { %1841 = vst [vmem:[#allocation2 + $0x18] sm:$0x1] %v1832_v17  ;;  %1871 = vst [vmem:[#allocation2 + $0x18] sm:$0x70] %v1865_v41 }
 0x3fa   : > { %v1313_v50 = vpop.permute.xlu0 %1312  ;;  %v1343_v54 = vpop.permute.xlu1 %1342 }
 0x3fb   : > { %v1316_v3 = vsel %vm484_vm5, %v1311_v46, %v1313_v50  ;;  %v1317_v59 = vsel %vm484_vm5, %v1313_v50, %v4102_v34  ;;  %v1357_v9 = vsel %vm501_vm3, %v4125_v40, %v1343_v54  ;;  %v1616_v34 = vpack.c.bf16 %v1325_v2, %v4114_v0  ;;  %v5064_v0 = vld [vmem:[#allocation5_spill] sm:$0xff] }
 0x3fc   : > { %1330 = vst [vmem:[#allocation2 + $0x20] sm:$0xff] %v1316_v3  ;;  %1331 = vst [vmem:[#allocation2 + $0x28] sm:$0xff] %v1317_v59  ;;  %v1618_v31 = vpack.c.bf16 %v1317_v59, %v4096_v51  ;;  %v1617_v17 = vpack.c.bf16 %v1316_v3, %v4111_v52  ;;  %v5063_v51 = vld [vmem:[#allocation15_spill] sm:$0xff] }
 0x3fd   : > { %1361 = vst [vmem:[#allocation2 + $0x48] sm:$0xff] %v1357_v9  ;;  %1842 = vst [vmem:[#allocation2 + $0x20] sm:$0x1] %v1833_v35  ;;  %v2007_v52 = vrot.slane %v5063_v51, 6 }
 0x3fe   : > { %1843 = vst [vmem:[#allocation2 + $0x28] sm:$0x1] %v1834_v6  ;;  %1872 = vst [vmem:[#allocation2 + $0x20] sm:$0x70] %v1866_v49  ;;  %v1345_v46 = vpop.permute.xlu0 %1344  ;;  %v1375_v58 = vpop.permute.xlu1 %1374  ;;  %1705 = vmatpush1.bf16.msra.mxu1 %v1618_v31  ;;  %1663 = vmatprep.subr.bf16.mxu0 %v1617_v17 }
 0x3ff   : > { %1873 = vst [vmem:[#allocation2 + $0x28] sm:$0x70] %v1867_v11  ;;  %1929 = vst [vmem:[#allocation2 + $0x48] sm:$0x7] %v5062_v21  ;;  %v1348_v19 = vsel %vm501_vm3, %v1343_v54, %v1345_v46  ;;  %v1349_v30 = vsel %vm501_vm3, %v1345_v46, %v4125_v40  ;;  %v1389_v6 = vsel %vm523_vm1, %v4161_v5, %v1375_v58  ;;  %1664 = vmatpush1.bf16.msra.mxu0 %v1616_v34 }
 0x400   : > { %1947 = vst [vmem:[#allocation2 + $0x48] sm:$0xc0] %v1941_v44  ;;  %1706 = vmatprep.subr.bf16.mxu1 %v5051_v55  ;;  %1362 = vst [vmem:[#allocation2 + $0x50] sm:$0xff] %v1348_v19  ;;  %v1621_v38 = vpack.c.bf16 %v1349_v30, %v4108_v20  ;;  %v1620_v35 = vpack.c.bf16 %v1348_v19, %v4130_v1  ;;  %v5065_v44 = vld [vmem:[#allocation6_spill] sm:$0xff]  ;;  %v1619_v40 = vpack.c.bf16 %v1357_v9, %v4133_v4  ;;  %v5066_v20 = vld [vmem:[#allocation12_spill] sm:$0xff] }
 0x401   : > { %1363 = vst [vmem:[#allocation2 + $0x58] sm:$0xff] %v1349_v30  ;;  %1393 = vst [vmem:[#allocation2 + $0x78] sm:$0xff] %v1389_v6  ;;  %v2008_v27 = vrot.slane %v5066_v20, 6  ;;  %v5067_v1 = vld [vmem:[#allocation16_spill] sm:$0xff]  ;;  %v1622_v60 = vpack.c.bf16 %v1389_v6, %v4150_v43  ;;  %v1629_v9 = vpack.c.bf16 %v4036_v15, %v3976_v61  ;;  %v1446_v61 = vsel %vm576_vm4, %v4168_v23, %v4186_v37 }
 0x402   : > { %1930 = vst [vmem:[#allocation2 + $0x50] sm:$0x7] %v5064_v0  ;;  %1931 = vst [vmem:[#allocation2 + $0x58] sm:$0x7] %v5065_v44  ;;  %v1377_v41 = vpop.permute.xlu0 %1376  ;;  %v1407_v2 = vpop.permute.xlu1 %1406  ;;  %1707 = vmatpush1.bf16.msra.mxu1 %v1621_v38  ;;  %1665 = vmatprep.subr.bf16.mxu0 %v1620_v35  ;;  %v2009_v49 = vrot.slane %v5067_v1, 6  ;;  %v1479_v34 = vsel %vm601_vm6, %v4190_v33, %v4092_v13 }
 0x403   : > { %1948 = vst [vmem:[#allocation2 + $0x50] sm:$0xc0] %v1942_v48  ;;  %1949 = vst [vmem:[#allocation2 + $0x58] sm:$0xc0] %v1943_v18  ;;  %v1380_v50 = vsel %vm523_vm1, %v1375_v58, %v1377_v41  ;;  %v1381_v24 = vsel %vm523_vm1, %v1377_v41, %v4161_v5  ;;  %1666 = vmatpush1.bf16.msra.mxu0 %v1619_v40  ;;  %1708 = vmatprep.subr.bf16.mxu1 %v5051_v55 }
 0x404   : > { %2013 = vst [vmem:[#allocation2 + $0x78] sm:$0x1c] %v2007_v52  ;;  %1394 = vst [vmem:[#allocation2 + $0x80] sm:$0xff] %v1380_v50  ;;  %v1624_v4 = vpack.c.bf16 %v1381_v24, %v4144_v53  ;;  %v1623_v48 = vpack.c.bf16 %v1380_v50, %v4147_v10  ;;  %v1421_v18 = vsel %vm548_vm2, %v4180_v16, %v1407_v2 }
 0x405   : > { %1395 = vst [vmem:[#allocation2 + $0x88] sm:$0xff] %v1381_v24  ;;  %2014 = vst [vmem:[#allocation2 + $0x80] sm:$0x1c] %v2008_v27  ;;  %v1625_v43 = vpack.c.bf16 %v1421_v18, %v4164_v12  ;;  %v1628_v12 = vpack.c.bf16 %v4025_v62, %v3990_v22  ;;  %v5068_v18 = vmov 0.0  }
 0x406   : > { %2015 = vst [vmem:[#allocation2 + $0x88] sm:$0x1c] %v2009_v49  ;;  %v1409_v54 = vpop.permute.xlu0 %1408  ;;  %v1499_v28 = vpop.permute.xlu1 %1498  ;;  %1709 = vmatpush1.bf16.msra.mxu1 %v1624_v4  ;;  %1667 = vmatprep.subr.bf16.mxu0 %v1623_v48 }
 0x407   : > { %v1412_v5 = vsel %vm548_vm2, %v1407_v2, %v1409_v54  ;;  %v1413_v11 = vsel %vm548_vm2, %v1409_v54, %v4180_v16  ;;  %1668 = vmatpush1.bf16.msra.mxu0 %v1622_v60  ;;  %1710 = vmatprep.subr.bf16.mxu1 %v5051_v55  ;;  %v1630_v16 = vpack.c.bf16 %v3983_v29, %v3965_v14 }
 0x408   : > { %v1627_v53 = vpack.c.bf16 %v1413_v11, %v4174_v7  ;;  %v1626_v10 = vpack.c.bf16 %v1412_v5, %v4171_v57  ;;  %v1459_v57 = vsel %vm576_vm4, %v4184_v32, %v4192_v45  ;;  %v1458_v7 = vsel %vm576_vm4, %v4090_v63, %v4168_v23 }
 0x409   : > { %v1447_v14 = vsel %vm576_vm4, %v4186_v37, %v4090_v63  ;;  %v1633_v62 = vpack.c.bf16 %v1459_v57, %v1458_v7  ;;  %v1491_v23 = vsel %vm601_vm6, %v4188_v42, %v4196_v25  ;;  %v1490_v63 = vsel %vm601_vm6, %v4092_v13, %v4182_v26 }
 0x40a   : > { %v1503_v3 = vpop.permute.xlu0 %1502  ;;  %v4254_v59 = vpop.permute.xlu1 %1532  ;;  %1711 = vmatpush1.bf16.msra.mxu1 %v1627_v53  ;;  %1669 = vmatprep.subr.bf16.mxu0 %v1626_v10  ;;  %v1478_v37 = vsel %vm601_vm6, %v4182_v26, %v4190_v33  ;;  %v1636_v51 = vpack.c.bf16 %v1491_v23, %v1490_v63  ;;  %v1510_v30 = vsel %vm623_vm7, %v1499_v28, %v4194_v56 }
 0x40b   : > { %1670 = vmatpush1.bf16.msra.mxu0 %v1625_v43  ;;  %1712 = vmatprep.subr.bf16.mxu1 %v5051_v55  ;;  %v1511_v13 = vsel %vm623_vm7, %v4194_v56, %v1503_v3 }
 0x40c   : > { %1671 = vmatprep.subr.bf16.mxu0 %v1629_v9 }
 0x40e   : > { %v1509_v15 = vpop.permute.xlu0 %1508  ;;  %v1443_v31 = vpop.permute.xlu1 %1442  ;;  %1713 = vmatpush1.bf16.msra.mxu1 %v1630_v16 }
 0x40f   : > { %v1448_v29 = vsel %vm576_vm4, %v4192_v45, %v1443_v31  ;;  %v1449_v22 = vsel %vm576_vm4, %v1443_v31, %v4184_v32  ;;  %1672 = vmatpush1.bf16.msra.mxu0 %v1628_v12  ;;  %1714 = vmatprep.subr.bf16.mxu1 %v5051_v55 }
 0x410   : > { %v1632_v17 = vpack.c.bf16 %v1449_v22, %v1447_v14  ;;  %v1631_v21 = vpack.c.bf16 %v1448_v29, %v1446_v61 }
 0x412   : > { %v1505_v45 = vpop.permute.xlu0 %1504  ;;  %v1475_v32 = vpop.permute.xlu1 %1474  ;;  %1715 = vmatpush1.bf16.msra.mxu1 %v1633_v62  ;;  %1673 = vmatprep.subr.bf16.mxu0 %v1632_v17 }
 0x413   : > { %v1480_v46 = vsel %vm601_vm6, %v4196_v25, %v1475_v32  ;;  %v1481_v58 = vsel %vm601_vm6, %v1475_v32, %v4188_v42  ;;  %1674 = vmatpush1.bf16.msra.mxu0 %v1631_v21  ;;  %1716 = vmatprep.subr.bf16.mxu1 %v5051_v55  ;;  %v1523_v19 = vsel %vm623_vm7, %v1509_v15, %v1505_v45 }
 0x414   : > { %v1635_v52 = vpack.c.bf16 %v1481_v58, %v1479_v34  ;;  %v1634_v26 = vpack.c.bf16 %v1480_v46, %v1478_v37  ;;  %v1522_v42 = vsel %vm623_vm7, %v1503_v3, %v1499_v28 }
 0x415   : > { %v1639_v0 = vpack.c.bf16 %v1523_v19, %v1522_v42 }
 0x416   : > { %v1535_v33 = vpop.permute.xlu0 %1534  ;;  %v1507_v6 = vpop.permute.xlu1 %1506  ;;  %1717 = vmatpush1.bf16.msra.mxu1 %v1636_v51  ;;  %1675 = vmatprep.subr.bf16.mxu0 %v1635_v52 }
 0x417   : > { %v1512_v25 = vsel %vm623_vm7, %v1505_v45, %v1507_v6  ;;  %v1513_v38 = vsel %vm623_vm7, %v1507_v6, %v1509_v15  ;;  %1676 = vmatpush1.bf16.msra.mxu0 %v1634_v26  ;;  %1718 = vmatprep.subr.bf16.mxu1 %v5051_v55  ;;  %v1543_v56 = vsel %vm645_vm8, %v4254_v59, %v1535_v33 }
 0x418   : > { %v1638_v35 = vpack.c.bf16 %v1513_v38, %v1511_v13  ;;  %v1637_v44 = vpack.c.bf16 %v1512_v25, %v1510_v30 }
 0x41a   : > { %v1541_v40 = vpop.permute.xlu0 %1540  ;;  %v1539_v41 = vpop.permute.xlu1 %1538  ;;  %1677 = vmatprep.subr.bf16.mxu0 %v1638_v35  ;;  %1719 = vmatpush1.bf16.msra.mxu1 %v1639_v0 }
 0x41b   : > { %v1545_v2 = vsel %vm645_vm8, %v1539_v41, %v1541_v40  ;;  %1678 = vmatpush1.bf16.msra.mxu0 %v1637_v44  ;;  %1720 = vmatprep.subr.bf16.mxu1 %v5051_v55 }
 0x41c   : > { %v1641_v20 = vpack.c.bf16 %v1545_v2, %v1543_v56 }
 0x41e   : > { %v1537_v27 = vpop.permute.xlu0 %1536  ;;  %v1531_v1 = vpop.permute.xlu1 %1530  ;;  %1679 = vmatprep.subr.bf16.mxu0 %v1641_v20 }
 0x41f   : > { %v1544_v49 = vsel %vm645_vm8, %v1537_v27, %v1539_v41  ;;  %v1555_v50 = vsel %vm645_vm8, %v1541_v40, %v1537_v27  ;;  %v1542_v24 = vsel %vm645_vm8, %v1531_v1, %v4254_v59  ;;  %v1554_v4 = vsel %vm645_vm8, %v1535_v33, %v1531_v1 }
 0x420   : > { %v1640_v48 = vpack.c.bf16 %v1544_v49, %v1542_v24  ;;  %v1642_v60 = vpack.c.bf16 %v1555_v50, %v1554_v4 }
 0x422   : > { %1680 = vmatpush1.bf16.msra.mxu0 %v1640_v48  ;;  %1721 = vmatpush1.bf16.msra.mxu1 %v1642_v60 }
 0x423   : > { %3353 = vmatprep.subr.bf16.mxu1 %v5068_v18 }
 0x425   : > { %1696 = vmatmul.mubr.bf16.vlgmr.msra.gmra.mrb[8].mxu0 %v4069_v39  ;;  %1737 = vmatmul.mubr.bf16.vlgmr.msra.gmra.mrb[8].mxu1 %v4069_v39 }
 0x426   : > { %2158 = vmatprep.mubr.bf16.mxu0 %v5051_v55  ;;  %3361 = vmatprep.mubr.msk.bf16.mxu1 %vm3430_vm0, %v5068_v18 }
 0x42f   : > { %v1648_v54 = vpop.permute.xlu1 %1647 }
 0x4f8   : > { %v1697_v28 = vpop.f32.mrb[8].mxu0  ;;  %v1738_v5 = vpop.f32.mrb[8].mxu1 }
 0x4f9   : > { %v1698_v11 = vadd.f32 %v1697_v28, %v1648_v54  ;;  %v1739_v39 = vadd.f32 %v1738_v5, %v1648_v54  ;;  %v1699_v53 = vpop.f32.mrb[9].mxu0  ;;  %v1740_v10 = vpop.f32.mrb[9].mxu1 }
 0x4fa   : > { %v1700_v43 = vadd.f32 %v1699_v53, %v1648_v54  ;;  %v1741_v3 = vpop.f32.mrb[10].mxu1  ;;  %v1701_v59 = vpop.f32.mrb[10].mxu0 }
 0x4fb   : > { %v1745_v9 = vsel %vm1744_vm13, %v1698_v11, -inf  ;;  %3185 = vst [vmem:[%s4325_s30] sm:$0x7] %v1698_v11  ;;  %v1759_v16 = vsel %vm1744_vm13, %v1739_v39, -inf  ;;  %3187 = vst [vmem:[%s4325_s30 + $0x10] sm:$0x7] %v1739_v39  ;;  %v1742_v57 = vpop.f32.mrb[11].mxu1 }
 0x4fc   : > { %v1702_v12 = vpop.f32.mrb[11].mxu0  ;;  %v1746_v7 = vrot.slane %v1745_v9, 4  ;;  %v1760_v61 = vrot.slane %v1759_v16, 4  ;;  %v1752_v15 = vsel %vm1744_vm13, %v1700_v43, -inf  ;;  %3186 = vst [vmem:[%s4325_s30 + $0x8] sm:$0x7] %v1700_v43 }
 0x4fd   : > { %v1753_v31 = vrot.slane %v1752_v15, 4 }
 0x4fe   : > { %v1747_v14 = vmax.f32 %v1745_v9, %v1746_v7  ;;  %v1761_v29 = vmax.f32 %v1759_v16, %v1760_v61 }
 0x4ff   : > { %v1754_v22 = vmax.f32 %v1752_v15, %v1753_v31  ;;  %v2097_v15 = vld [vmem:[%s5003_s9 + $0x8] sm:$0xff]  ;;  %v2096_v31 = vld [vmem:[%s5003_s9] sm:$0xff] }
 0x500   : > { %v1748_v62 = vrot.slane %v1747_v14, 2  ;;  %v1762_v17 = vrot.slane %v1761_v29, 2 }
 0x501   : > { %v1755_v21 = vrot.slane %v1754_v22, 2 }
 0x502   : > { %v1749_v23 = vmax.f32 %v1747_v14, %v1748_v62  ;;  %v1763_v63 = vmax.f32 %v1761_v29, %v1762_v17 }
 0x503   : > { %v1756_v37 = vmax.f32 %v1754_v22, %v1755_v21 }
 0x504   : > { %v1750_v45 = vrot.slane %v1749_v23, 1  ;;  %v1764_v32 = vrot.slane %v1763_v63, 1 }
 0x505   : > { %v1757_v34 = vrot.slane %v1756_v37, 1 }
 0x506   : > { %v1751_v46 = vmax.f32 %v1749_v23, %v1750_v45  ;;  %v1765_v58 = vmax.f32 %v1763_v63, %v1764_v32 }
 0x507   : > { %v1758_v51 = vmax.f32 %v1756_v37, %v1757_v34 }
 0x508   : > { %v1766_v52 = vsub.f32 %v1698_v11, %v1751_v46  ;;  %v1768_v26 = vsub.f32 %v1739_v39, %v1765_v58 }
 0x509   : > { %v1767_v19 = vsub.f32 %v1700_v43, %v1758_v51 }
 0x50a   : > { %v1769_v30 = vmul.f32 1.442695, %v1766_v52  ;;  %v1773_v13 = vmul.f32 1.442695, %v1768_v26 }
 0x50b   : > { %v1771_v33 = vmul.f32 1.442695, %v1767_v19 }
 0x50c   : > { %3401 = vpow2.f32 %v1769_v30 }
 0x50d   : > { %3403 = vpow2.f32 %v1773_v13 }
 0x50e   : > { %3405 = vpow2.f32 %v1771_v33 }
 0x516   : > { %v3402_v6 = vpop.eup %3401 }
 0x517   : > { %v3404_v42 = vpop.eup %3403  ;;  %v1775_v25 = vsel %vm1744_vm13, %v3402_v6, 0.0 }
 0x518   : > { %v3406_v38 = vpop.eup %3405  ;;  %v1776_v35 = vrot.slane %v1775_v25, 4  ;;  %v1789_v0 = vsel %vm1744_vm13, %v3404_v42, 0.0 }
 0x519   : > { %v1790_v44 = vrot.slane %v1789_v0, 4  ;;  %v1782_v40 = vsel %vm1744_vm13, %v3406_v38, 0.0 }
 0x51a   : > { %v1777_v41 = vadd.f32 %v1776_v35, %v1775_v25  ;;  %v1783_v56 = vrot.slane %v1782_v40, 4 }
 0x51b   : > { %v1791_v2 = vadd.f32 %v1790_v44, %v1789_v0 }
 0x51c   : > { %v1778_v20 = vrot.slane %v1777_v41, 2  ;;  %v1784_v27 = vadd.f32 %v1783_v56, %v1782_v40 }
 0x51d   : > { %v1792_v1 = vrot.slane %v1791_v2, 2 }
 0x51e   : > { %v1779_v49 = vadd.f32 %v1778_v20, %v1777_v41  ;;  %v1785_v50 = vrot.slane %v1784_v27, 2 }
 0x51f   : > { %v1793_v24 = vadd.f32 %v1792_v1, %v1791_v2 }
 0x520   : > { %v1780_v4 = vrot.slane %v1779_v49, 1  ;;  %v1786_v48 = vadd.f32 %v1785_v50, %v1784_v27 }
 0x521   : > { %v1794_v60 = vrot.slane %v1793_v24, 1 }
 0x522   : > { %v1781_v54 = vadd.f32 %v1780_v4, %v1779_v49  ;;  %v1787_v28 = vrot.slane %v1786_v48, 1 }
 0x523   : > { %v1795_v5 = vadd.f32 %v1794_v60, %v1793_v24 }
 0x524   : > { %3407 = vrcp.f32 %v1781_v54  ;;  %v1788_v11 = vadd.f32 %v1787_v28, %v1786_v48 }
 0x525   : > { %3409 = vrcp.f32 %v1795_v5 }
 0x526   : > { %3411 = vrcp.f32 %v1788_v11 }
 0x52e   : > { %v3408_v39 = vpop.eup %3407 }
 0x52f   : > { %v3410_v53 = vpop.eup %3409  ;;  %v1799_v10 = vmul.f32 %v3408_v39, %v3402_v6 }
 0x530   : > { %v3412_v43 = vpop.eup %3411  ;;  %v1801_v3 = vmul.f32 %v3410_v53, %v3404_v42 }
 0x531   : > { %v4337_v59 = vmul.f32 %v1799_v10, %v3733_v47  ;;  %v1800_v9 = vmul.f32 %v3412_v43, %v3406_v38 }
 0x532   : > { %v4340_v16 = vmul.f32 %v1801_v3, %v3707_v8 }
 0x533   : > { %v4343_v57 = vmul.f32 %v1800_v9, %v3717_v36  ;;  %v1932_v12 = vrot.slane %v4337_v59, 5 }
 0x534   : > { %1844 = vrot.lane.b32.xlu1 %v4340_v16, %s3422_s21  ;;  %1809 = vrot.lane.b32.xlu0 %v4340_v16, %s3425_s24  ;;  %v1934_v7 = vrot.slane %v4340_v16, 5 }
 0x535   : > { %v1933_v61 = vrot.slane %v4343_v57, 5  ;;  %1938 = vst [vmem:[#allocation2 + $0x48] sm:$0x38] %v1932_v12 }
 0x536   : > { %1940 = vst [vmem:[#allocation2 + $0x58] sm:$0x38] %v1934_v7 }
 0x537   : > { %1939 = vst [vmem:[#allocation2 + $0x50] sm:$0x38] %v1933_v61 }
 0x538   : > { %1907 = vrot.lane.b32.xlu1 %v4340_v16, %s3423_s22  ;;  %1874 = vrot.lane.b32.xlu0 %v4340_v16, %s3421_s20 }
 0x53c   : > { %1957 = vrot.lane.b32.xlu1 %v4340_v16, %s3424_s23  ;;  %1814 = vrot.lane.b32.xlu0 %v4337_v59, %s3425_s24 }
 0x540   : > { %1987 = vrot.lane.b32.xlu1 %v4340_v16, %s3426_s25  ;;  %1847 = vrot.lane.b32.xlu0 %v4337_v59, %s3422_s21 }
 0x544   : > { %2020 = vrot.lane.b32.xlu1 %v4340_v16, %s3427_s26  ;;  %1877 = vrot.lane.b32.xlu0 %v4337_v59, %s3421_s20 }
 0x548   : > { %1910 = vrot.lane.b32.xlu1 %v4337_v59, %s3423_s22  ;;  %1953 = vrot.lane.b32.xlu0 %v4337_v59, %s3424_s23 }
 0x54c   : > { %1816 = vrot.lane.b32.xlu1 %v4343_v57, %s3425_s24  ;;  %2016 = vrot.lane.b32.xlu0 %v4337_v59, %s3427_s26 }
 0x550   : > { %1849 = vrot.lane.b32.xlu1 %v4343_v57, %s3422_s21  ;;  %1912 = vrot.lane.b32.xlu0 %v4343_v57, %s3423_s22 }
 0x554   : > { %1879 = vrot.lane.b32.xlu1 %v4343_v57, %s3421_s20  ;;  %1955 = vrot.lane.b32.xlu0 %v4343_v57, %s3424_s23 }
 0x558   : > { %1983 = vrot.lane.b32.xlu1 %v4337_v59, %s3426_s25  ;;  %1985 = vrot.lane.b32.xlu0 %v4343_v57, %s3426_s25 }
 0x55c   : > { %2040 = vrot.lane.b32.xlu1 %v4337_v59, %s3429_s27  ;;  %2018 = vrot.lane.b32.xlu0 %v4343_v57, %s3427_s26 }
 0x560   : > { %2044 = vrot.lane.b32.xlu1 %v4340_v16, %s3429_s27  ;;  %2042 = vrot.lane.b32.xlu0 %v4343_v57, %s3429_s27 }
 0x564   : > { %2105 = vperm.xlu1 %3389, %v2097_v15   ;;  %2100 = vperm.xlu0 %3388, %v2096_v31  }
 0x5a6   : > { %v1845_v14 = vpop.permute.xlu1 %1844  ;;  %v1810_v29 = vpop.permute.xlu0 %1809 }
 0x5aa   : > { %v1908_v22 = vpop.permute.xlu1 %1907  ;;  %v1875_v62 = vpop.permute.xlu0 %1874 }
 0x5ae   : > { %v1958_v17 = vpop.permute.xlu1 %1957  ;;  %v1815_v21 = vpop.permute.xlu0 %1814 }
 0x5af   : > { %v1821_v23 = vsel %vm484_vm5, %v1810_v29, %v1815_v21 }
 0x5b0   : > { %v1823_v63 = vrot.slane %v1821_v23, 5 }
 0x5b2   : > { %1829 = vst [vmem:[#allocation2] sm:$0x38] %v1823_v63  ;;  %v1988_v37 = vpop.permute.xlu1 %1987  ;;  %v1848_v45 = vpop.permute.xlu0 %1847 }
 0x5b3   : > { %v1854_v32 = vsel %vm501_vm3, %v1845_v14, %v1848_v45 }
 0x5b4   : > { %v1856_v34 = vrot.slane %v1854_v32, 7 }
 0x5b6   : > { %1862 = vst [vmem:[#allocation2 + $0x18] sm:$0xe] %v1856_v34  ;;  %v4404_v46 = vpop.permute.xlu1 %2020  ;;  %v1878_v58 = vpop.permute.xlu0 %1877 }
 0x5b7   : > { %v1884_v51 = vsel %vm523_vm1, %v1875_v62, %v1878_v58 }
 0x5b8   : > { %v1886_v52 = vrot.slane %v1884_v51, 1 }
 0x5ba   : > { %1892 = vst [vmem:[#allocation2 + $0x30] ss:$-20 sps:$4 sm:$0x83] %v1886_v52   ;;  %v1911_v26 = vpop.permute.xlu1 %1910  ;;  %v1954_v19 = vpop.permute.xlu0 %1953 }
 0x5bb   : > { %v1917_v30 = vsel %vm548_vm2, %v1908_v22, %v1911_v26  ;;  %v1963_v13 = vsel %vm576_vm4, %v1958_v17, %v1954_v19 }
 0x5bc   : > { %v1919_v33 = vrot.slane %v1917_v30, 3  ;;  %v1967_v6 = vrot.slane %v1963_v13, 7  ;;  %v2061_v13 = vld [vmem:[#allocation2] sm:$0xff] }
 0x5be   : > { %1925 = vst [vmem:[#allocation2 + $0x30] sm:$0xe0] %v1919_v33  ;;  %1973 = vst [vmem:[#allocation2 + $0x70] sm:$0xe] %v1967_v6  ;;  %v1817_v42 = vpop.permute.xlu1 %1816  ;;  %v2017_v25 = vpop.permute.xlu0 %2016 }
 0x5bf   : > { %v1818_v38 = vsel %vm484_vm5, %v1815_v21, %v1817_v42  ;;  %v1819_v35 = vsel %vm484_vm5, %v1817_v42, %v1810_v29  ;;  %v2026_v0 = vsel %vm623_vm7, %v4404_v46, %v2017_v25 }
 0x5c0   : > { %v1824_v44 = vrot.slane %v1818_v38, 5  ;;  %v1825_v40 = vrot.slane %v1819_v35, 5  ;;  %v2030_v41 = vrot.slane %v2026_v0, 3 }
 0x5c1   : > { %v2064_v34 = vld [vmem:[#allocation2 + $0x18] sm:$0xff] }
 0x5c2   : > { %1830 = vst [vmem:[#allocation2 + $0x8] sm:$0x38] %v1824_v44  ;;  %1831 = vst [vmem:[#allocation2 + $0x10] sm:$0x38] %v1825_v40  ;;  %v1850_v56 = vpop.permute.xlu1 %1849  ;;  %v1913_v2 = vpop.permute.xlu0 %1912  ;;  %v2082_v42 = vpack.c.bf16 %v2064_v34, %v2061_v13 }
 0x5c3   : > { %2036 = vst [vmem:[#allocation2 + $0x88] sm:$0xe0] %v2030_v41  ;;  %v1851_v20 = vsel %vm501_vm3, %v1848_v45, %v1850_v56  ;;  %v1852_v27 = vsel %vm501_vm3, %v1850_v56, %v1845_v14  ;;  %v1914_v1 = vsel %vm548_vm2, %v1911_v26, %v1913_v2  ;;  %v1915_v49 = vsel %vm548_vm2, %v1913_v2, %v1908_v22  ;;  %v2072_v56 = vld [vmem:[#allocation2 + $0x58] sm:$0xff] }
 0x5c4   : > { %v1857_v50 = vrot.slane %v1851_v20, 7  ;;  %v1858_v24 = vrot.slane %v1852_v27, 7  ;;  %v1920_v4 = vrot.slane %v1914_v1, 3  ;;  %v1921_v48 = vrot.slane %v1915_v49, 3  ;;  %v2070_v20 = vld [vmem:[#allocation2 + $0x48] sm:$0xff] }
 0x5c5   : > { %v2067_v41 = vld [vmem:[#allocation2 + $0x30] sm:$0xff] }
 0x5c6   : > { %1863 = vst [vmem:[#allocation2 + $0x20] sm:$0xe] %v1857_v50  ;;  %1864 = vst [vmem:[#allocation2 + $0x28] sm:$0xe] %v1858_v24  ;;  %v1880_v60 = vpop.permute.xlu1 %1879  ;;  %v1956_v54 = vpop.permute.xlu0 %1955  ;;  %v2085_v27 = vpack.c.bf16 %v2070_v20, %v2067_v41 }
 0x5c7   : > { %1926 = vst [vmem:[#allocation2 + $0x38] sm:$0xe0] %v1920_v4  ;;  %1927 = vst [vmem:[#allocation2 + $0x40] sm:$0xe0] %v1921_v48  ;;  %v1881_v28 = vsel %vm523_vm1, %v1878_v58, %v1880_v60  ;;  %v1882_v5 = vsel %vm523_vm1, %v1880_v60, %v1875_v62  ;;  %v1959_v11 = vsel %vm576_vm4, %v1954_v19, %v1956_v54 }
 0x5c8   : > { %v1960_v39 = vsel %vm576_vm4, %v1956_v54, %v1958_v17  ;;  %v1887_v53 = vrot.slane %v1881_v28, 1  ;;  %v1888_v10 = vrot.slane %v1882_v5, 1  ;;  %v1965_v43 = vrot.slane %v1959_v11, 7 }
 0x5c9   : > { %v1966_v3 = vrot.slane %v1960_v39, 7  ;;  %v2062_v45 = vld [vmem:[#allocation2 + $0x8] sm:$0xff]  ;;  %v2063_v32 = vld [vmem:[#allocation2 + $0x10] sm:$0xff] }
 0x5ca   : > { %1893 = vst [vmem:[#allocation2 + $0x38] ss:$-20 sps:$4 sm:$0x83] %v1887_v53   ;;  %1894 = vst [vmem:[#allocation2 + $0x40] ss:$-20 sps:$4 sm:$0x83] %v1888_v10   ;;  %v1984_v9 = vpop.permute.xlu1 %1983  ;;  %v1986_v12 = vpop.permute.xlu0 %1985 }
 0x5cb   : > { %1971 = vst [vmem:[#allocation2 + $0x60] sm:$0xe] %v1965_v43  ;;  %1972 = vst [vmem:[#allocation2 + $0x68] sm:$0xe] %v1966_v3  ;;  %v1993_v7 = vsel %vm601_vm6, %v1988_v37, %v1984_v9  ;;  %v1989_v61 = vsel %vm601_vm6, %v1984_v9, %v1986_v12  ;;  %v1990_v15 = vsel %vm601_vm6, %v1986_v12, %v1988_v37  ;;  %v3397_v12 = vld [vmem:[%s5002_s8] sm:$0xff]  }
 0x5cc   : > { %v1997_v31 = vrot.slane %v1993_v7, 1  ;;  %v1995_v14 = vrot.slane %v1989_v61, 1  ;;  %v1996_v29 = vrot.slane %v1990_v15, 1 }
 0x5ce   : > { %2003 = vst [vmem:[#allocation2 + $0x88] ss:$-20 sps:$4 sm:$0x83] %v1997_v31   ;;  %2001 = vst [vmem:[#allocation2 + $0x78] ss:$-20 sps:$4 sm:$0x83] %v1995_v14   ;;  %v2041_v22 = vpop.permute.xlu1 %2040  ;;  %v2019_v62 = vpop.permute.xlu0 %2018 }
 0x5cf   : > { %2002 = vst [vmem:[#allocation2 + $0x80] ss:$-20 sps:$4 sm:$0x83] %v1996_v29   ;;  %v2022_v17 = vsel %vm623_vm7, %v2017_v25, %v2019_v62  ;;  %v2023_v21 = vsel %vm623_vm7, %v2019_v62, %v4404_v46  ;;  %v2071_v25 = vld [vmem:[#allocation2 + $0x50] sm:$0xff] }
 0x5d0   : > { %v2028_v23 = vrot.slane %v2022_v17, 3  ;;  %v2029_v63 = vrot.slane %v2023_v21, 3 }
 0x5d1   : > { %v2065_v58 = vld [vmem:[#allocation2 + $0x20] sm:$0xff]  ;;  %v2066_v37 = vld [vmem:[#allocation2 + $0x28] sm:$0xff]  ;;  %v2068_v51 = vld [vmem:[#allocation2 + $0x38] sm:$0xff] }
 0x5d2   : > { %2034 = vst [vmem:[#allocation2 + $0x78] sm:$0xe0] %v2028_v23  ;;  %2035 = vst [vmem:[#allocation2 + $0x80] sm:$0xe0] %v2029_v63  ;;  %v2045_v52 = vpop.permute.xlu1 %2044  ;;  %v2043_v26 = vpop.permute.xlu0 %2042  ;;  %v2083_v19 = vpack.c.bf16 %v2065_v58, %v2062_v45  ;;  %v2084_v30 = vpack.c.bf16 %v2066_v37, %v2063_v32  ;;  %v2069_v38 = vld [vmem:[#allocation2 + $0x40] sm:$0xff]  ;;  %v2086_v40 = vpack.c.bf16 %v2071_v25, %v2068_v51 }
 0x5d3   : > { %v2050_v33 = vsel %vm645_vm8, %v2045_v52, %v2041_v22  ;;  %v2046_v6 = vsel %vm645_vm8, %v2041_v22, %v2043_v26  ;;  %v2047_v46 = vsel %vm645_vm8, %v2043_v26, %v2045_v52  ;;  %v2087_v2 = vpack.c.bf16 %v2072_v56, %v2069_v38  ;;  %v3398_v25 = vld [vmem:[%s5004_s10 + $0x4] ss:$8 sps:$4 sm:$0xff]  }
 0x5d4   : > { %v2054_v35 = vrot.slane %v2050_v33, 5  ;;  %v2052_v0 = vrot.slane %v2046_v6, 5  ;;  %v2053_v44 = vrot.slane %v2047_v46, 5  ;;  %2126 = vmatprep.subr.bf16.mxu0 %v2083_v19  ;;  %3354 = vmatpush3.bf16.msra.mxu1 %v2084_v30  ;;  %v2574_v38 = vld [vmem:[%s5005_s11 + $0x8] sm:$0xff] }
 0x5d5   : > { %2127 = vmatpush1.bf16.msra.mxu0 %v2082_v42  ;;  %3355 = vmatprep.subr.bf16.mxu1 %v5068_v18  ;;  %v2075_v1 = vld [vmem:[#allocation2 + $0x70] sm:$0xff]  ;;  %v2078_v49 = vld [vmem:[#allocation2 + $0x88] sm:$0xff]  ;;  %v2073_v4 = vld [vmem:[#allocation2 + $0x60] sm:$0xff] }
 0x5d6   : > { %2060 = vst [vmem:[#allocation2 + $0xa0] sm:$0x38] %v2054_v35  ;;  %2058 = vst [vmem:[#allocation2 + $0x90] sm:$0x38] %v2052_v0  ;;  %2128 = vmatprep.subr.bf16.mxu0 %v2086_v40  ;;  %v2074_v50 = vld [vmem:[#allocation2 + $0x68] sm:$0xff]  ;;  %v2090_v54 = vpack.c.bf16 %v2078_v49, %v2075_v1  ;;  %v2573_v35 = vld [vmem:[%s5005_s11] sm:$0xff] }
 0x5d7   : > { %2059 = vst [vmem:[#allocation2 + $0x98] sm:$0x38] %v2053_v44 }
 0x5d8   : > { %3356 = vmatpush3.bf16.msra.mxu1 %v2087_v2 }
 0x5d9   : > { %2129 = vmatpush1.bf16.msra.mxu0 %v2085_v27  ;;  %3357 = vmatprep.subr.bf16.mxu1 %v5068_v18  ;;  %v2077_v24 = vld [vmem:[#allocation2 + $0x80] sm:$0xff]  ;;  %v2076_v48 = vld [vmem:[#allocation2 + $0x78] sm:$0xff] }
 0x5da   : > { %v2089_v60 = vpack.c.bf16 %v2077_v24, %v2074_v50  ;;  %v2088_v28 = vpack.c.bf16 %v2076_v48, %v2073_v4 }
 0x5dc   : > { %2130 = vmatprep.subr.bf16.mxu0 %v2089_v60  ;;  %3358 = vmatpush3.bf16.msra.mxu1 %v2090_v54 }
 0x5dd   : > { %2131 = vmatpush1.bf16.msra.mxu0 %v2088_v28  ;;  %3359 = vmatprep.subr.bf16.mxu1 %v5068_v18  ;;  %v2079_v11 = vld [vmem:[#allocation2 + $0x90] sm:$0x3f]  ;;  %v2081_v39 = vld [vmem:[#allocation2 + $0xa0] sm:$0x3f] }
 0x5de   : > { %v2080_v5 = vld [vmem:[#allocation2 + $0x98] sm:$0x3f]  ;;  %v2091_v10 = vpack.c.bf16 %v2079_v11, %v2079_v11  ;;  %v2093_v43 = vpack.c.bf16 %v2081_v39, %v2081_v39 }
 0x5df   : > { %v2092_v53 = vpack.c.bf16 %v2080_v5, %v2080_v5 }
 0x5e0   : > { %v2118_v3 = vsel %vm1744_vm13, %v2091_v10, 0  ;;  %v2124_v9 = vsel %vm1744_vm13, %v2093_v43, 0 }
 0x5e1   : > { %3323 = vmatprep.subr.msk.bf16.mxu0 %vm1744_vm13, %v2092_v53  ;;  %3360 = vmatpush3.bf16.msra.mxu1 %v2124_v9 }
 0x5e2   : > { %2133 = vmatpush1.bf16.msra.mxu0 %v2118_v3  ;;  %2640 = vmatprep.subr.bf16.mxu1 %v5051_v55 }
 0x5e3   : > { %v2101_v18 = vpop.permute.xlu0 %2100  ;;  %v2106_v45 = vpop.permute.xlu1 %2105 }
 0x5e4   : > { %3362 = vmatmul.mubr.msk.bf16.vlgmr.msra.gmra.mrb[12].mxu1 %vm2113_vm14, %v3397_v12 }
 0x5e5   : > { %3324 = vmatmul.mubr.msk.bf16.vlgmr.msra.gmra.mrb[12].mxu0 %vm2113_vm14, %v3397_v12  ;;  %3329 = vmatprep.mubr.msk.bf16.mxu1 %vm1194_vm12, %v3398_v25 }
 0x5e6   : > { %3328 = vmatprep.mubr.msk.bf16.mxu0 %vm1194_vm12, %v3398_v25 }
 0x6b7   : > { %v2203_v61 = vpop.f32.mrb[12].mxu1 }
 0x6b8   : > { %v2160_v7 = vpop.f32.mrb[12].mxu0  ;;  %v2204_v15 = vadd.f32 %v2203_v61, %v2101_v18  ;;  %v3363_v14 = vpop.f32.mrb[13].mxu1 }
 0x6b9   : > { %v2162_v31 = vpop.f32.mrb[13].mxu0  ;;  %v2206_v22 = vpop.f32.mrb[14].mxu1  ;;  %v2161_v58 = vadd.f32 %v2160_v7, %v2101_v18 }
 0x6ba   : > { %v2164_v29 = vpop.f32.mrb[14].mxu0  ;;  %v2212_v62 = vmax.f32 %v2204_v15, 0.0  ;;  %v3364_v21 = vpop.f32.mrb[15].mxu1  ;;  %v2163_v63 = vadd.f32 %v2162_v31, %v2101_v18  ;;  %v2207_v34 = vadd.f32 %v2206_v22, %v2106_v45 }
 0x6bb   : > { %v2166_v17 = vpop.f32.mrb[15].mxu0  ;;  %v2210_v52 = vmax.f32 %v2161_v58, 0.0  ;;  %v2165_v30 = vadd.f32 %v2164_v29, %v2106_v45 }
 0x6bc   : > { %v4441_v23 = vmul.f32 %v2212_v62, %v3707_v8  ;;  %v2211_v32 = vmax.f32 %v2163_v63, 0.0  ;;  %v2215_v51 = vmax.f32 %v2207_v34, 0.0  ;;  %v2167_v6 = vadd.f32 %v2166_v17, %v2106_v45 }
 0x6bd   : > { %v4466_v19 = vmul.f32 %v2210_v52, %v3733_v47  ;;  %v2213_v13 = vmax.f32 %v2165_v30, 0.0 }
 0x6be   : > { %2366 = vrot.lane.b32.xlu1 %v4441_v23, %s3424_s23  ;;  %2224 = vrot.lane.b32.xlu0 %v4441_v23, %s3425_s24  ;;  %v4452_v37 = vmul.f32 %v2211_v32, %v3717_v36  ;;  %v4459_v26 = vmul.f32 %v2215_v51, %v3707_v8  ;;  %v2214_v46 = vmax.f32 %v2167_v6, 0.0 }
 0x6bf   : > { %v4501_v33 = vmul.f32 %v2213_v13, %v3733_v47 }
 0x6c0   : > { %v4512_v42 = vmul.f32 %v2214_v46, %v3717_v36 }
 0x6c2   : > { %2398 = vrot.lane.b32.xlu1 %v4441_v23, %s3426_s25  ;;  %2260 = vrot.lane.b32.xlu0 %v4441_v23, %s3422_s21 }
 0x6c6   : > { %2292 = vrot.lane.b32.xlu0 %v4441_v23, %s3421_s20  ;;  %2236 = vrot.lane.b32.xlu1 %v4452_v37, %s3425_s24 }
 0x6ca   : > { %2324 = vrot.lane.b32.xlu0 %v4441_v23, %s3423_s22  ;;  %2226 = vrot.lane.b32.xlu1 %v4459_v26, %s3425_s24 }
 0x6ce   : > { %2268 = vrot.lane.b32.xlu1 %v4452_v37, %s3422_s21  ;;  %2234 = vrot.lane.b32.xlu0 %v4466_v19, %s3425_s24 }
 0x6d2   : > { %2262 = vrot.lane.b32.xlu1 %v4459_v26, %s3422_s21  ;;  %2266 = vrot.lane.b32.xlu0 %v4466_v19, %s3422_s21 }
 0x6d6   : > { %2300 = vrot.lane.b32.xlu1 %v4452_v37, %s3421_s20  ;;  %2298 = vrot.lane.b32.xlu0 %v4466_v19, %s3421_s20 }
 0x6da   : > { %2294 = vrot.lane.b32.xlu1 %v4459_v26, %s3421_s20  ;;  %2330 = vrot.lane.b32.xlu0 %v4466_v19, %s3423_s22 }
 0x6de   : > { %2332 = vrot.lane.b32.xlu1 %v4452_v37, %s3423_s22  ;;  %2362 = vrot.lane.b32.xlu0 %v4466_v19, %s3424_s23 }
 0x6e2   : > { %2326 = vrot.lane.b32.xlu1 %v4459_v26, %s3423_s22  ;;  %2394 = vrot.lane.b32.xlu0 %v4466_v19, %s3426_s25 }
 0x6e6   : > { %2372 = vrot.lane.b32.xlu1 %v4459_v26, %s3424_s23  ;;  %2364 = vrot.lane.b32.xlu0 %v4452_v37, %s3424_s23 }
 0x6ea   : > { %2404 = vrot.lane.b32.xlu1 %v4459_v26, %s3426_s25  ;;  %2396 = vrot.lane.b32.xlu0 %v4452_v37, %s3426_s25 }
 0x6ee   : > { %2368 = vrot.lane.b32.xlu1 %v4501_v33, %s3424_s23  ;;  %2428 = vrot.lane.b32.xlu0 %v4452_v37, %s3427_s26 }
 0x6f2   : > { %2400 = vrot.lane.b32.xlu1 %v4501_v33, %s3426_s25  ;;  %2238 = vrot.lane.b32.xlu0 %v4501_v33, %s3425_s24 }
 0x6f6   : > { %2240 = vrot.lane.b32.xlu1 %v4512_v42, %s3425_s24  ;;  %2270 = vrot.lane.b32.xlu0 %v4501_v33, %s3422_s21 }
 0x6fa   : > { %2272 = vrot.lane.b32.xlu1 %v4512_v42, %s3422_s21  ;;  %2302 = vrot.lane.b32.xlu0 %v4501_v33, %s3421_s20 }
 0x6fe   : > { %2304 = vrot.lane.b32.xlu1 %v4512_v42, %s3421_s20  ;;  %2334 = vrot.lane.b32.xlu0 %v4501_v33, %s3423_s22 }
 0x702   : > { %2336 = vrot.lane.b32.xlu1 %v4512_v42, %s3423_s22  ;;  %2426 = vrot.lane.b32.xlu0 %v4466_v19, %s3427_s26 }
 0x706   : > { %2430 = vrot.lane.b32.xlu1 %v4441_v23, %s3427_s26  ;;  %2460 = vrot.lane.b32.xlu0 %v4452_v37, %s3429_s27 }
 0x70a   : > { %2436 = vrot.lane.b32.xlu1 %v4459_v26, %s3427_s26  ;;  %2370 = vrot.lane.b32.xlu0 %v4512_v42, %s3424_s23 }
 0x70e   : > { %2432 = vrot.lane.b32.xlu1 %v4501_v33, %s3427_s26  ;;  %2402 = vrot.lane.b32.xlu0 %v4512_v42, %s3426_s25 }
 0x712   : > { %2462 = vrot.lane.b32.xlu1 %v4441_v23, %s3429_s27  ;;  %2434 = vrot.lane.b32.xlu0 %v4512_v42, %s3427_s26 }
 0x716   : > { %2468 = vrot.lane.b32.xlu1 %v4459_v26, %s3429_s27  ;;  %2466 = vrot.lane.b32.xlu0 %v4512_v42, %s3429_s27 }
 0x71a   : > { %2464 = vrot.lane.b32.xlu1 %v4501_v33, %s3429_s27  ;;  %2458 = vrot.lane.b32.xlu0 %v4466_v19, %s3429_s27 }
 0x71e   : > { %2582 = vperm.xlu1 %3389, %v2574_v38   ;;  %2577 = vperm.xlu0 %3388, %v2573_v35  }
 0x730   : > { %v4565_v0 = vpop.permute.xlu1 %2366  ;;  %v2225_v44 = vpop.permute.xlu0 %2224 }
 0x734   : > { %v4567_v40 = vpop.permute.xlu1 %2398  ;;  %v2261_v41 = vpop.permute.xlu0 %2260 }
 0x738   : > { %v2293_v56 = vpop.permute.xlu0 %2292  ;;  %v2237_v2 = vpop.permute.xlu1 %2236 }
 0x739   : > { %v2243_v14 = vsel %vm484_vm5, %v2237_v2, %v2225_v44 }
 0x73c   : > { %v4569_v20 = vpop.permute.xlu0 %2324  ;;  %v2227_v27 = vpop.permute.xlu1 %2226 }
 0x740   : > { %v2269_v1 = vpop.permute.xlu1 %2268  ;;  %v2235_v49 = vpop.permute.xlu0 %2234 }
 0x741   : > { %v2242_v29 = vsel %vm484_vm5, %v2235_v49, %v2237_v2  ;;  %v2252_v17 = vsel %vm484_vm5, %v2225_v44, %v2235_v49  ;;  %v2275_v32 = vsel %vm501_vm3, %v2269_v1, %v2261_v41 }
 0x744   : > { %v2263_v50 = vpop.permute.xlu1 %2262  ;;  %v2267_v24 = vpop.permute.xlu0 %2266 }
 0x745   : > { %v2274_v52 = vsel %vm501_vm3, %v2267_v24, %v2269_v1  ;;  %v2284_v6 = vsel %vm501_vm3, %v2261_v41, %v2267_v24 }
 0x748   : > { %v2301_v4 = vpop.permute.xlu1 %2300  ;;  %v2299_v48 = vpop.permute.xlu0 %2298 }
 0x749   : > { %v2307_v35 = vsel %vm523_vm1, %v2301_v4, %v2293_v56  ;;  %v2306_v1 = vsel %vm523_vm1, %v2299_v48, %v2301_v4  ;;  %v2316_v41 = vsel %vm523_vm1, %v2293_v56, %v2299_v48 }
 0x74c   : > { %v2295_v60 = vpop.permute.xlu1 %2294  ;;  %v4571_v54 = vpop.permute.xlu0 %2330 }
 0x74d   : > { %v2348_v56 = vsel %vm548_vm2, %v4569_v20, %v4571_v54 }
 0x750   : > { %v2333_v28 = vpop.permute.xlu1 %2332  ;;  %v4573_v5 = vpop.permute.xlu0 %2362 }
 0x751   : > { %v2339_v4 = vsel %vm548_vm2, %v2333_v28, %v4569_v20 }
 0x754   : > { %v2327_v11 = vpop.permute.xlu1 %2326  ;;  %v4575_v39 = vpop.permute.xlu0 %2394 }
 0x758   : > { %v4577_v53 = vpop.permute.xlu1 %2372  ;;  %v4579_v10 = vpop.permute.xlu0 %2364 }
 0x75c   : > { %v4581_v43 = vpop.permute.xlu1 %2404  ;;  %v4583_v3 = vpop.permute.xlu0 %2396 }
 0x760   : > { %v4585_v9 = vpop.permute.xlu1 %2368  ;;  %v4587_v12 = vpop.permute.xlu0 %2428 }
 0x761   : > { %v2387_v20 = vsel %vm576_vm4, %v4577_v53, %v4585_v9 }
 0x764   : > { %v4589_v18 = vpop.permute.xlu1 %2400  ;;  %v2239_v7 = vpop.permute.xlu0 %2238 }
 0x765   : > { %v2253_v61 = vsel %vm484_vm5, %v2227_v27, %v2239_v7 }
 0x766   : > { %v2544_v45 = vpack.c.bf16 %v2253_v61, %v2252_v17 }
 0x768   : > { %v2241_v15 = vpop.permute.xlu1 %2240  ;;  %v2271_v31 = vpop.permute.xlu0 %2270 }
 0x769   : > { %v2244_v22 = vsel %vm484_vm5, %v2239_v7, %v2241_v15  ;;  %v2245_v62 = vsel %vm484_vm5, %v2241_v15, %v2227_v27  ;;  %v2285_v34 = vsel %vm501_vm3, %v2263_v50, %v2271_v31  ;;  %v2338_v15 = vsel %vm548_vm2, %v4571_v54, %v2333_v28 }
 0x76a   : > { %v2546_v21 = vpack.c.bf16 %v2245_v62, %v2243_v14  ;;  %v2545_v63 = vpack.c.bf16 %v2244_v22, %v2242_v29  ;;  %v2547_v38 = vpack.c.bf16 %v2285_v34, %v2284_v6  ;;  %v2557_v28 = vpack.c.bf16 %v4512_v42, %v4452_v37 }
 0x76b   : > { %v2556_v54 = vpack.c.bf16 %v4501_v33, %v4466_v19  ;;  %v2374_v37 = vsel %vm576_vm4, %v4573_v5, %v4579_v10 }
 0x76c   : > { %v2273_v58 = vpop.permute.xlu1 %2272  ;;  %v2303_v51 = vpop.permute.xlu0 %2302  ;;  %2641 = vmatpush1.bf16.msra.mxu1 %v2546_v21  ;;  %2597 = vmatprep.subr.bf16.mxu0 %v2545_v63 }
 0x76d   : > { %v2276_v30 = vsel %vm501_vm3, %v2271_v31, %v2273_v58  ;;  %v2277_v13 = vsel %vm501_vm3, %v2273_v58, %v2263_v50  ;;  %2598 = vmatpush1.bf16.msra.mxu0 %v2544_v45  ;;  %2642 = vmatprep.subr.bf16.mxu1 %v5051_v55  ;;  %v2317_v44 = vsel %vm523_vm1, %v2295_v60, %v2303_v51 }
 0x76e   : > { %v2549_v46 = vpack.c.bf16 %v2277_v13, %v2275_v32  ;;  %v2548_v25 = vpack.c.bf16 %v2276_v30, %v2274_v52  ;;  %v2550_v61 = vpack.c.bf16 %v2317_v44, %v2316_v41  ;;  %v2386_v45 = vsel %vm576_vm4, %v4565_v0, %v4573_v5 }
 0x76f   : > { %v2561_v33 = vpack.c.bf16 %v2387_v20, %v2386_v45  ;;  %v2419_v5 = vsel %vm601_vm6, %v4581_v43, %v4589_v18 }
 0x770   : > { %v2305_v2 = vpop.permute.xlu1 %2304  ;;  %v2335_v27 = vpop.permute.xlu0 %2334  ;;  %2643 = vmatpush1.bf16.msra.mxu1 %v2549_v46  ;;  %2599 = vmatprep.subr.bf16.mxu0 %v2548_v25 }
 0x771   : > { %v2308_v49 = vsel %vm523_vm1, %v2303_v51, %v2305_v2  ;;  %v2309_v50 = vsel %vm523_vm1, %v2305_v2, %v2295_v60  ;;  %2600 = vmatpush1.bf16.msra.mxu0 %v2547_v38  ;;  %2644 = vmatprep.subr.bf16.mxu1 %v5051_v55  ;;  %v2349_v31 = vsel %vm548_vm2, %v2327_v11, %v2335_v27 }
 0x772   : > { %v2552_v24 = vpack.c.bf16 %v2309_v50, %v2307_v35  ;;  %v2551_v7 = vpack.c.bf16 %v2308_v49, %v2306_v1  ;;  %v2553_v17 = vpack.c.bf16 %v2349_v31, %v2348_v56  ;;  %v2407_v51 = vsel %vm601_vm6, %v4583_v3, %v4567_v40 }
 0x774   : > { %v2337_v14 = vpop.permute.xlu1 %2336  ;;  %v2427_v29 = vpop.permute.xlu0 %2426  ;;  %2645 = vmatpush1.bf16.msra.mxu1 %v2552_v24  ;;  %2601 = vmatprep.subr.bf16.mxu0 %v2551_v7 }
 0x775   : > { %v2340_v60 = vsel %vm548_vm2, %v2335_v27, %v2337_v14  ;;  %v2341_v22 = vsel %vm548_vm2, %v2337_v14, %v2327_v11  ;;  %2602 = vmatpush1.bf16.msra.mxu0 %v2550_v61  ;;  %2646 = vmatprep.subr.bf16.mxu1 %v5051_v55  ;;  %v2558_v11 = vpack.c.bf16 %v4459_v26, %v4441_v23 }
 0x776   : > { %v2555_v48 = vpack.c.bf16 %v2341_v22, %v2339_v4  ;;  %v2554_v62 = vpack.c.bf16 %v2340_v60, %v2338_v15  ;;  %v2375_v23 = vsel %vm576_vm4, %v4579_v10, %v4565_v0  ;;  %v2418_v0 = vsel %vm601_vm6, %v4567_v40, %v4575_v39  ;;  %v3400_v60 = vld [vmem:[%s5004_s10] ss:$8 sps:$4 sm:$0xff]  }
 0x777   : > { %v2406_v10 = vsel %vm601_vm6, %v4575_v39, %v4583_v3  ;;  %v2564_v13 = vpack.c.bf16 %v2419_v5, %v2418_v0  ;;  %v2438_v25 = vsel %vm623_vm7, %v2427_v29, %v4587_v12 }
 0x778   : > { %v2431_v21 = vpop.permute.xlu1 %2430  ;;  %v4622_v63 = vpop.permute.xlu0 %2460  ;;  %2647 = vmatpush1.bf16.msra.mxu1 %v2555_v48  ;;  %2603 = vmatprep.subr.bf16.mxu0 %v2554_v62 }
 0x779   : > { %2604 = vmatpush1.bf16.msra.mxu0 %v2553_v17  ;;  %2648 = vmatprep.subr.bf16.mxu1 %v5051_v55  ;;  %v2439_v40 = vsel %vm623_vm7, %v4587_v12, %v2431_v21 }
 0x77a   : > { %2605 = vmatprep.subr.bf16.mxu0 %v2557_v28 }
 0x77c   : > { %v2437_v42 = vpop.permute.xlu1 %2436  ;;  %v2371_v32 = vpop.permute.xlu0 %2370  ;;  %2649 = vmatpush1.bf16.msra.mxu1 %v2558_v11 }
 0x77d   : > { %v2376_v26 = vsel %vm576_vm4, %v4585_v9, %v2371_v32  ;;  %v2377_v19 = vsel %vm576_vm4, %v2371_v32, %v4577_v53  ;;  %2606 = vmatpush1.bf16.msra.mxu0 %v2556_v54  ;;  %2650 = vmatprep.subr.bf16.mxu1 %v5051_v55 }
 0x77e   : > { %v2560_v34 = vpack.c.bf16 %v2377_v19, %v2375_v23  ;;  %v2559_v58 = vpack.c.bf16 %v2376_v26, %v2374_v37 }
 0x780   : > { %v2433_v9 = vpop.permute.xlu1 %2432  ;;  %v2403_v53 = vpop.permute.xlu0 %2402  ;;  %2651 = vmatpush1.bf16.msra.mxu1 %v2561_v33  ;;  %2607 = vmatprep.subr.bf16.mxu0 %v2560_v34 }
 0x781   : > { %v2408_v52 = vsel %vm601_vm6, %v4589_v18, %v2403_v53  ;;  %v2409_v30 = vsel %vm601_vm6, %v2403_v53, %v4581_v43  ;;  %2608 = vmatpush1.bf16.msra.mxu0 %v2559_v58  ;;  %2652 = vmatprep.subr.bf16.mxu1 %v5051_v55  ;;  %v2451_v46 = vsel %vm623_vm7, %v2437_v42, %v2433_v9 }
 0x782   : > { %v2563_v6 = vpack.c.bf16 %v2409_v30, %v2407_v51  ;;  %v2562_v39 = vpack.c.bf16 %v2408_v52, %v2406_v10  ;;  %v2450_v43 = vsel %vm623_vm7, %v2431_v21, %v2427_v29  ;;  %v4792_v30 = vld.sshfl [vmem:[%s5006_s12] sm:$0x11 pattern:$0x75316420] }
 0x783   : > { %v2567_v2 = vpack.c.bf16 %v2451_v46, %v2450_v43 }
 0x784   : > { %v2463_v3 = vpop.permute.xlu1 %2462  ;;  %v2435_v38 = vpop.permute.xlu0 %2434  ;;  %2653 = vmatpush1.bf16.msra.mxu1 %v2564_v13  ;;  %2609 = vmatprep.subr.bf16.mxu0 %v2563_v6  ;;  %v3061_v13 = vcombine.high %v4792_v30, %v4792_v30  ;;  %v5069_v6 = vld [vmem:[#allocation20_spill] sm:$0xff] }
 0x785   : > { %v2440_v18 = vsel %vm623_vm7, %v2433_v9, %v2435_v38  ;;  %v2441_v35 = vsel %vm623_vm7, %v2435_v38, %v2437_v42  ;;  %2610 = vmatpush1.bf16.msra.mxu0 %v2562_v39  ;;  %2654 = vmatprep.subr.bf16.mxu1 %v5051_v55  ;;  %v2471_v12 = vsel %vm645_vm8, %v4622_v63, %v2463_v3 }
 0x786   : > { %v2566_v44 = vpack.c.bf16 %v2441_v35, %v2439_v40  ;;  %v2565_v27 = vpack.c.bf16 %v2440_v18, %v2438_v25  ;;  %v3043_v25 = vld [vmem:[#allocation3] sm:$0x1] }
 0x788   : > { %v2469_v1 = vpop.permute.xlu1 %2468  ;;  %v2467_v49 = vpop.permute.xlu0 %2466  ;;  %2611 = vmatprep.subr.bf16.mxu0 %v2566_v44  ;;  %2655 = vmatpush1.bf16.msra.mxu1 %v2567_v2 }
 0x789   : > { %v2473_v50 = vsel %vm645_vm8, %v2467_v49, %v2469_v1  ;;  %2612 = vmatpush1.bf16.msra.mxu0 %v2565_v27  ;;  %2656 = vmatprep.subr.bf16.mxu1 %v5051_v55 }
 0x78a   : > { %v2569_v41 = vpack.c.bf16 %v2473_v50, %v2471_v12 }
 0x78c   : > { %v2465_v24 = vpop.permute.xlu1 %2464  ;;  %v2459_v7 = vpop.permute.xlu0 %2458  ;;  %2613 = vmatprep.subr.bf16.mxu0 %v2569_v41 }
 0x78d   : > { %v2472_v61 = vsel %vm645_vm8, %v2465_v24, %v2467_v49  ;;  %v2483_v15 = vsel %vm645_vm8, %v2469_v1, %v2465_v24  ;;  %v2470_v31 = vsel %vm645_vm8, %v2459_v7, %v4622_v63  ;;  %v2482_v14 = vsel %vm645_vm8, %v2463_v3, %v2459_v7 }
 0x78e   : > { %v2568_v29 = vpack.c.bf16 %v2472_v61, %v2470_v31  ;;  %v2570_v4 = vpack.c.bf16 %v2483_v15, %v2482_v14 }
 0x790   : > { %2614 = vmatpush1.bf16.msra.mxu0 %v2568_v29  ;;  %2657 = vmatpush1.bf16.msra.mxu1 %v2570_v4 }
 0x791   : > { %3121 = vmatprep.subr.bf16.mxu1 %v5051_v55 }
 0x793   : > { %2630 = vmatmul.mubr.bf16.vlgmr.msra.gmra.mrb[16].mxu0 %v3400_v60  ;;  %2673 = vmatmul.mubr.bf16.vlgmr.msra.gmra.mrb[16].mxu1 %v3400_v60 }
 0x79d   : > { %v2583_v22 = vpop.permute.xlu1 %2582  ;;  %v2578_v56 = vpop.permute.xlu0 %2577 }
 0x866   : > { %v2631_v48 = vpop.f32.mrb[16].mxu0  ;;  %v2674_v62 = vpop.f32.mrb[16].mxu1 }
 0x867   : > { %v2632_v17 = vadd.f32 %v2631_v48, %v2578_v56  ;;  %v2675_v21 = vadd.f32 %v2674_v62, %v2578_v56  ;;  %v2633_v63 = vpop.f32.mrb[17].mxu0  ;;  %v2676_v28 = vpop.f32.mrb[17].mxu1 }
 0x868   : > { %v2634_v11 = vadd.f32 %v2633_v63, %v2578_v56  ;;  %v2635_v20 = vpop.f32.mrb[18].mxu0  ;;  %v2677_v54 = vpop.f32.mrb[18].mxu1 }
 0x869   : > { %v2681_v45 = vmax.f32 %v2632_v17, 0.0  ;;  %v2683_v37 = vmax.f32 %v2675_v21, 0.0  ;;  %v2636_v42 = vadd.f32 %v2635_v20, %v2583_v22  ;;  %v2678_v32 = vadd.f32 %v2677_v54, %v2583_v22  ;;  %v2637_v23 = vpop.f32.mrb[19].mxu0  ;;  %v2679_v26 = vpop.f32.mrb[19].mxu1 }
 0x86a   : > { %v2682_v19 = vmax.f32 %v2634_v11, 0.0  ;;  %v2638_v33 = vadd.f32 %v2637_v23, %v2583_v22 }
 0x86b   : > { %v4688_v34 = vmul.f32 %v2681_v45, %v3733_v47  ;;  %v4691_v58 = vmul.f32 %v2683_v37, %v3707_v8  ;;  %v2684_v5 = vmax.f32 %v2636_v42, 0.0  ;;  %v2686_v0 = vmax.f32 %v2678_v32, 0.0 }
 0x86c   : > { %v4694_v10 = vmul.f32 %v2682_v19, %v3717_v36  ;;  %v2685_v9 = vmax.f32 %v2638_v33, 0.0 }
 0x86d   : > { %v4697_v53 = vmul.f32 %v2684_v5, %v3733_v47  ;;  %v4700_v51 = vmul.f32 %v2686_v0, %v3707_v8  ;;  %2837 = vrot.lane.b32.xlu1 %v4691_v58, %s3424_s23  ;;  %2695 = vrot.lane.b32.xlu0 %v4691_v58, %s3425_s24  ;;  %v3433_v8 = vmov 1966171168  }
 0x86e   : > { %v4707_v52 = vmul.f32 %v2685_v9, %v3717_v36  ;;  %v3063_v36 = vunpack.c.l.s4 %v3433_v8 }
 0x870   : > { %v3064_v47 = vunpack.c.0.s8 %v3063_v36 }
 0x871   : > { %2869 = vrot.lane.b32.xlu1 %v4691_v58, %s3426_s25  ;;  %2731 = vrot.lane.b32.xlu0 %v4691_v58, %s3422_s21 }
 0x872   : > { %v4797_v39 = vsub.s32 %v3064_v47, %v5069_v6 }
 0x874   : > { %v3075_v46 = vrot.slane %v3061_v13, %v4797_v39 }
 0x875   : > { %2763 = vrot.lane.b32.xlu0 %v4691_v58, %s3421_s20  ;;  %2707 = vrot.lane.b32.xlu1 %v4694_v10, %s3425_s24 }
 0x876   : > { %3331 = vmatprep.mubr.msk.bf16.mxu0 %vm1194_vm12, %v3075_v46  ;;  %3332 = vmatprep.mubr.msk.bf16.mxu1 %vm1194_vm12, %v3075_v46 }
 0x879   : > { %2795 = vrot.lane.b32.xlu0 %v4691_v58, %s3423_s22  ;;  %2697 = vrot.lane.b32.xlu1 %v4700_v51, %s3425_s24 }
 0x87d   : > { %2739 = vrot.lane.b32.xlu1 %v4694_v10, %s3422_s21  ;;  %2705 = vrot.lane.b32.xlu0 %v4688_v34, %s3425_s24 }
 0x881   : > { %2733 = vrot.lane.b32.xlu1 %v4700_v51, %s3422_s21  ;;  %2737 = vrot.lane.b32.xlu0 %v4688_v34, %s3422_s21 }
 0x885   : > { %2771 = vrot.lane.b32.xlu1 %v4694_v10, %s3421_s20  ;;  %2769 = vrot.lane.b32.xlu0 %v4688_v34, %s3421_s20 }
 0x889   : > { %2765 = vrot.lane.b32.xlu1 %v4700_v51, %s3421_s20  ;;  %2801 = vrot.lane.b32.xlu0 %v4688_v34, %s3423_s22 }
 0x88d   : > { %2803 = vrot.lane.b32.xlu1 %v4694_v10, %s3423_s22  ;;  %2833 = vrot.lane.b32.xlu0 %v4688_v34, %s3424_s23 }
 0x891   : > { %2797 = vrot.lane.b32.xlu1 %v4700_v51, %s3423_s22  ;;  %2865 = vrot.lane.b32.xlu0 %v4688_v34, %s3426_s25 }
 0x895   : > { %2843 = vrot.lane.b32.xlu1 %v4700_v51, %s3424_s23  ;;  %2835 = vrot.lane.b32.xlu0 %v4694_v10, %s3424_s23 }
 0x899   : > { %2875 = vrot.lane.b32.xlu1 %v4700_v51, %s3426_s25  ;;  %2867 = vrot.lane.b32.xlu0 %v4694_v10, %s3426_s25 }
 0x89d   : > { %2839 = vrot.lane.b32.xlu1 %v4697_v53, %s3424_s23  ;;  %2899 = vrot.lane.b32.xlu0 %v4694_v10, %s3427_s26 }
 0x8a1   : > { %2871 = vrot.lane.b32.xlu1 %v4697_v53, %s3426_s25  ;;  %2709 = vrot.lane.b32.xlu0 %v4697_v53, %s3425_s24 }
 0x8a5   : > { %2711 = vrot.lane.b32.xlu1 %v4707_v52, %s3425_s24  ;;  %2741 = vrot.lane.b32.xlu0 %v4697_v53, %s3422_s21 }
 0x8a9   : > { %2743 = vrot.lane.b32.xlu1 %v4707_v52, %s3422_s21  ;;  %2773 = vrot.lane.b32.xlu0 %v4697_v53, %s3421_s20 }
 0x8ad   : > { %2775 = vrot.lane.b32.xlu1 %v4707_v52, %s3421_s20  ;;  %2805 = vrot.lane.b32.xlu0 %v4697_v53, %s3423_s22 }
 0x8b1   : > { %2807 = vrot.lane.b32.xlu1 %v4707_v52, %s3423_s22  ;;  %2897 = vrot.lane.b32.xlu0 %v4688_v34, %s3427_s26 }
 0x8b5   : > { %2901 = vrot.lane.b32.xlu1 %v4691_v58, %s3427_s26  ;;  %2931 = vrot.lane.b32.xlu0 %v4694_v10, %s3429_s27 }
 0x8b9   : > { %2907 = vrot.lane.b32.xlu1 %v4700_v51, %s3427_s26  ;;  %2841 = vrot.lane.b32.xlu0 %v4707_v52, %s3424_s23 }
 0x8bd   : > { %2903 = vrot.lane.b32.xlu1 %v4697_v53, %s3427_s26  ;;  %2873 = vrot.lane.b32.xlu0 %v4707_v52, %s3426_s25 }
 0x8c1   : > { %2933 = vrot.lane.b32.xlu1 %v4691_v58, %s3429_s27  ;;  %2905 = vrot.lane.b32.xlu0 %v4707_v52, %s3427_s26 }
 0x8c5   : > { %2939 = vrot.lane.b32.xlu1 %v4700_v51, %s3429_s27  ;;  %2937 = vrot.lane.b32.xlu0 %v4707_v52, %s3429_s27 }
 0x8c9   : > { %2935 = vrot.lane.b32.xlu1 %v4697_v53, %s3429_s27  ;;  %2929 = vrot.lane.b32.xlu0 %v4688_v34, %s3429_s27 }
 0x8cd   : > { %3046 = vperm.xlu0 %3388, %v3043_v25  }
 0x8df   : > { %v2838_v40 = vpop.permute.xlu1 %2837  ;;  %v2696_v3 = vpop.permute.xlu0 %2695 }
 0x8e3   : > { %v2870_v38 = vpop.permute.xlu1 %2869  ;;  %v2732_v43 = vpop.permute.xlu0 %2731 }
 0x8e7   : > { %v2764_v18 = vpop.permute.xlu0 %2763  ;;  %v2708_v35 = vpop.permute.xlu1 %2707 }
 0x8e8   : > { %v4815_v44 = vsel %vm484_vm5, %v2708_v35, %v2696_v3 }
 0x8e9   : > { %2727 = vst [vmem:[#allocation2 + $0x10] sm:$0xff] %v4815_v44 }
 0x8eb   : > { %v2796_v2 = vpop.permute.xlu0 %2795  ;;  %v2698_v27 = vpop.permute.xlu1 %2697 }
 0x8ef   : > { %v2740_v1 = vpop.permute.xlu1 %2739  ;;  %v2706_v49 = vpop.permute.xlu0 %2705 }
 0x8f0   : > { %v4819_v12 = vsel %vm501_vm3, %v2740_v1, %v2732_v43  ;;  %v4822_v50 = vsel %vm484_vm5, %v2706_v49, %v2708_v35  ;;  %v4825_v41 = vsel %vm484_vm5, %v2696_v3, %v2706_v49 }
 0x8f1   : > { %2759 = vst [vmem:[#allocation2 + $0x40] sm:$0xff] %v4819_v12  ;;  %2725 = vst [vmem:[#allocation2] sm:$0xff] %v4825_v41 }
 0x8f2   : > { %2726 = vst [vmem:[#allocation2 + $0x8] sm:$0xff] %v4822_v50 }
 0x8f3   : > { %v2734_v24 = vpop.permute.xlu1 %2733  ;;  %v2738_v7 = vpop.permute.xlu0 %2737 }
 0x8f4   : > { %v4831_v61 = vsel %vm501_vm3, %v2738_v7, %v2740_v1  ;;  %v4834_v15 = vsel %vm501_vm3, %v2732_v43, %v2738_v7 }
 0x8f5   : > { %2757 = vst [vmem:[#allocation2 + $0x30] sm:$0xff] %v4834_v15  ;;  %2758 = vst [vmem:[#allocation2 + $0x38] sm:$0xff] %v4831_v61 }
 0x8f7   : > { %v2772_v31 = vpop.permute.xlu1 %2771  ;;  %v2770_v14 = vpop.permute.xlu0 %2769 }
 0x8f8   : > { %v4839_v29 = vsel %vm523_vm1, %v2772_v31, %v2764_v18  ;;  %v4842_v4 = vsel %vm523_vm1, %v2770_v14, %v2772_v31  ;;  %v4845_v60 = vsel %vm523_vm1, %v2764_v18, %v2770_v14 }
 0x8f9   : > { %2791 = vst [vmem:[#allocation2 + $0x70] sm:$0xff] %v4839_v29  ;;  %2789 = vst [vmem:[#allocation2 + $0x60] sm:$0xff] %v4845_v60 }
 0x8fa   : > { %2790 = vst [vmem:[#allocation2 + $0x68] sm:$0xff] %v4842_v4 }
 0x8fb   : > { %v2766_v22 = vpop.permute.xlu1 %2765  ;;  %v2802_v56 = vpop.permute.xlu0 %2801 }
 0x8fc   : > { %v4851_v48 = vsel %vm548_vm2, %v2796_v2, %v2802_v56 }
 0x8fd   : > { %2821 = vst [vmem:[#allocation2 + $0x90] sm:$0xff] %v4851_v48 }
 0x8ff   : > { %v2804_v62 = vpop.permute.xlu1 %2803  ;;  %v2834_v17 = vpop.permute.xlu0 %2833 }
 0x900   : > { %v4855_v21 = vsel %vm548_vm2, %v2802_v56, %v2804_v62  ;;  %v4858_v63 = vsel %vm548_vm2, %v2804_v62, %v2796_v2  ;;  %v4861_v28 = vsel %vm576_vm4, %v2838_v40, %v2834_v17 }
 0x901   : > { %2822 = vst [vmem:[#allocation2 + $0x98] sm:$0xff] %v4855_v21  ;;  %2823 = vst [vmem:[#allocation2 + $0xa0] sm:$0xff] %v4858_v63 }
 0x903   : > { %v4865_v11 = vpop.permute.xlu1 %2797  ;;  %v2866_v20 = vpop.permute.xlu0 %2865 }
 0x904   : > { %v4868_v54 = vsel %vm601_vm6, %v2870_v38, %v2866_v20 }
 0x907   : > { %v4870_v45 = vpop.permute.xlu1 %2843  ;;  %v2836_v37 = vpop.permute.xlu0 %2835 }
 0x908   : > { %v4873_v42 = vsel %vm576_vm4, %v2834_v17, %v2836_v37  ;;  %v4876_v32 = vsel %vm576_vm4, %v2836_v37, %v2838_v40 }
 0x90b   : > { %v4878_v23 = vpop.permute.xlu1 %2875  ;;  %v2868_v26 = vpop.permute.xlu0 %2867 }
 0x90c   : > { %v4881_v19 = vsel %vm601_vm6, %v2866_v20, %v2868_v26  ;;  %v4884_v33 = vsel %vm601_vm6, %v2868_v26, %v2870_v38 }
 0x90f   : > { %v4886_v5 = vpop.permute.xlu1 %2839  ;;  %v4888_v0 = vpop.permute.xlu0 %2899 }
 0x910   : > { %v4893_v9 = vsel %vm576_vm4, %v4870_v45, %v4886_v5 }
 0x913   : > { %v4895_v8 = vpop.permute.xlu1 %2871  ;;  %v2710_v36 = vpop.permute.xlu0 %2709 }
 0x914   : > { %v4900_v47 = vsel %vm601_vm6, %v4878_v23, %v4895_v8  ;;  %v2724_v13 = vsel %vm484_vm5, %v2698_v27, %v2710_v36 }
 0x915   : > { %2728 = vst [vmem:[#allocation2 + $0x18] sm:$0xff] %v2724_v13  ;;  %v3015_v35 = vpack.c.bf16 %v2724_v13, %v4825_v41 }
 0x917   : > { %v2712_v46 = vpop.permute.xlu1 %2711  ;;  %v2742_v25 = vpop.permute.xlu0 %2741 }
 0x918   : > { %v2715_v40 = vsel %vm484_vm5, %v2710_v36, %v2712_v46  ;;  %v2716_v3 = vsel %vm484_vm5, %v2712_v46, %v2698_v27  ;;  %v2756_v38 = vsel %vm501_vm3, %v2734_v24, %v2742_v25  ;;  %v3028_v46 = vpack.c.bf16 %v4707_v52, %v4694_v10 }
 0x919   : > { %2729 = vst [vmem:[#allocation2 + $0x20] sm:$0xff] %v2715_v40  ;;  %2730 = vst [vmem:[#allocation2 + $0x28] sm:$0xff] %v2716_v3  ;;  %v3017_v43 = vpack.c.bf16 %v2716_v3, %v4815_v44  ;;  %v3016_v18 = vpack.c.bf16 %v2715_v40, %v4822_v50  ;;  %v3018_v41 = vpack.c.bf16 %v2756_v38, %v4834_v15 }
 0x91a   : > { %2760 = vst [vmem:[#allocation2 + $0x48] sm:$0xff] %v2756_v38 }
 0x91b   : > { %v2744_v2 = vpop.permute.xlu1 %2743  ;;  %v2774_v1 = vpop.permute.xlu0 %2773  ;;  %3122 = vmatpush1.bf16.msra.mxu1 %v3017_v43  ;;  %3080 = vmatprep.subr.bf16.mxu0 %v3016_v18 }
 0x91c   : > { %v2747_v49 = vsel %vm501_vm3, %v2742_v25, %v2744_v2  ;;  %v2748_v7 = vsel %vm501_vm3, %v2744_v2, %v2734_v24  ;;  %v2788_v27 = vsel %vm523_vm1, %v2766_v22, %v2774_v1  ;;  %3081 = vmatpush1.bf16.msra.mxu0 %v3015_v35  ;;  %3123 = vmatprep.subr.bf16.mxu1 %v5051_v55 }
 0x91d   : > { %2761 = vst [vmem:[#allocation2 + $0x50] sm:$0xff] %v2747_v49  ;;  %2762 = vst [vmem:[#allocation2 + $0x58] sm:$0xff] %v2748_v7  ;;  %v3020_v44 = vpack.c.bf16 %v2748_v7, %v4819_v12  ;;  %v3019_v50 = vpack.c.bf16 %v2747_v49, %v4831_v61  ;;  %v3021_v15 = vpack.c.bf16 %v2788_v27, %v4845_v60 }
 0x91e   : > { %2792 = vst [vmem:[#allocation2 + $0x78] sm:$0xff] %v2788_v27 }
 0x91f   : > { %v2776_v31 = vpop.permute.xlu1 %2775  ;;  %v2806_v14 = vpop.permute.xlu0 %2805  ;;  %3124 = vmatpush1.bf16.msra.mxu1 %v3020_v44  ;;  %3082 = vmatprep.subr.bf16.mxu0 %v3019_v50 }
 0x920   : > { %v2779_v24 = vsel %vm523_vm1, %v2774_v1, %v2776_v31  ;;  %v2780_v56 = vsel %vm523_vm1, %v2776_v31, %v2766_v22  ;;  %v2820_v62 = vsel %vm548_vm2, %v4865_v11, %v2806_v14  ;;  %3083 = vmatpush1.bf16.msra.mxu0 %v3018_v41  ;;  %3125 = vmatprep.subr.bf16.mxu1 %v5051_v55 }
 0x921   : > { %2793 = vst [vmem:[#allocation2 + $0x80] sm:$0xff] %v2779_v24  ;;  %2794 = vst [vmem:[#allocation2 + $0x88] sm:$0xff] %v2780_v56  ;;  %v3023_v12 = vpack.c.bf16 %v2780_v56, %v4839_v29  ;;  %v3022_v61 = vpack.c.bf16 %v2779_v24, %v4842_v4  ;;  %v3024_v60 = vpack.c.bf16 %v2820_v62, %v4851_v48  ;;  %v5070_v24 = vsub.s32 0, %v5069_v6 }
 0x922   : > { %v3027_v48 = vpack.c.bf16 %v4697_v53, %v4688_v34 }
 0x923   : > { %v2808_v17 = vpop.permute.xlu1 %2807  ;;  %v2898_v20 = vpop.permute.xlu0 %2897  ;;  %3126 = vmatpush1.bf16.msra.mxu1 %v3023_v12  ;;  %3084 = vmatprep.subr.bf16.mxu0 %v3022_v61 }
 0x924   : > { %v2811_v22 = vsel %vm548_vm2, %v2806_v14, %v2808_v17  ;;  %v2812_v37 = vsel %vm548_vm2, %v2808_v17, %v4865_v11  ;;  %v2909_v26 = vsel %vm623_vm7, %v2898_v20, %v4888_v0  ;;  %3085 = vmatpush1.bf16.msra.mxu0 %v3021_v15  ;;  %3127 = vmatprep.subr.bf16.mxu1 %v5051_v55 }
 0x925   : > { %v3026_v29 = vpack.c.bf16 %v2812_v37, %v4858_v63  ;;  %v3025_v4 = vpack.c.bf16 %v2811_v22, %v4855_v21  ;;  %v3029_v21 = vpack.c.bf16 %v4700_v51, %v4691_v58  ;;  %v3068_v14 = vrot.slane %v4792_v30, %v4797_v39 }
 0x927   : > { %v2902_v36 = vpop.permute.xlu1 %2901  ;;  %v2932_v13 = vpop.permute.xlu0 %2931  ;;  %3128 = vmatpush1.bf16.msra.mxu1 %v3026_v29  ;;  %3086 = vmatprep.subr.bf16.mxu0 %v3025_v4 }
 0x928   : > { %v2910_v11 = vsel %vm623_vm7, %v4888_v0, %v2902_v36  ;;  %v2921_v25 = vsel %vm623_vm7, %v2902_v36, %v2898_v20  ;;  %3087 = vmatpush1.bf16.msra.mxu0 %v3024_v60  ;;  %3129 = vmatprep.subr.bf16.mxu1 %v5051_v55  ;;  %v3032_v0 = vpack.c.bf16 %v4893_v9, %v4861_v28 }
 0x929   : > { %3088 = vmatprep.subr.bf16.mxu0 %v3028_v46  ;;  %v3035_v28 = vpack.c.bf16 %v4900_v47, %v4868_v54 }
 0x92b   : > { %v2908_v63 = vpop.permute.xlu1 %2907  ;;  %v2842_v40 = vpop.permute.xlu0 %2841  ;;  %3130 = vmatpush1.bf16.msra.mxu1 %v3029_v21 }
 0x92c   : > { %v2847_v10 = vsel %vm576_vm4, %v4886_v5, %v2842_v40  ;;  %v2848_v52 = vsel %vm576_vm4, %v2842_v40, %v4870_v45  ;;  %3089 = vmatpush1.bf16.msra.mxu0 %v3027_v48  ;;  %3131 = vmatprep.subr.bf16.mxu1 %v5051_v55 }
 0x92d   : > { %v3031_v58 = vpack.c.bf16 %v2848_v52, %v4876_v32  ;;  %v3030_v51 = vpack.c.bf16 %v2847_v10, %v4873_v42 }
 0x92f   : > { %v2904_v34 = vpop.permute.xlu1 %2903  ;;  %v2874_v53 = vpop.permute.xlu0 %2873  ;;  %3132 = vmatpush1.bf16.msra.mxu1 %v3032_v0  ;;  %3090 = vmatprep.subr.bf16.mxu0 %v3031_v58  ;;  %v5071_v0 = vlaneseq }
 0x930   : > { %v2922_v3 = vsel %vm623_vm7, %v2908_v63, %v2904_v34  ;;  %v2879_v5 = vsel %vm601_vm6, %v4895_v8, %v2874_v53  ;;  %v2880_v45 = vsel %vm601_vm6, %v2874_v53, %v4878_v23  ;;  %3091 = vmatpush1.bf16.msra.mxu0 %v3030_v51  ;;  %3133 = vmatprep.subr.bf16.mxu1 %v5051_v55 }
 0x931   : > { %v3034_v42 = vpack.c.bf16 %v2880_v45, %v4884_v33  ;;  %v3033_v32 = vpack.c.bf16 %v2879_v5, %v4881_v19  ;;  %v3038_v35 = vpack.c.bf16 %v2922_v3, %v2921_v25  ;;  %vm3214_vm15 = vcmp.lt.s32.totalorder %v5071_v0, 384 }
 0x933   : > { %v2934_v9 = vpop.permute.xlu1 %2933  ;;  %v2906_v38 = vpop.permute.xlu0 %2905  ;;  %3134 = vmatpush1.bf16.msra.mxu1 %v3035_v28  ;;  %3092 = vmatprep.subr.bf16.mxu0 %v3034_v42 }
 0x934   : > { %v2942_v43 = vsel %vm645_vm8, %v2932_v13, %v2934_v9  ;;  %v2911_v8 = vsel %vm623_vm7, %v2904_v34, %v2906_v38  ;;  %v2912_v23 = vsel %vm623_vm7, %v2906_v38, %v2908_v63  ;;  %3093 = vmatpush1.bf16.msra.mxu0 %v3033_v32  ;;  %3135 = vmatprep.subr.bf16.mxu1 %v5051_v55 }
 0x935   : > { %v3037_v18 = vpack.c.bf16 %v2912_v23, %v2910_v11  ;;  %v3036_v54 = vpack.c.bf16 %v2911_v8, %v2909_v26 }
 0x937   : > { %v2940_v47 = vpop.permute.xlu1 %2939  ;;  %v2938_v33 = vpop.permute.xlu0 %2937  ;;  %3094 = vmatprep.subr.bf16.mxu0 %v3037_v18  ;;  %3136 = vmatpush1.bf16.msra.mxu1 %v3038_v35 }
 0x938   : > { %v2944_v19 = vsel %vm645_vm8, %v2938_v33, %v2940_v47  ;;  %3095 = vmatpush1.bf16.msra.mxu0 %v3036_v54  ;;  %3137 = vmatprep.subr.bf16.mxu1 %v5051_v55 }
 0x939   : > { %v3040_v2 = vpack.c.bf16 %v2944_v19, %v2942_v43 }
 0x93b   : > { %v2936_v1 = vpop.permute.xlu1 %2935  ;;  %v2930_v49 = vpop.permute.xlu0 %2929  ;;  %3096 = vmatprep.subr.bf16.mxu0 %v3040_v2 }
 0x93c   : > { %v2943_v7 = vsel %vm645_vm8, %v2936_v1, %v2938_v33  ;;  %v2954_v27 = vsel %vm645_vm8, %v2940_v47, %v2936_v1  ;;  %v2941_v44 = vsel %vm645_vm8, %v2930_v49, %v2932_v13  ;;  %v2953_v50 = vsel %vm645_vm8, %v2934_v9, %v2930_v49 }
 0x93d   : > { %v3039_v41 = vpack.c.bf16 %v2943_v7, %v2941_v44  ;;  %v3041_v31 = vpack.c.bf16 %v2954_v27, %v2953_v50 }
 0x93f   : > { %3097 = vmatpush1.bf16.msra.mxu0 %v3039_v41  ;;  %3138 = vmatpush1.bf16.msra.mxu1 %v3041_v31 }
 0x942   : > { %3113 = vmatmul.mubr.bf16.vlgmr.msra.gmra.mrb[20].mxu0 %v3068_v14  ;;  %3154 = vmatmul.mubr.bf16.vlgmr.msra.gmra.mrb[20].mxu1 %v3068_v14 }
 0x94c   : > { %v3047_v55 = vpop.permute.xlu0 %3046 }
 0x94d   : > { %v3052_v56 = vrot.slane %v3047_v55, %v5070_v24 }
 0xa15   : > { %v3114_v62 = vpop.f32.mrb[20].mxu0  ;;  %v3155_v12 = vpop.f32.mrb[20].mxu1 }
 0xa16   : > { %v3115_v61 = vadd.f32 %v3114_v62, %v3052_v56  ;;  %v3156_v15 = vadd.f32 %v3155_v12, %v3052_v56  ;;  %v3116_v17 = vpop.f32.mrb[21].mxu0  ;;  %v3157_v20 = vpop.f32.mrb[21].mxu1 }
 0xa17   : > { %v3117_v22 = vadd.f32 %v3116_v17, %v3052_v56  ;;  %v3118_v37 = vpop.f32.mrb[22].mxu0  ;;  %v3158_v26 = vpop.f32.mrb[22].mxu1 }
 0xa18   : > { %v3164_v29 = vrot.slane %v3115_v61, 7  ;;  %v3166_v4 = vrot.slane %v3156_v15, 7  ;;  %v3119_v30 = vpop.f32.mrb[23].mxu0  ;;  %v3159_v60 = vpop.f32.mrb[23].mxu1  ;;  %v3202_v11 = vrot.slane %v3156_v15, %v4797_v39 }
 0xa19   : > { %v3165_v36 = vrot.slane %v3117_v22, 7  ;;  %v3188_v13 = vcombine.low %v3115_v61, %v3117_v22 }
 0xa1a   : > { %v3170_v46 = vmul.f32 %v3164_v29, %v4337_v59  ;;  %v3172_v6 = vmul.f32 %v3166_v4, %v4340_v16 }
 0xa1b   : > { %v3171_v25 = vmul.f32 %v3165_v36, %v4343_v57  ;;  %v3195_v21 = vrot.slane %v3188_v13, %v4797_v39 }
 0xa1c   : > { %v3176_v48 = vrot.slane %v3170_v46, 7  ;;  %v3178_v63 = vrot.slane %v3172_v6, 7 }
 0xa1d   : > { %v3177_v40 = vrot.slane %v3171_v25, 7  ;;  %v3203_v10 = vcombine.low %v3195_v21, %v3202_v11 }
 0xa1e   : > { %v3182_v52 = vadd.f32 %v3176_v48, %v4337_v59  ;;  %v3184_v58 = vadd.f32 %v3178_v63, %v4340_v16 }
 0xa1f   : > { %v3183_v51 = vadd.f32 %v3177_v40, %v4343_v57  ;;  %v3210_v34 = vrot.slane %v3203_v10, %v4797_v39 }
 0xa20   : > { %v3236_v3 = vrot.slane %v3184_v58, %v4797_v39 }
 0xa21   : > { %3333 = vst.msk [vmem:[%s4325_s30 + $0x3] ss:$8 sm:$0x7] %vm3214_vm15, %v3210_v34  ;;  %v3222_v53 = vcombine.low %v3182_v52, %v3183_v51 }
 0xa23   : > { %v3229_v5 = vrot.slane %v3222_v53, %v4797_v39 }
 0xa25   : > { %v3237_v45 = vcombine.low %v3229_v5, %v3236_v3 }
 0xa27   : > { %v3244_v28 = vrot.slane %v3237_v45, %v4797_v39 }
 0xa29   : > { %v3245_v42 = vcombine.high %v3244_v28, %v3244_v28 }
 0xa2b   : > { %3334 = vst.msk [vmem:[%s4325_s30 + $0x4] ss:$8 sm:$0x7] %vm3214_vm15, %v3245_v42 }
 0xa2c PF: > { %s26_s15 = sadd.s32 1, %s3419_s15  }
 0xa2d   : > { %p23_p4 = scmp.ge.s32.totalorder %s26_s15, 4  }
 0xa2f   :  { %25 = sbr.rel (!%p23_p4) target bundleno = 3 (0x3), region = 108 }

</bundles_post_ra>
